<compile_context>
chip_gen: v7x
topology: tpu7x:2x2x1
jax: 0.10.0
libtpu: 0.0.40
codegen_flags: <defaults>
</compile_context>

<pallas_src>
import functools

import jax
import jax.numpy as jnp
from jax.experimental import pallas as pl
from jax.experimental.pallas import tpu as pltpu


def _conv_bn_qrelu_kernel(x_ref, w_ref, s_ref, t_ref, o_ref, *,
                          kh, kw, stride, dilation, oh, ow, act_step, act_qmax):
    """One (batch, Cout-tile) step: fused patch gather + GEMM + BN + uint fake-quant ReLU.

    x_ref: (1, Hp, Wp, Cin)   bf16  padded NHWC image
    w_ref: (KH, KW, Cin, Tco) bf16  integer weight codes (exact)
    s_ref: (1, Tco)           f32   w_scale * bn_scale / act_step
    t_ref: (1, Tco)           f32   bn_shift / act_step
    o_ref: (1, OH, OW, Tco)         quantized activations (q * act_step)
    """
    cin = x_ref.shape[-1]
    tco = o_ref.shape[-1]

    acc = jnp.zeros((oh * ow, tco), jnp.float32)
    for i in range(kh):
        for j in range(kw):
            r0 = i * dilation
            c0 = j * dilation
            if stride == 1:
                p = x_ref[0, r0:r0 + oh, c0:c0 + ow, :]
            else:
                # Contiguous window + reshape-subsample (input padded by stride-1).
                p = x_ref[0, r0:r0 + oh * stride, c0:c0 + ow * stride, :]
                p = p.reshape(oh, stride, ow * stride, cin)[:, 0]
                p = p.reshape(oh, ow, stride, cin)[:, :, 0]
            p = p.reshape(oh * ow, cin)
            acc = acc + jnp.dot(p, w_ref[i, j], preferred_element_type=jnp.float32)

    # BN + ReLU + uint fake-quant, computed in "quant step" units:
    #   q = clip(round(conv*bn_s + bn_t)/step, 0, qmax);  out = q * step
    # (the lower clip at 0 subsumes the ReLU since round is monotone and round(0)=0).
    y = acc * s_ref[...] + t_ref[...]
    q = jnp.clip(jnp.round(y), 0.0, act_qmax)
    o_ref[0] = (q * act_step).reshape(oh, ow, tco).astype(o_ref.dtype)


def _vmem_limit_bytes(block_shapes_dtypes):
    """Conservative VMEM budget: 2x (double-buffered) padded block bytes + headroom,
    capped at 3/4 of this chip's VMEM capacity (v7x has only 64 MiB per core)."""
    def padded_bytes(shape, dtype):
        s = [int(d) for d in shape]
        if len(s) >= 1:
            s[-1] = -(-s[-1] // 128) * 128
        if len(s) >= 2:
            s[-2] = -(-s[-2] // 16) * 16
        n = 1
        for d in s:
            n *= d
        return n * jnp.dtype(dtype).itemsize

    need = 2 * sum(padded_bytes(s, d) for s, d in block_shapes_dtypes)
    try:
        cap = int(pltpu.get_tpu_info().vmem_capacity_bytes)
    except Exception:
        cap = 64 << 20  # assume the smallest per-core VMEM (v7x)
    return int(min(max(need + (8 << 20), 32 << 20), (cap * 3) // 4))


def building_block_forward(x, params, *, kernel_size, stride, dilation, padding,
                           groups, weight_bit_width, act_bit_width,
                           act_scale=6.0, out_dtype=jnp.bfloat16, nchw_output=True):
    assert groups == 1  # TODO(synk): grouped / depthwise conv not implemented.
    del kernel_size  # taken from the weight shape

    w = params["conv_w"]
    cout, cin, kh, kw = w.shape

    # Brevitas CommonIntWeightPerChannelQuant: symmetric narrow-range int, per-channel
    # scale.  Keep the integer codes for the GEMM (exact in bf16) and move the scale to
    # the f32 epilogue so no bf16 folding error compounds on the quantization.
    wq_max = 2.0 ** (weight_bit_width - 1) - 1.0
    absmax = jnp.max(jnp.abs(w.reshape(cout, -1)), axis=1)
    w_scale = jnp.maximum(absmax, 1e-12) / wq_max
    w_codes = jnp.clip(jnp.round(w / w_scale.reshape(-1, 1, 1, 1)), -wq_max, wq_max)

    # BatchNorm2d (inference, running stats) folded to per-channel scale/shift.
    eps = 1e-5
    inv_std = 1.0 / jnp.sqrt(params["bn_var"] + eps)
    bn_s = params["bn_gamma"] * inv_std
    bn_t = params["bn_beta"] - params["bn_mean"] * bn_s

    # TODO(synk): Brevitas CommonUintActQuant learns its scale; a fixed scale is used.
    act_qmax = 2.0 ** act_bit_width - 1.0
    act_step = float(act_scale) / act_qmax

    s_vec = (w_scale * bn_s / act_step).reshape(1, cout).astype(jnp.float32)
    t_vec = (bn_t / act_step).reshape(1, cout).astype(jnp.float32)

    # HWIO weight codes (kh, kw, cin, cout): channels-last matches the NHWC gather.
    w_hwio = w_codes.transpose(2, 3, 1, 0).astype(jnp.bfloat16)

    n, _, h, wd = x.shape
    oh = (h + 2 * padding - dilation * (kh - 1) - 1) // stride + 1
    ow = (wd + 2 * padding - dilation * (kw - 1) - 1) // stride + 1

    # NCHW -> NHWC once at the module boundary.
    # TODO(synk): keep NHWC through stacked BuildingBlocks; transpose at the model edge.
    x_nhwc = x.transpose(0, 2, 3, 1).astype(jnp.bfloat16)
    extra = (stride - 1) if stride > 1 else 0  # room for the reshape-subsample trick
    xp = jnp.pad(x_nhwc, ((0, 0), (padding, padding + extra),
                          (padding, padding + extra), (0, 0)))
    hp, wp = xp.shape[1], xp.shape[2]

    # Cout tile: full Cout when it is not a 128-multiple (no output lane padding for
    # small Cout); otherwise lane-dense 128/256-wide tiles.
    tco = min(cout, 256) if cout % 128 == 0 else cout
    assert cout % tco == 0

    grid = (n, cout // tco)

    vmem_limit = _vmem_limit_bytes([
        ((1, hp, wp, cin), jnp.bfloat16),
        ((kh, kw, cin, tco), jnp.bfloat16),
        ((1, tco), jnp.float32),
        ((1, tco), jnp.float32),
        ((1, oh, ow, tco), out_dtype),
    ])

    kernel = functools.partial(
        _conv_bn_qrelu_kernel, kh=kh, kw=kw, stride=stride, dilation=dilation,
        oh=oh, ow=ow, act_step=act_step, act_qmax=act_qmax)

    out = pl.pallas_call(
        kernel,
        out_shape=jax.ShapeDtypeStruct((n, oh, ow, cout), out_dtype),
        grid_spec=pltpu.PrefetchScalarGridSpec(
            num_scalar_prefetch=0,
            grid=grid,
            in_specs=[
                pl.BlockSpec((1, hp, wp, cin), lambda b, co: (b, 0, 0, 0)),
                pl.BlockSpec((kh, kw, cin, tco), lambda b, co: (0, 0, 0, co)),
                pl.BlockSpec((1, tco), lambda b, co: (0, co)),
                pl.BlockSpec((1, tco), lambda b, co: (0, co)),
            ],
            out_specs=pl.BlockSpec((1, oh, ow, tco), lambda b, co: (b, 0, 0, co)),
        ),
        compiler_params=pltpu.CompilerParams(
            dimension_semantics=("parallel", "parallel"),
            vmem_limit_bytes=vmem_limit,
        ),
    )(xp, w_hwio, s_vec, t_vec)

    if nchw_output:
        out = out.transpose(0, 3, 1, 2)
    return out


def _reference(x, params, *, stride, dilation, padding, weight_bit_width,
               act_bit_width, act_scale=6.0):
    # Pure-JAX f32 reference of conv -> BN (inference) -> uint fake-quant ReLU.
    w = params["conv_w"]
    cout = w.shape[0]
    wq_max = 2.0 ** (weight_bit_width - 1) - 1.0
    absmax = jnp.max(jnp.abs(w.reshape(cout, -1)), axis=1)
    scale = (jnp.maximum(absmax, 1e-12) / wq_max).reshape(-1, 1, 1, 1)
    w_fq = jnp.clip(jnp.round(w / scale), -wq_max, wq_max) * scale
    y = jax.lax.conv_general_dilated(
        x, w_fq, window_strides=(stride, stride),
        padding=[(padding, padding), (padding, padding)],
        rhs_dilation=(dilation, dilation),
        dimension_numbers=("NCHW", "OIHW", "NCHW"))
    eps = 1e-5
    inv_std = 1.0 / jnp.sqrt(params["bn_var"] + eps)
    s = (params["bn_gamma"] * inv_std).reshape(1, -1, 1, 1)
    t = (params["bn_beta"] - params["bn_mean"] * params["bn_gamma"] * inv_std
         ).reshape(1, -1, 1, 1)
    y = jnp.maximum(y * s + t, 0.0)
    qmax = 2.0 ** act_bit_width - 1.0
    step = float(act_scale) / qmax
    return jnp.clip(jnp.round(y / step), 0.0, qmax) * step


if __name__ == "__main__":
    key = jax.random.PRNGKey(0)
    in_ch, out_ch = 4, 8
    ksz, stride, dil, pad, grp = 3, 1, 1, 1, 1
    wbw, abw = 4, 4

    k_x, k_w, k_g, k_b, k_m, k_v = jax.random.split(key, 6)
    x = jax.random.normal(k_x, (2, in_ch, 16, 16), jnp.float32)
    params = {
        "conv_w": 0.1 * jax.random.normal(k_w, (out_ch, in_ch, ksz, ksz), jnp.float32),
        "bn_gamma": 1.0 + 0.1 * jax.random.normal(k_g, (out_ch,), jnp.float32),
        "bn_beta": 0.1 * jax.random.normal(k_b, (out_ch,), jnp.float32),
        "bn_mean": 0.05 * jax.random.normal(k_m, (out_ch,), jnp.float32),
        "bn_var": 1.0 + 0.1 * jax.random.uniform(k_v, (out_ch,), jnp.float32),
    }

    y = building_block_forward(
        x, params, kernel_size=ksz, stride=stride, dilation=dil, padding=pad,
        groups=grp, weight_bit_width=wbw, act_bit_width=abw)
    jax.block_until_ready(y)
    assert y.shape == (2, out_ch, 16, 16), y.shape

    # Correctness: bf16 activations/output may flip a rounding boundary by at most one
    # quant step (plus tiny bf16 output representation error).
    y_ref = _reference(x, params, stride=stride, dilation=dil, padding=pad,
                       weight_bit_width=wbw, act_bit_width=abw)
    act_step = 6.0 / (2.0 ** abw - 1.0)
    err = float(jnp.max(jnp.abs(y.astype(jnp.float32) - y_ref)))
    assert err <= act_step + 5e-2, err

    print("KERNEL_OK")
</pallas_src>

<mosaic_0001>
module attributes {stable_mosaic.version = 11 : i64} {
  func.func @_conv_bn_qrelu_kernel(%arg0: i32, %arg1: i32, %arg2: memref<1x18x18x4xbf16, #tpu.memory_space<vmem>>, %arg3: memref<3x3x4x8xbf16, #tpu.memory_space<vmem>>, %arg4: memref<1x8xf32, #tpu.memory_space<vmem>>, %arg5: memref<1x8xf32, #tpu.memory_space<vmem>>, %arg6: memref<1x16x16x8xbf16, #tpu.memory_space<vmem>>) attributes {dimension_semantics = [#tpu.dimension_semantics<parallel>, #tpu.dimension_semantics<parallel>], iteration_bounds = array<i64: 2, 1>, scalar_prefetch = 0 : i64, scratch_operands = 0 : i64, tpu.core_type = #tpu.core_type<tc>, window_params = [{transform_indices = @transform_0, window_bounds = array<i64: 1, 18, 18, 4>}, {transform_indices = @transform_1, window_bounds = array<i64: 3, 3, 4, 8>}, {transform_indices = @transform_2, window_bounds = array<i64: 1, 8>}, {transform_indices = @transform_3, window_bounds = array<i64: 1, 8>}, {transform_indices = @transform_4, window_bounds = array<i64: 1, 16, 16, 8>}]} {
    %cst = arith.constant 0.000000e+00 : f32
    %0 = vector.broadcast %cst : f32 to vector<256x8xf32>
    %c0 = arith.constant 0 : index
    %c0_0 = arith.constant 0 : index
    %c0_1 = arith.constant 0 : index
    %c0_2 = arith.constant 0 : index
    %1 = vector.load %arg2[%c0, %c0_0, %c0_1, %c0_2] : memref<1x18x18x4xbf16, #tpu.memory_space<vmem>>, vector<1x16x16x4xbf16>
    %2 = vector.shape_cast %1 : vector<1x16x16x4xbf16> to vector<16x16x4xbf16>
    %3 = vector.shape_cast %2 : vector<16x16x4xbf16> to vector<256x4xbf16>
    %c0_3 = arith.constant 0 : index
    %c0_4 = arith.constant 0 : index
    %c0_5 = arith.constant 0 : index
    %c0_6 = arith.constant 0 : index
    %4 = vector.load %arg3[%c0_3, %c0_4, %c0_5, %c0_6] : memref<3x3x4x8xbf16, #tpu.memory_space<vmem>>, vector<1x1x4x8xbf16>
    %5 = vector.shape_cast %4 : vector<1x1x4x8xbf16> to vector<4x8xbf16>
    %cst_7 = arith.constant dense<0.000000e+00> : vector<256x8xf32>
    %6 = tpu.matmul %3, %5, %cst_7 {dimension_numbers = #tpu.dot_dimension_numbers<[1], [0], [0], [1], [0, 0, 1, 1], [], []>} : vector<256x4xbf16>, vector<4x8xbf16>, vector<256x8xf32> -> vector<256x8xf32>
    %7 = arith.addf %0, %6 : vector<256x8xf32>
    %c0_8 = arith.constant 0 : index
    %c0_9 = arith.constant 0 : index
    %c1 = arith.constant 1 : index
    %c0_10 = arith.constant 0 : index
    %8 = vector.load %arg2[%c0_8, %c0_9, %c1, %c0_10] : memref<1x18x18x4xbf16, #tpu.memory_space<vmem>>, vector<1x16x16x4xbf16>
    %9 = vector.shape_cast %8 : vector<1x16x16x4xbf16> to vector<16x16x4xbf16>
    %10 = vector.shape_cast %9 : vector<16x16x4xbf16> to vector<256x4xbf16>
    %c0_11 = arith.constant 0 : index
    %c1_12 = arith.constant 1 : index
    %c0_13 = arith.constant 0 : index
    %c0_14 = arith.constant 0 : index
    %11 = vector.load %arg3[%c0_11, %c1_12, %c0_13, %c0_14] : memref<3x3x4x8xbf16, #tpu.memory_space<vmem>>, vector<1x1x4x8xbf16>
    %12 = vector.shape_cast %11 : vector<1x1x4x8xbf16> to vector<4x8xbf16>
    %cst_15 = arith.constant dense<0.000000e+00> : vector<256x8xf32>
    %13 = tpu.matmul %10, %12, %cst_15 {dimension_numbers = #tpu.dot_dimension_numbers<[1], [0], [0], [1], [0, 0, 1, 1], [], []>} : vector<256x4xbf16>, vector<4x8xbf16>, vector<256x8xf32> -> vector<256x8xf32>
    %14 = arith.addf %7, %13 : vector<256x8xf32>
    %c0_16 = arith.constant 0 : index
    %c0_17 = arith.constant 0 : index
    %c2 = arith.constant 2 : index
    %c0_18 = arith.constant 0 : index
    %15 = vector.load %arg2[%c0_16, %c0_17, %c2, %c0_18] : memref<1x18x18x4xbf16, #tpu.memory_space<vmem>>, vector<1x16x16x4xbf16>
    %16 = vector.shape_cast %15 : vector<1x16x16x4xbf16> to vector<16x16x4xbf16>
    %17 = vector.shape_cast %16 : vector<16x16x4xbf16> to vector<256x4xbf16>
    %c0_19 = arith.constant 0 : index
    %c2_20 = arith.constant 2 : index
    %c0_21 = arith.constant 0 : index
    %c0_22 = arith.constant 0 : index
    %18 = vector.load %arg3[%c0_19, %c2_20, %c0_21, %c0_22] : memref<3x3x4x8xbf16, #tpu.memory_space<vmem>>, vector<1x1x4x8xbf16>
    %19 = vector.shape_cast %18 : vector<1x1x4x8xbf16> to vector<4x8xbf16>
    %cst_23 = arith.constant dense<0.000000e+00> : vector<256x8xf32>
    %20 = tpu.matmul %17, %19, %cst_23 {dimension_numbers = #tpu.dot_dimension_numbers<[1], [0], [0], [1], [0, 0, 1, 1], [], []>} : vector<256x4xbf16>, vector<4x8xbf16>, vector<256x8xf32> -> vector<256x8xf32>
    %21 = arith.addf %14, %20 : vector<256x8xf32>
    %c0_24 = arith.constant 0 : index
    %c1_25 = arith.constant 1 : index
    %c0_26 = arith.constant 0 : index
    %c0_27 = arith.constant 0 : index
    %22 = vector.load %arg2[%c0_24, %c1_25, %c0_26, %c0_27] : memref<1x18x18x4xbf16, #tpu.memory_space<vmem>>, vector<1x16x16x4xbf16>
    %23 = vector.shape_cast %22 : vector<1x16x16x4xbf16> to vector<16x16x4xbf16>
    %24 = vector.shape_cast %23 : vector<16x16x4xbf16> to vector<256x4xbf16>
    %c1_28 = arith.constant 1 : index
    %c0_29 = arith.constant 0 : index
    %c0_30 = arith.constant 0 : index
    %c0_31 = arith.constant 0 : index
    %25 = vector.load %arg3[%c1_28, %c0_29, %c0_30, %c0_31] : memref<3x3x4x8xbf16, #tpu.memory_space<vmem>>, vector<1x1x4x8xbf16>
    %26 = vector.shape_cast %25 : vector<1x1x4x8xbf16> to vector<4x8xbf16>
    %cst_32 = arith.constant dense<0.000000e+00> : vector<256x8xf32>
    %27 = tpu.matmul %24, %26, %cst_32 {dimension_numbers = #tpu.dot_dimension_numbers<[1], [0], [0], [1], [0, 0, 1, 1], [], []>} : vector<256x4xbf16>, vector<4x8xbf16>, vector<256x8xf32> -> vector<256x8xf32>
    %28 = arith.addf %21, %27 : vector<256x8xf32>
    %c0_33 = arith.constant 0 : index
    %c1_34 = arith.constant 1 : index
    %c1_35 = arith.constant 1 : index
    %c0_36 = arith.constant 0 : index
    %29 = vector.load %arg2[%c0_33, %c1_34, %c1_35, %c0_36] : memref<1x18x18x4xbf16, #tpu.memory_space<vmem>>, vector<1x16x16x4xbf16>
    %30 = vector.shape_cast %29 : vector<1x16x16x4xbf16> to vector<16x16x4xbf16>
    %31 = vector.shape_cast %30 : vector<16x16x4xbf16> to vector<256x4xbf16>
    %c1_37 = arith.constant 1 : index
    %c1_38 = arith.constant 1 : index
    %c0_39 = arith.constant 0 : index
    %c0_40 = arith.constant 0 : index
    %32 = vector.load %arg3[%c1_37, %c1_38, %c0_39, %c0_40] : memref<3x3x4x8xbf16, #tpu.memory_space<vmem>>, vector<1x1x4x8xbf16>
    %33 = vector.shape_cast %32 : vector<1x1x4x8xbf16> to vector<4x8xbf16>
    %cst_41 = arith.constant dense<0.000000e+00> : vector<256x8xf32>
    %34 = tpu.matmul %31, %33, %cst_41 {dimension_numbers = #tpu.dot_dimension_numbers<[1], [0], [0], [1], [0, 0, 1, 1], [], []>} : vector<256x4xbf16>, vector<4x8xbf16>, vector<256x8xf32> -> vector<256x8xf32>
    %35 = arith.addf %28, %34 : vector<256x8xf32>
    %c0_42 = arith.constant 0 : index
    %c1_43 = arith.constant 1 : index
    %c2_44 = arith.constant 2 : index
    %c0_45 = arith.constant 0 : index
    %36 = vector.load %arg2[%c0_42, %c1_43, %c2_44, %c0_45] : memref<1x18x18x4xbf16, #tpu.memory_space<vmem>>, vector<1x16x16x4xbf16>
    %37 = vector.shape_cast %36 : vector<1x16x16x4xbf16> to vector<16x16x4xbf16>
    %38 = vector.shape_cast %37 : vector<16x16x4xbf16> to vector<256x4xbf16>
    %c1_46 = arith.constant 1 : index
    %c2_47 = arith.constant 2 : index
    %c0_48 = arith.constant 0 : index
    %c0_49 = arith.constant 0 : index
    %39 = vector.load %arg3[%c1_46, %c2_47, %c0_48, %c0_49] : memref<3x3x4x8xbf16, #tpu.memory_space<vmem>>, vector<1x1x4x8xbf16>
    %40 = vector.shape_cast %39 : vector<1x1x4x8xbf16> to vector<4x8xbf16>
    %cst_50 = arith.constant dense<0.000000e+00> : vector<256x8xf32>
    %41 = tpu.matmul %38, %40, %cst_50 {dimension_numbers = #tpu.dot_dimension_numbers<[1], [0], [0], [1], [0, 0, 1, 1], [], []>} : vector<256x4xbf16>, vector<4x8xbf16>, vector<256x8xf32> -> vector<256x8xf32>
    %42 = arith.addf %35, %41 : vector<256x8xf32>
    %c0_51 = arith.constant 0 : index
    %c2_52 = arith.constant 2 : index
    %c0_53 = arith.constant 0 : index
    %c0_54 = arith.constant 0 : index
    %43 = vector.load %arg2[%c0_51, %c2_52, %c0_53, %c0_54] : memref<1x18x18x4xbf16, #tpu.memory_space<vmem>>, vector<1x16x16x4xbf16>
    %44 = vector.shape_cast %43 : vector<1x16x16x4xbf16> to vector<16x16x4xbf16>
    %45 = vector.shape_cast %44 : vector<16x16x4xbf16> to vector<256x4xbf16>
    %c2_55 = arith.constant 2 : index
    %c0_56 = arith.constant 0 : index
    %c0_57 = arith.constant 0 : index
    %c0_58 = arith.constant 0 : index
    %46 = vector.load %arg3[%c2_55, %c0_56, %c0_57, %c0_58] : memref<3x3x4x8xbf16, #tpu.memory_space<vmem>>, vector<1x1x4x8xbf16>
    %47 = vector.shape_cast %46 : vector<1x1x4x8xbf16> to vector<4x8xbf16>
    %cst_59 = arith.constant dense<0.000000e+00> : vector<256x8xf32>
    %48 = tpu.matmul %45, %47, %cst_59 {dimension_numbers = #tpu.dot_dimension_numbers<[1], [0], [0], [1], [0, 0, 1, 1], [], []>} : vector<256x4xbf16>, vector<4x8xbf16>, vector<256x8xf32> -> vector<256x8xf32>
    %49 = arith.addf %42, %48 : vector<256x8xf32>
    %c0_60 = arith.constant 0 : index
    %c2_61 = arith.constant 2 : index
    %c1_62 = arith.constant 1 : index
    %c0_63 = arith.constant 0 : index
    %50 = vector.load %arg2[%c0_60, %c2_61, %c1_62, %c0_63] : memref<1x18x18x4xbf16, #tpu.memory_space<vmem>>, vector<1x16x16x4xbf16>
    %51 = vector.shape_cast %50 : vector<1x16x16x4xbf16> to vector<16x16x4xbf16>
    %52 = vector.shape_cast %51 : vector<16x16x4xbf16> to vector<256x4xbf16>
    %c2_64 = arith.constant 2 : index
    %c1_65 = arith.constant 1 : index
    %c0_66 = arith.constant 0 : index
    %c0_67 = arith.constant 0 : index
    %53 = vector.load %arg3[%c2_64, %c1_65, %c0_66, %c0_67] : memref<3x3x4x8xbf16, #tpu.memory_space<vmem>>, vector<1x1x4x8xbf16>
    %54 = vector.shape_cast %53 : vector<1x1x4x8xbf16> to vector<4x8xbf16>
    %cst_68 = arith.constant dense<0.000000e+00> : vector<256x8xf32>
    %55 = tpu.matmul %52, %54, %cst_68 {dimension_numbers = #tpu.dot_dimension_numbers<[1], [0], [0], [1], [0, 0, 1, 1], [], []>} : vector<256x4xbf16>, vector<4x8xbf16>, vector<256x8xf32> -> vector<256x8xf32>
    %56 = arith.addf %49, %55 : vector<256x8xf32>
    %c0_69 = arith.constant 0 : index
    %c2_70 = arith.constant 2 : index
    %c2_71 = arith.constant 2 : index
    %c0_72 = arith.constant 0 : index
    %57 = vector.load %arg2[%c0_69, %c2_70, %c2_71, %c0_72] : memref<1x18x18x4xbf16, #tpu.memory_space<vmem>>, vector<1x16x16x4xbf16>
    %58 = vector.shape_cast %57 : vector<1x16x16x4xbf16> to vector<16x16x4xbf16>
    %59 = vector.shape_cast %58 : vector<16x16x4xbf16> to vector<256x4xbf16>
    %c2_73 = arith.constant 2 : index
    %c2_74 = arith.constant 2 : index
    %c0_75 = arith.constant 0 : index
    %c0_76 = arith.constant 0 : index
    %60 = vector.load %arg3[%c2_73, %c2_74, %c0_75, %c0_76] : memref<3x3x4x8xbf16, #tpu.memory_space<vmem>>, vector<1x1x4x8xbf16>
    %61 = vector.shape_cast %60 : vector<1x1x4x8xbf16> to vector<4x8xbf16>
    %cst_77 = arith.constant dense<0.000000e+00> : vector<256x8xf32>
    %62 = tpu.matmul %59, %61, %cst_77 {dimension_numbers = #tpu.dot_dimension_numbers<[1], [0], [0], [1], [0, 0, 1, 1], [], []>} : vector<256x4xbf16>, vector<4x8xbf16>, vector<256x8xf32> -> vector<256x8xf32>
    %63 = arith.addf %56, %62 : vector<256x8xf32>
    %c0_78 = arith.constant 0 : index
    %c0_79 = arith.constant 0 : index
    %64 = vector.load %arg4[%c0_78, %c0_79] : memref<1x8xf32, #tpu.memory_space<vmem>>, vector<1x8xf32>
    %65 = vector.broadcast %64 : vector<1x8xf32> to vector<256x8xf32>
    %66 = arith.mulf %63, %65 : vector<256x8xf32>
    %c0_80 = arith.constant 0 : index
    %c0_81 = arith.constant 0 : index
    %67 = vector.load %arg5[%c0_80, %c0_81] : memref<1x8xf32, #tpu.memory_space<vmem>>, vector<1x8xf32>
    %68 = vector.broadcast %67 : vector<1x8xf32> to vector<256x8xf32>
    %69 = arith.addf %66, %68 : vector<256x8xf32>
    %70 = math.roundeven %69 : vector<256x8xf32>
    %cst_82 = arith.constant 0.000000e+00 : f32
    %cst_83 = arith.constant 1.500000e+01 : f32
    %71 = vector.broadcast %cst_82 : f32 to vector<256x8xf32>
    %72 = arith.maximumf %71, %70 : vector<256x8xf32>
    %73 = vector.broadcast %cst_83 : f32 to vector<256x8xf32>
    %74 = arith.minimumf %73, %72 : vector<256x8xf32>
    %cst_84 = arith.constant 4.000000e-01 : f32
    %75 = vector.broadcast %cst_84 : f32 to vector<256x8xf32>
    %76 = arith.mulf %74, %75 : vector<256x8xf32>
    %77 = vector.shape_cast %76 : vector<256x8xf32> to vector<16x16x8xf32>
    %78 = arith.truncf %77 : vector<16x16x8xf32> to vector<16x16x8xbf16>
    %c0_85 = arith.constant 0 : index
    %c0_86 = arith.constant 0 : index
    %c0_87 = arith.constant 0 : index
    %c0_88 = arith.constant 0 : index
    %79 = vector.load %arg6[%c0_85, %c0_86, %c0_87, %c0_88] : memref<1x16x16x8xbf16, #tpu.memory_space<vmem>>, vector<1x16x16x8xbf16>
    %80 = vector.shape_cast %79 : vector<1x16x16x8xbf16> to vector<16x16x8xbf16>
    %81 = vector.shape_cast %78 : vector<16x16x8xbf16> to vector<1x16x16x8xbf16>
    tpu.vector_store %arg6[%c0_85, %c0_86, %c0_87, %c0_88], %81 {strides = array<i32>} : memref<1x16x16x8xbf16, #tpu.memory_space<vmem>>, vector<1x16x16x8xbf16>,
    return
  }
  func.func @transform_0(%arg0: i32, %arg1: i32) -> (i32, i32, i32, i32) {
    %c0_i32 = arith.constant 0 : i32
    %c0_i32_0 = arith.constant 0 : i32
    %c0_i32_1 = arith.constant 0 : i32
    %c0_i32_2 = arith.constant 0 : i32
    return %arg0, %c0_i32, %c0_i32_0, %c0_i32_1 : i32, i32, i32, i32
  }
  func.func @transform_1(%arg0: i32, %arg1: i32) -> (i32, i32, i32, i32) {
    %c0_i32 = arith.constant 0 : i32
    %c0_i32_0 = arith.constant 0 : i32
    %c0_i32_1 = arith.constant 0 : i32
    %c0_i32_2 = arith.constant 0 : i32
    return %c0_i32, %c0_i32_0, %c0_i32_1, %arg1 : i32, i32, i32, i32
  }
  func.func @transform_2(%arg0: i32, %arg1: i32) -> (i32, i32) {
    %c0_i32 = arith.constant 0 : i32
    %c0_i32_0 = arith.constant 0 : i32
    return %c0_i32, %arg1 : i32, i32
  }
  func.func @transform_3(%arg0: i32, %arg1: i32) -> (i32, i32) {
    %c0_i32 = arith.constant 0 : i32
    %c0_i32_0 = arith.constant 0 : i32
    return %c0_i32, %arg1 : i32, i32
  }
  func.func @transform_4(%arg0: i32, %arg1: i32) -> (i32, i32, i32, i32) {
    %c0_i32 = arith.constant 0 : i32
    %c0_i32_0 = arith.constant 0 : i32
    %c0_i32_1 = arith.constant 0 : i32
    return %arg0, %c0_i32, %c0_i32_0, %arg1 : i32, i32, i32, i32
  }
}

</mosaic_0001>

<bundles_post_ra>
// kernel: tpu_custom_call.1
= control target key start
LH: loop header
LB: loop body
LE: loop exit
PB: predicated region body
PF: predicated region fallthrough
CT: control target
= control target key end

     0   :  { %s6861_s15 = smov 0   ;;  %s6863_s16 = smov 0   ;;  %s8759_s0 = inlined_call_operand.vmem [shape: bf16[2,18,18,4], index: 0, kind: input, shape index: {}]   ;;  %s8760_s1 = inlined_call_operand.vmem [shape: bf16[3,3,4,8], index: 1, kind: input, shape index: {}]   ;;  %s8761_s2 = inlined_call_operand.vmem [shape: f32[1,8], index: 2, kind: input, shape index: {}]   ;;  %s8762_s3 = inlined_call_operand.vmem [shape: f32[1,8], index: 3, kind: input, shape index: {}]   ;;  %s8763_s4 = inlined_call_operand.vmem [shape: bf16[2,16,16,8], index: 4, kind: output, shape index: {}]  }
   0x1   :  { %s6865_s17 = smov 0  }
   0x2 LB: > { %s26_s18 = sadd.s32 1, %s6830_s16  ;;  %p5314_p0 = scmp.ge.s32.totalorder %s6834_s17, 1  ;;  %s6834_s17 = sphi %s6865_s17, %s14_s17   ;;  %s6830_s16 = sphi %s6863_s16, %s8832_s16   ;;  %s6826_s15 = sphi %s6861_s15, %s8831_s15  }
   0x3   : > { %p28_p1 = scmp.ge.s32.totalorder %s26_s18, 2  ;;  %p201_p2 = scmp.lt.s32.totalorder %s6834_s17, 3 }
   0x5   : > { %s8834_s18 = smov (%p28_p1, %s26_s18), 0  ;;  %p202_p3 = pnand %p5314_p0, %p201_p2 }
   0x7   : > { %205 = sbr.rel (%p202_p3) target bundleno = 598 (0x256), region = 36 }
   0xe   : > { %v5318_v0 = vld [vmem:[%s8760_s1 + $0x2] sm:$0x3]  ;;  %vm799_vm0 = vcmask 1041408   ;;  %v5545_v1 = vld [vmem:[%s8760_s1 + $0x8] sm:$0x3]  ;;  %p240_p4 = scmp.lt.s32.totalorder %s6826_s15, 1 }
   0xf   : > { %6640 = vmatprep.subr.msk.bf16.mxu1 %vm799_vm0, %v5318_v0  ;;  %6644 = vmatprep.subr.msk.bf16.mxu0 %vm799_vm0, %v5545_v1  ;;  %v801_v2 = vsel %vm799_vm0, %v5318_v0, 0  ;;  %v6889_v3 = vsel %vm799_vm0, %v5545_v1, 0  ;;  %v296_v4 = vld [vmem:[%s8760_s1] sm:$0x3]  ;;  %v5610_v5 = vld [vmem:[%s8760_s1 + $0xa] sm:$0x3] }
  0x10   : > { %8777 = vst [vmem:[#allocation2_spill] sm:$0xff] %v6889_v3  ;;  %6077 = vmatpush3.bf16.msra.mxu1 %v801_v2  ;;  %6213 = vmatpush3.bf16.msra.mxu0 %v6889_v3  ;;  %s8836_s15 = smov (!%p240_p4, %s6826_s15), 1  ;;  %vm313_vm1 = vsmask.f32 3328  ;;  %vm314_vm2 = vsmask.f32 7440 }
  0x11   : > { %6641 = vmatprep.subr.msk.bf16.mxu1 %vm799_vm0, %v296_v4  ;;  %6646 = vmatprep.subr.msk.bf16.mxu0 %vm799_vm0, %v5610_v5  ;;  %s6650_s27 = smul.u32 216, %s8836_s15  ;;  %vm750_vm3 = vcmask 31744   ;;  %v6919_v17 = vsel %vm799_vm0, %v296_v4, 0  ;;  %v6925_v26 = vld [vmem:[%s8760_s1 + $0xc] sm:$0x3]  ;;  %vm6932_vm4 = vmor %vm313_vm1, %vm314_vm2  ;;  %v6938_v37 = vsel %vm799_vm0, %v5610_v5, 0 }
  0x12   : > { %v6942_v41 = vsel %vm799_vm0, %v6925_v26, 0  ;;  %vm1304_vm5 = vcmask 1042432   ;;  %vm1305_vm6 = vcmask 1046532   ;;  %vm5157_vm8 = vcmask 60416  }
  0x13   : > { %s6906_s30 = scalar_lea.vmem %s8759_s0, %s6650_s27  ;;  %vm7158_vm7 = vmor %vm1304_vm5, %vm1305_vm6  ;;  %s5890_s27 = sshll.u32 %s8836_s15, 7 }
  0x14   : > { %v264_v6 = vld [vmem:[%s6906_s30] sm:$0xf]  ;;  %v265_v7 = vld [vmem:[%s6906_s30 + $0x4] sm:$0xf]  ;;  %v297_v8 = vld [vmem:[%s6906_s30 + $0x8] sm:$0x1]  ;;  %s8624_s15 = scalar_lea.vmem %s8763_s4, %s5890_s27 }
  0x15   : > { %v317_v9 = vshrl.u32 %v264_v6, 16  ;;  %v320_v10 = vshll.u32 %v264_v6, 16  ;;  %v326_v11 = vshll.u32 %v265_v7, 16  ;;  %v330_v12 = vshrl.u32 %v265_v7, 16  ;;  %v5497_v13 = vld [vmem:[%s6906_s30 + $0xc] sm:$0xf] }
  0x16   : > { %v336_v14 = vshll.u32 %v297_v8, 16  ;;  %v6913_v15 = vld [vmem:[%s6906_s30 + $0x10] sm:$0xf]  ;;  %v6916_v16 = vld [vmem:[%s6906_s30 + $0x14] sm:$0x1]  ;;  %v2121_v23 = vshrl.u32 %v5497_v13, 16 }
  0x17   : > { %v319_v18 = vrot.slane %v317_v9, 4  ;;  %v322_v19 = vrot.slane %v320_v10, 5  ;;  %v328_v20 = vrot.slane %v326_v11, 5  ;;  %v332_v21 = vrot.slane %v330_v12, 4  ;;  %v266_v31 = vld [vmem:[%s6906_s30 + $0xc] sm:$0xf] }
  0x18   : > { %v338_v22 = vrot.slane %v336_v14, 5  ;;  %v2124_v24 = vshll.u32 %v5497_v13, 16  ;;  %v2130_v25 = vshll.u32 %v6913_v15, 16  ;;  %v2134_v29 = vshrl.u32 %v6913_v15, 16  ;;  %v267_v36 = vld [vmem:[%s6906_s30 + $0x10] sm:$0xf] }
  0x19   : > { %v323_v27 = vor.u32 %v322_v19, %v319_v18  ;;  %v333_v28 = vor.u32 %v332_v21, %v328_v20  ;;  %v2140_v30 = vshll.u32 %v6916_v16, 16  ;;  %v2123_v33 = vrot.slane %v2121_v23, 4  ;;  %v298_v44 = vld [vmem:[%s6906_s30 + $0x14] sm:$0x1]  ;;  %v5500_v55 = vld [vmem:[%s6906_s30 + $0x18] sm:$0xf] }
  0x1a   : > { %v2126_v34 = vrot.slane %v2124_v24, 5  ;;  %v2132_v35 = vrot.slane %v2130_v25, 5  ;;  %v2136_v40 = vrot.slane %v2134_v29, 4  ;;  %v341_v45 = vshrl.u32 %v266_v31, 16  ;;  %v6951_v60 = vld [vmem:[%s6906_s30 + $0x1c] sm:$0xf] }
  0x1b   : > { %v324_v38 = vrot.slane %v323_v27, 4  ;;  %v334_v39 = vrot.slane %v333_v28, 4  ;;  %v2142_v43 = vrot.slane %v2140_v30, 5  ;;  %v344_v46 = vshll.u32 %v266_v31, 16  ;;  %v6959_v1 = vld [vmem:[%s6906_s30 + $0x20] sm:$0x1] }
  0x1c   : > { %v2127_v42 = vor.u32 %v2126_v34, %v2123_v33  ;;  %v2137_v49 = vor.u32 %v2136_v40, %v2132_v35  ;;  %v350_v50 = vshll.u32 %v267_v36, 16  ;;  %v343_v53 = vrot.slane %v341_v45, 4  ;;  %v268_v18 = vld [vmem:[%s6906_s30 + $0x18] sm:$0xf]  ;;  %v269_v23 = vld [vmem:[%s6906_s30 + $0x1c] sm:$0xf] }
  0x1d   : > { %v329_v47 = vsel %vm6932_vm4, %v324_v38, %v328_v20  ;;  %v339_v48 = vsel %vm6932_vm4, %v334_v39, %v338_v22  ;;  %v346_v54 = vrot.slane %v344_v46, 5  ;;  %v354_v58 = vshrl.u32 %v267_v36, 16  ;;  %v299_v31 = vld [vmem:[%s6906_s30 + $0x20] sm:$0x1]  ;;  %v5503_v40 = vld [vmem:[%s6906_s30 + $0x24] sm:$0xf] }
  0x1e   : > { %v5319_v51 = vcombine.low %v329_v47, %v339_v48  ;;  %v2128_v52 = vrot.slane %v2127_v42, 4  ;;  %v2138_v56 = vrot.slane %v2137_v49, 4  ;;  %v352_v57 = vrot.slane %v350_v50, 5  ;;  %v6982_v46 = vld [vmem:[%s6906_s30 + $0x28] sm:$0xf] }
  0x1f   : > { %v360_v59 = vshll.u32 %v298_v44, 16  ;;  %v2864_v62 = vrot.slane %v6913_v15, 5  ;;  %v2867_v63 = vrot.slane %v6916_v16, 5  ;;  %v347_v0 = vor.u32 %v346_v54, %v343_v53  ;;  %v6991_v54 = vld [vmem:[%s6906_s30 + $0x2c] sm:$0x1] }
  0x20   : > { %6078 = vmatprep.mubr.msk.bf16.mxu1 %vm750_vm3, %v5319_v51  ;;  %v2133_v61 = vsel %vm6932_vm4, %v2128_v52, %v2132_v35  ;;  %v2143_v2 = vsel %vm6932_vm4, %v2138_v56, %v2142_v43  ;;  %v356_v4 = vrot.slane %v354_v58, 4  ;;  %v2145_v6 = vshrl.u32 %v5500_v55, 16  ;;  %v5399_v51 = vld [vmem:[%s8760_s1 + $0x4] sm:$0x3]  ;;  %v7191_v16 = vld [vmem:[%s6906_s30 + $0x7c] sm:$0xf] }
  0x21   : > { %v362_v5 = vrot.slane %v360_v59, 5  ;;  %v5546_v7 = vcombine.low %v2133_v61, %v2143_v2  ;;  %v348_v8 = vrot.slane %v347_v0, 4  ;;  %v2148_v9 = vshll.u32 %v5500_v55, 16  ;;  %v270_v0 = vld [vmem:[%s6906_s30 + $0x24] sm:$0xf] }
  0x22   : > { %v2154_v10 = vshll.u32 %v6951_v60, 16  ;;  %v357_v11 = vor.u32 %v356_v4, %v352_v57  ;;  %v2147_v12 = vrot.slane %v2145_v6, 4  ;;  %v2158_v13 = vshrl.u32 %v6951_v60, 16 }
  0x23   : > { %v2164_v14 = vshll.u32 %v6959_v1, 16  ;;  %6214 = vmatprep.mubr.msk.bf16.mxu0 %vm750_vm3, %v5546_v7  ;;  %v353_v19 = vsel %vm6932_vm4, %v348_v8, %v352_v57  ;;  %v2150_v20 = vrot.slane %v2148_v9, 5  ;;  %v2871_v22 = vrot.slane %v6951_v60, 5  ;;  %v271_v7 = vld [vmem:[%s6906_s30 + $0x28] sm:$0xf] }
  0x24   : > { %v2156_v21 = vrot.slane %v2154_v10, 5  ;;  %v358_v24 = vrot.slane %v357_v11, 4  ;;  %v2160_v25 = vrot.slane %v2158_v13, 4  ;;  %v2874_v28 = vrot.slane %v6959_v1, 5  ;;  %v300_v13 = vld [vmem:[%s6906_s30 + $0x2c] sm:$0x1] }
  0x25   : > { %v2166_v27 = vrot.slane %v2164_v14, 5  ;;  %v2151_v29 = vor.u32 %v2150_v20, %v2147_v12  ;;  %v6975_v30 = vrot.slane %v2871_v22, 4  ;;  %v365_v33 = vshrl.u32 %v268_v18, 16 }
  0x26   : > { %v368_v34 = vshll.u32 %v268_v18, 16  ;;  %v363_v35 = vsel %vm6932_vm4, %v358_v24, %v362_v5  ;;  %v2161_v36 = vor.u32 %v2160_v25, %v2156_v21  ;;  %v374_v38 = vshll.u32 %v269_v23, 16  ;;  %v5506_v24 = vld [vmem:[%s6906_s30 + $0x30] sm:$0xf] }
  0x27   : > { %v378_v39 = vshrl.u32 %v269_v23, 16  ;;  %v5320_v42 = vcombine.low %v353_v19, %v363_v35  ;;  %v2152_v43 = vrot.slane %v2151_v29, 4  ;;  %v367_v44 = vrot.slane %v365_v33, 4  ;;  %v7011_v33 = vld [vmem:[%s6906_s30 + $0x34] sm:$0xf] }
  0x28   : > { %v370_v45 = vrot.slane %v368_v34, 5  ;;  %v2162_v47 = vrot.slane %v2161_v36, 4  ;;  %v376_v48 = vrot.slane %v374_v38, 5  ;;  %v384_v50 = vshll.u32 %v299_v31, 16 }
  0x29   : > { %v380_v49 = vrot.slane %v378_v39, 4  ;;  %6079 = vmatmul.mubr.msk.bf16.vlgmr.msra.gmra.mrb[0].mxu1 %vm750_vm3, %v5320_v42  ;;  %v2157_v52 = vsel %vm6932_vm4, %v2152_v43, %v2156_v21  ;;  %v2169_v55 = vshrl.u32 %v5503_v40, 16  ;;  %v2172_v56 = vshll.u32 %v5503_v40, 16  ;;  %v7019_v40 = vld [vmem:[%s6906_s30 + $0x38] sm:$0x1] }
  0x2a   : > { %v371_v53 = vor.u32 %v370_v45, %v367_v44  ;;  %6111 = vmatpush3.bf16.msra.mxu1 %v6919_v17  ;;  %v2167_v57 = vsel %vm6932_vm4, %v2162_v47, %v2166_v27  ;;  %v386_v59 = vrot.slane %v384_v50, 5  ;;  %v2178_v61 = vshll.u32 %v6982_v46, 16 }
  0x2b   : > { %v381_v58 = vor.u32 %v380_v49, %v376_v48  ;;  %v5547_v2 = vcombine.low %v2157_v52, %v2167_v57  ;;  %v2171_v5 = vrot.slane %v2169_v55, 4  ;;  %v2174_v6 = vrot.slane %v2172_v56, 5  ;;  %6642 = vmatprep.subr.msk.bf16.mxu1 %vm799_vm0, %v5399_v51  ;;  %v272_v52 = vld [vmem:[%s6906_s30 + $0x30] sm:$0xf] }
  0x2c   : > { %v372_v4 = vrot.slane %v371_v53, 4  ;;  %v2180_v9 = vrot.slane %v2178_v61, 5  ;;  %v2182_v17 = vshrl.u32 %v6982_v46, 16  ;;  %v2188_v10 = vshll.u32 %v6991_v54, 16 }
  0x2d   : > { %v382_v8 = vrot.slane %v381_v58, 4  ;;  %6215 = vmatmul.mubr.msk.bf16.vlgmr.msra.gmra.mrb[0].mxu0 %vm750_vm3, %v5547_v2  ;;  %v2175_v12 = vor.u32 %v2174_v6, %v2171_v5  ;;  %v389_v14 = vshrl.u32 %v270_v0, 16  ;;  %v392_v18 = vshll.u32 %v270_v0, 16  ;;  %v273_v58 = vld [vmem:[%s6906_s30 + $0x34] sm:$0xf] }
  0x2e   : > { %v377_v11 = vsel %vm6932_vm4, %v372_v4, %v376_v48  ;;  %6247 = vmatpush3.bf16.msra.mxu0 %v6938_v37  ;;  %v2184_v20 = vrot.slane %v2182_v17, 4  ;;  %v2190_v21 = vrot.slane %v2188_v10, 5  ;;  %v398_v23 = vshll.u32 %v271_v7, 16  ;;  %v301_v4 = vld [vmem:[%s6906_s30 + $0x38] sm:$0x1] }
  0x2f   : > { %v387_v19 = vsel %vm6932_vm4, %v382_v8, %v386_v59  ;;  %v2176_v27 = vrot.slane %v2175_v12, 4  ;;  %v391_v29 = vrot.slane %v389_v14, 4  ;;  %v394_v31 = vrot.slane %v392_v18, 5  ;;  %6647 = vmatprep.subr.msk.bf16.mxu0 %vm799_vm0, %v6925_v26  ;;  %v5509_v12 = vld [vmem:[%s6906_s30 + $0x3c] sm:$0xf] }
  0x30   : > { %v5321_v25 = vcombine.low %v377_v11, %v387_v19  ;;  %v2185_v34 = vor.u32 %v2184_v20, %v2180_v9  ;;  %v400_v35 = vrot.slane %v398_v23, 5  ;;  %v402_v37 = vshrl.u32 %v271_v7, 16  ;;  %v7036_v20 = vld [vmem:[%s6906_s30 + $0x40] sm:$0xf] }
  0x31   : > { %v408_v36 = vshll.u32 %v300_v13, 16  ;;  %v2181_v38 = vsel %vm6932_vm4, %v2176_v27, %v2180_v9  ;;  %v395_v39 = vor.u32 %v394_v31, %v391_v29  ;;  %v2193_v42 = vshrl.u32 %v5506_v24, 16 }
  0x32   : > { %6082 = vmatprep.mubr.msk.bf16.mxu1 %vm750_vm3, %v5321_v25  ;;  %v2196_v43 = vshll.u32 %v5506_v24, 16  ;;  %v2186_v44 = vrot.slane %v2185_v34, 4  ;;  %v404_v45 = vrot.slane %v402_v37, 4  ;;  %v2202_v26 = vshll.u32 %v7011_v33, 16  ;;  %v7041_v34 = vld [vmem:[%s6906_s30 + $0x44] sm:$0x1] }
  0x33   : > { %v410_v47 = vrot.slane %v408_v36, 5  ;;  %v396_v48 = vrot.slane %v395_v39, 4  ;;  %v2195_v49 = vrot.slane %v2193_v42, 4  ;;  %v2206_v51 = vshrl.u32 %v7011_v33, 16  ;;  %v274_v42 = vld [vmem:[%s6906_s30 + $0x3c] sm:$0xf] }
  0x34   : > { %v2198_v50 = vrot.slane %v2196_v43, 5  ;;  %v2191_v53 = vsel %vm6932_vm4, %v2186_v44, %v2190_v21  ;;  %v405_v55 = vor.u32 %v404_v45, %v400_v35  ;;  %v2204_v56 = vrot.slane %v2202_v26, 5  ;;  %v275_v26 = vld [vmem:[%s6906_s30 + $0x40] sm:$0xf] }
  0x35   : > { %v2212_v57 = vshll.u32 %v7019_v40, 16  ;;  %v5548_v59 = vcombine.low %v2181_v38, %v2191_v53  ;;  %v401_v61 = vsel %vm6932_vm4, %v396_v48, %v400_v35  ;;  %v2208_v2 = vrot.slane %v2206_v51, 4 }
  0x36   : > { %v2199_v0 = vor.u32 %v2198_v50, %v2195_v49  ;;  %v406_v5 = vrot.slane %v405_v55, 4  ;;  %v413_v7 = vshrl.u32 %v272_v52, 16  ;;  %v416_v8 = vshll.u32 %v272_v52, 16 }
  0x37   : > { %v2214_v6 = vrot.slane %v2212_v57, 5  ;;  %6218 = vmatprep.mubr.msk.bf16.mxu0 %vm750_vm3, %v5548_v59  ;;  %v2209_v17 = vor.u32 %v2208_v2, %v2204_v56  ;;  %v422_v10 = vshll.u32 %v273_v58, 16  ;;  %v426_v11 = vshrl.u32 %v273_v58, 16  ;;  %v5512_v2 = vld [vmem:[%s6906_s30 + $0x48] sm:$0xf] }
  0x38   : > { %v2200_v9 = vrot.slane %v2199_v0, 4  ;;  %v411_v13 = vsel %vm6932_vm4, %v406_v5, %v410_v47  ;;  %v415_v14 = vrot.slane %v413_v7, 4  ;;  %v418_v18 = vrot.slane %v416_v8, 5  ;;  %v7059_v8 = vld [vmem:[%s6906_s30 + $0x4c] sm:$0xf] }
  0x39   : > { %v432_v19 = vshll.u32 %v301_v4, 16  ;;  %v5322_v21 = vcombine.low %v401_v61, %v411_v13  ;;  %v2210_v24 = vrot.slane %v2209_v17, 4  ;;  %v424_v25 = vrot.slane %v422_v10, 5  ;;  %v302_v61 = vld [vmem:[%s6906_s30 + $0x44] sm:$0x1] }
  0x3a   : > { %v2205_v23 = vsel %vm6932_vm4, %v2200_v9, %v2204_v56  ;;  %v419_v27 = vor.u32 %v418_v18, %v415_v14  ;;  %v428_v29 = vrot.slane %v426_v11, 4  ;;  %v2217_v35 = vshrl.u32 %v5509_v12, 16 }
  0x3b   : > { %v434_v31 = vrot.slane %v432_v19, 5  ;;  %6083 = vmatmul.mubr.msk.bf16.gmra.mrb[4].mxu1 %vm750_vm3, %v5322_v21  ;;  %v2215_v37 = vsel %vm6932_vm4, %v2210_v24, %v2214_v6  ;;  %v2220_v36 = vshll.u32 %v5509_v12, 16  ;;  %v2226_v38 = vshll.u32 %v7036_v20, 16 }
  0x3c   : > { %v2230_v39 = vshrl.u32 %v7036_v20, 16  ;;  %v5549_v43 = vcombine.low %v2205_v23, %v2215_v37  ;;  %v420_v44 = vrot.slane %v419_v27, 4  ;;  %v429_v45 = vor.u32 %v428_v29, %v424_v25  ;;  %v7067_v23 = vld [vmem:[%s6906_s30 + $0x50] sm:$0x1]  ;;  %v7071_v27 = vld [vmem:[%s6906_s30 + $0x48] sm:$0xf] }
  0x3d   : > { %v2219_v47 = vrot.slane %v2217_v35, 4  ;;  %v2222_v48 = vrot.slane %v2220_v36, 5  ;;  %v2228_v49 = vrot.slane %v2226_v38, 5  ;;  %v2236_v51 = vshll.u32 %v7041_v34, 16  ;;  %v7074_v36 = vld [vmem:[%s6906_s30 + $0x4c] sm:$0xf] }
  0x3e   : > { %v2232_v50 = vrot.slane %v2230_v39, 4  ;;  %6219 = vmatmul.mubr.msk.bf16.gmra.mrb[4].mxu0 %vm750_vm3, %v5549_v43  ;;  %v425_v52 = vsel %vm6932_vm4, %v420_v44, %v424_v25  ;;  %v430_v53 = vrot.slane %v429_v45, 4  ;;  %v437_v55 = vshrl.u32 %v274_v42, 16 }
  0x3f   : > { %v440_v56 = vshll.u32 %v274_v42, 16  ;;  %v2223_v57 = vor.u32 %v2222_v48, %v2219_v47  ;;  %v2238_v59 = vrot.slane %v2236_v51, 5  ;;  %v446_v0 = vshll.u32 %v275_v26, 16 }
  0x40   : > { %v2233_v58 = vor.u32 %v2232_v50, %v2228_v49  ;;  %v435_v4 = vsel %vm6932_vm4, %v430_v53, %v434_v31  ;;  %v439_v5 = vrot.slane %v437_v55, 4  ;;  %v450_v7 = vshrl.u32 %v275_v26, 16  ;;  %v303_v26 = vld [vmem:[%s6906_s30 + $0x50] sm:$0x1]  ;;  %v5515_v53 = vld [vmem:[%s6906_s30 + $0x54] sm:$0xf] }
  0x41   : > { %v442_v6 = vrot.slane %v440_v56, 5  ;;  %v5323_v9 = vcombine.low %v425_v52, %v435_v4  ;;  %v2224_v17 = vrot.slane %v2223_v57, 4  ;;  %v448_v11 = vrot.slane %v446_v0, 5  ;;  %v7090_v4 = vld [vmem:[%s6906_s30 + $0x58] sm:$0xf] }
  0x42   : > { %v2234_v10 = vrot.slane %v2233_v58, 4  ;;  %v452_v13 = vrot.slane %v450_v7, 4  ;;  %v456_v14 = vshll.u32 %v302_v61, 16  ;;  %v2241_v18 = vshrl.u32 %v5512_v2, 16 }
  0x43   : > { %v443_v12 = vor.u32 %v442_v6, %v439_v5  ;;  %6086 = vmatprep.mubr.msk.bf16.mxu1 %vm750_vm3, %v5323_v9  ;;  %v2229_v19 = vsel %vm6932_vm4, %v2224_v17, %v2228_v49  ;;  %v2244_v24 = vshll.u32 %v5512_v2, 16  ;;  %v2250_v25 = vshll.u32 %v7059_v8, 16 }
  0x44   : > { %v2239_v21 = vsel %vm6932_vm4, %v2234_v10, %v2238_v59  ;;  %v453_v35 = vor.u32 %v452_v13, %v448_v11  ;;  %v458_v37 = vrot.slane %v456_v14, 5  ;;  %v2243_v38 = vrot.slane %v2241_v18, 4 }
  0x45   : > { %v5550_v29 = vcombine.low %v2229_v19, %v2239_v21  ;;  %v444_v31 = vrot.slane %v443_v12, 4  ;;  %v2246_v39 = vrot.slane %v2244_v24, 5  ;;  %v2252_v42 = vrot.slane %v2250_v25, 5  ;;  %v7096_v12 = vld [vmem:[%s6906_s30 + $0x5c] sm:$0x1] }
  0x46   : > { %v2254_v43 = vshrl.u32 %v7059_v8, 16  ;;  %v454_v45 = vrot.slane %v453_v35, 4  ;;  %v2260_v47 = vshll.u32 %v7067_v23, 16  ;;  %v461_v48 = vshrl.u32 %v7071_v27, 16  ;;  %v7100_v24 = vld [vmem:[%s6906_s30 + $0x54] sm:$0xf] }
  0x47   : > { %6222 = vmatprep.mubr.msk.bf16.mxu0 %vm750_vm3, %v5550_v29  ;;  %v449_v44 = vsel %vm6932_vm4, %v444_v31, %v448_v11  ;;  %v2247_v49 = vor.u32 %v2246_v39, %v2243_v38  ;;  %v464_v51 = vshll.u32 %v7071_v27, 16  ;;  %v470_v52 = vshll.u32 %v7074_v36, 16 }
  0x48   : > { %v2256_v50 = vrot.slane %v2254_v43, 4  ;;  %v459_v55 = vsel %vm6932_vm4, %v454_v45, %v458_v37  ;;  %v2262_v56 = vrot.slane %v2260_v47, 5  ;;  %v463_v57 = vrot.slane %v461_v48, 4  ;;  %v7106_v37 = vld [vmem:[%s6906_s30 + $0x58] sm:$0xf] }
  0x49   : > { %v474_v58 = vshrl.u32 %v7074_v36, 16  ;;  %v5324_v59 = vcombine.low %v449_v44, %v459_v55  ;;  %v2248_v61 = vrot.slane %v2247_v49, 4  ;;  %v466_v2 = vrot.slane %v464_v51, 5 }
  0x4a   : > { %v2257_v0 = vor.u32 %v2256_v50, %v2252_v42  ;;  %v472_v5 = vrot.slane %v470_v52, 5  ;;  %v480_v7 = vshll.u32 %v303_v26, 16  ;;  %v2265_v9 = vshrl.u32 %v5515_v53, 16  ;;  %v304_v26 = vld [vmem:[%s6906_s30 + $0x5c] sm:$0x1] }
  0x4b   : > { %v476_v6 = vrot.slane %v474_v58, 4  ;;  %6087 = vmatmul.mubr.msk.bf16.gmra.mrb[8].mxu1 %vm750_vm3, %v5324_v59  ;;  %v2253_v17 = vsel %vm6932_vm4, %v2248_v61, %v2252_v42  ;;  %v467_v11 = vor.u32 %v466_v2, %v463_v57  ;;  %v2268_v13 = vshll.u32 %v5515_v53, 16  ;;  %v5518_v53 = vld [vmem:[%s6906_s30 + $0x60] sm:$0xf]  ;;  %v7120_v59 = vld [vmem:[%s6906_s30 + $0x64] sm:$0xf] }
  0x4c   : > { %v2258_v10 = vrot.slane %v2257_v0, 4  ;;  %v482_v18 = vrot.slane %v480_v7, 5  ;;  %v2267_v19 = vrot.slane %v2265_v9, 4  ;;  %v2274_v21 = vshll.u32 %v7090_v4, 16  ;;  %v7127_v9 = vld [vmem:[%s6906_s30 + $0x68] sm:$0x1] }
  0x4d   : > { %v477_v14 = vor.u32 %v476_v6, %v472_v5  ;;  %v468_v29 = vrot.slane %v467_v11, 4  ;;  %v2270_v31 = vrot.slane %v2268_v13, 5  ;;  %v2278_v35 = vshrl.u32 %v7090_v4, 16 }
  0x4e   : > { %v2263_v25 = vsel %vm6932_vm4, %v2258_v10, %v2262_v56  ;;  %v2276_v42 = vrot.slane %v2274_v21, 5  ;;  %v2284_v43 = vshll.u32 %v7096_v12, 16  ;;  %v485_v48 = vshrl.u32 %v7100_v24, 16 }
  0x4f   : > { %v5551_v38 = vcombine.low %v2253_v17, %v2263_v25  ;;  %v478_v39 = vrot.slane %v477_v14, 4  ;;  %v473_v44 = vsel %vm6932_vm4, %v468_v29, %v472_v5  ;;  %v2271_v45 = vor.u32 %v2270_v31, %v2267_v19  ;;  %v7131_v19 = vld [vmem:[%s6906_s30 + $0x60] sm:$0xf] }
  0x50   : > { %v2280_v47 = vrot.slane %v2278_v35, 4  ;;  %v2286_v50 = vrot.slane %v2284_v43, 5  ;;  %v488_v51 = vshll.u32 %v7100_v24, 16  ;;  %v494_v52 = vshll.u32 %v7106_v37, 16  ;;  %v7137_v35 = vld [vmem:[%s6906_s30 + $0x64] sm:$0xf] }
  0x51   : > { %6223 = vmatmul.mubr.msk.bf16.gmra.mrb[8].mxu0 %vm750_vm3, %v5551_v38  ;;  %v483_v49 = vsel %vm6932_vm4, %v478_v39, %v482_v18  ;;  %v2272_v56 = vrot.slane %v2271_v45, 4  ;;  %v487_v58 = vrot.slane %v485_v48, 4  ;;  %v498_v2 = vshrl.u32 %v7106_v37, 16 }
  0x52   : > { %v5325_v55 = vcombine.low %v473_v44, %v483_v49  ;;  %v2281_v57 = vor.u32 %v2280_v47, %v2276_v42  ;;  %v490_v61 = vrot.slane %v488_v51, 5  ;;  %v496_v0 = vrot.slane %v494_v52, 5 }
  0x53   : > { %v504_v5 = vshll.u32 %v304_v26, 16  ;;  %v2277_v6 = vsel %vm6932_vm4, %v2272_v56, %v2276_v42  ;;  %v2289_v17 = vshrl.u32 %v5518_v53, 16  ;;  %v2292_v10 = vshll.u32 %v5518_v53, 16 }
  0x54   : > { %6090 = vmatprep.mubr.msk.bf16.mxu1 %vm750_vm3, %v5325_v55  ;;  %v2282_v7 = vrot.slane %v2281_v57, 4  ;;  %v491_v11 = vor.u32 %v490_v61, %v487_v58  ;;  %v500_v13 = vrot.slane %v498_v2, 4  ;;  %v2298_v18 = vshll.u32 %v7120_v59, 16  ;;  %v5578_v58 = vld [vmem:[%s6906_s30 + $0xc] sm:$0xe] }
  0x55   : > { %v506_v14 = vrot.slane %v504_v5, 5  ;;  %v2291_v25 = vrot.slane %v2289_v17, 4  ;;  %v2294_v29 = vrot.slane %v2292_v10, 5  ;;  %v2302_v31 = vshrl.u32 %v7120_v59, 16 }
  0x56   : > { %v2287_v21 = vsel %vm6932_vm4, %v2282_v7, %v2286_v50  ;;  %v492_v39 = vrot.slane %v491_v11, 4  ;;  %v501_v42 = vor.u32 %v500_v13, %v496_v0  ;;  %v2300_v43 = vrot.slane %v2298_v18, 5  ;;  %v305_v50 = vld [vmem:[%s6906_s30 + $0x68] sm:$0x1] }
  0x57   : > { %v5552_v38 = vcombine.low %v2277_v6, %v2287_v21  ;;  %v2295_v44 = vor.u32 %v2294_v29, %v2291_v25  ;;  %v2304_v45 = vrot.slane %v2302_v31, 4  ;;  %v2308_v47 = vshll.u32 %v7127_v9, 16  ;;  %v7165_v29 = vld [vmem:[%s6906_s30 + $0x70] sm:$0xf] }
  0x58   : > { %v509_v26 = vshrl.u32 %v7131_v19, 16  ;;  %v497_v48 = vsel %vm6932_vm4, %v492_v39, %v496_v0  ;;  %v502_v49 = vrot.slane %v501_v42, 4  ;;  %v512_v51 = vshll.u32 %v7131_v19, 16  ;;  %v7152_v0 = vld [vmem:[%s6906_s30 + $0x6c] sm:$0xf] }
  0x59   : > { %6226 = vmatprep.mubr.msk.bf16.mxu0 %vm750_vm3, %v5552_v38  ;;  %v518_v52 = vshll.u32 %v7137_v35, 16  ;;  %v2296_v53 = vrot.slane %v2295_v44, 4  ;;  %v2305_v55 = vor.u32 %v2304_v45, %v2300_v43  ;;  %v2310_v56 = vrot.slane %v2308_v47, 5 }
  0x5a   : > { %v511_v57 = vrot.slane %v509_v26, 4  ;;  %v507_v61 = vsel %vm6932_vm4, %v502_v49, %v506_v14  ;;  %v514_v2 = vrot.slane %v512_v51, 5  ;;  %v522_v6 = vshrl.u32 %v7137_v35, 16  ;;  %v306_v26 = vld [vmem:[%s6906_s30 + $0x74] sm:$0x1] }
  0x5b   : > { %v520_v5 = vrot.slane %v518_v52, 5  ;;  %v5326_v7 = vcombine.low %v497_v48, %v507_v61  ;;  %v2301_v17 = vsel %vm6932_vm4, %v2296_v53, %v2300_v43  ;;  %v2306_v10 = vrot.slane %v2305_v55, 4  ;;  %v5579_v48 = vld [vmem:[%s6906_s30 + $0x18] sm:$0xe] }
  0x5c   : > { %v528_v11 = vshll.u32 %v305_v50, 16  ;;  %v515_v14 = vor.u32 %v514_v2, %v511_v57  ;;  %v524_v18 = vrot.slane %v522_v6, 4  ;;  %v5594_v21 = vrot.slane %v5578_v58, 9  ;;  %v7184_v53 = vld [vmem:[%s6906_s30 + $0x78] sm:$0xf] }
  0x5d   : > { %v2866_v25 = vrot.slane %v2864_v62, 4  ;;  %6091 = vmatmul.mubr.msk.bf16.gmra.mrb[12].mxu1 %vm750_vm3, %v5326_v7  ;;  %v2311_v31 = vsel %vm6932_vm4, %v2306_v10, %v2310_v56  ;;  %v533_v39 = vshrl.u32 %v7152_v0, 16  ;;  %v536_v42 = vshll.u32 %v7152_v0, 16  ;;  %v307_v57 = vld [vmem:[%s6906_s30 + $0x80] sm:$0x1] }
  0x5e   : > { %v530_v38 = vrot.slane %v528_v11, 5  ;;  %v5553_v43 = vcombine.low %v2301_v17, %v2311_v31  ;;  %v516_v44 = vrot.slane %v515_v14, 4  ;;  %v525_v45 = vor.u32 %v524_v18, %v520_v5  ;;  %v5580_v10 = vld [vmem:[%s6906_s30 + $0x24] sm:$0xe] }
  0x5f   : > { %v2865_v47 = vsel %vm7158_vm7, %v5594_v21, %v2864_v62  ;;  %v2868_v49 = vsel %vm7158_vm7, %v2866_v25, %v2867_v63  ;;  %v535_v50 = vrot.slane %v533_v39, 4  ;;  %v538_v51 = vrot.slane %v536_v42, 5  ;;  %v7210_v39 = vld [vmem:[%s6906_s30 + $0x84] sm:$0xf] }
  0x60   : > { %v542_v52 = vshll.u32 %v7165_v29, 16  ;;  %6227 = vmatmul.mubr.msk.bf16.gmra.mrb[12].mxu0 %vm750_vm3, %v5553_v43  ;;  %v521_v15 = vsel %vm6932_vm4, %v516_v44, %v520_v5  ;;  %v526_v62 = vrot.slane %v525_v45, 4  ;;  %v5611_v55 = vcombine.low %v2865_v47, %v2868_v49  ;;  %v7218_v43 = vld [vmem:[%s6906_s30 + $0x88] sm:$0xf] }
  0x61   : > { %v546_v56 = vshrl.u32 %v7165_v29, 16  ;;  %v539_v63 = vor.u32 %v538_v51, %v535_v50  ;;  %v552_v61 = vshll.u32 %v306_v26, 16  ;;  %v5595_v2 = vrot.slane %v5579_v48, 9 }
  0x62   : > { %v544_v58 = vrot.slane %v542_v52, 5  ;;  %v531_v6 = vsel %vm6932_vm4, %v526_v62, %v530_v38  ;;  %6248 = vmatprep.mubr.msk.bf16.mxu0 %vm750_vm3, %v5611_v55  ;;  %v2875_v5 = vsel %vm7158_vm7, %v6975_v30, %v2874_v28  ;;  %v557_v17 = vshrl.u32 %v7184_v53, 16  ;;  %v308_v52 = vld [vmem:[%s6906_s30 + $0x8c] sm:$0x1] }
  0x63   : > { %v548_v7 = vrot.slane %v546_v56, 4  ;;  %v5327_v11 = vcombine.low %v521_v15, %v531_v6  ;;  %v540_v14 = vrot.slane %v539_v63, 4  ;;  %v554_v18 = vrot.slane %v552_v61, 5 }
  0x64   : > { %v2872_v21 = vsel %vm7158_vm7, %v5595_v2, %v2871_v22  ;;  %v559_v38 = vrot.slane %v557_v17, 4  ;;  %v560_v1 = vshll.u32 %v7184_v53, 16  ;;  %v566_v30 = vshll.u32 %v7191_v16, 16  ;;  %v7223_v22 = vld [vmem:[%s8760_s1 + $0xe] sm:$0x3] }
  0x65   : > { %v549_v25 = vor.u32 %v548_v7, %v544_v58  ;;  %v5612_v31 = vcombine.low %v2872_v21, %v2875_v5  ;;  %6094 = vmatprep.mubr.msk.bf16.mxu1 %vm750_vm3, %v5327_v11  ;;  %v545_v28 = vsel %vm6932_vm4, %v540_v14, %v544_v58  ;;  %v570_v60 = vshrl.u32 %v7191_v16, 16  ;;  %v7242_v5 = vld [vmem:[%s6906_s30 + $0x90] sm:$0xf] }
  0x66   : > { %v576_v42 = vshll.u32 %v307_v57, 16  ;;  %v562_v45 = vrot.slane %v560_v1, 5  ;;  %v5596_v47 = vrot.slane %v5580_v10, 9  ;;  %v2878_v26 = vrot.slane %v6982_v46, 5  ;;  %v5581_v57 = vld [vmem:[%s6906_s30 + $0x30] sm:$0xe] }
  0x67   : > { %v550_v44 = vrot.slane %v549_v25, 4  ;;  %v568_v48 = vrot.slane %v566_v30, 5  ;;  %v572_v49 = vrot.slane %v570_v60, 4  ;;  %v2881_v51 = vrot.slane %v6991_v54, 5  ;;  %v7254_v30 = vld [vmem:[%s6906_s30 + $0x94] sm:$0xf] }
  0x68   : > { %v578_v50 = vrot.slane %v576_v42, 5  ;;  %6249 = vmatmul.mubr.msk.bf16.vlgmr.msra.gmra.mrb[0].mxu0 %vm750_vm3, %v5612_v31  ;;  %v563_v62 = vor.u32 %v562_v45, %v559_v38  ;;  %v2879_v55 = vsel %vm7158_vm7, %v5596_v47, %v2878_v26  ;;  %v2880_v56 = vrot.slane %v2878_v26, 4  ;;  %v309_v60 = vld [vmem:[%s6906_s30 + $0x98] sm:$0x1]  ;;  %v5582_v26 = vld [vmem:[%s6906_s30 + $0x3c] sm:$0xe] }
  0x69   : > { %v555_v15 = vsel %vm6932_vm4, %v550_v44, %v554_v18  ;;  %6281 = vmatpush3.bf16.msra.mxu0 %v6942_v41  ;;  %v573_v46 = vor.u32 %v572_v49, %v568_v48  ;;  %v581_v58 = vshrl.u32 %v7210_v39, 16  ;;  %v584_v54 = vshll.u32 %v7210_v39, 16 }
  0x6a   : > { %v5328_v63 = vcombine.low %v545_v28, %v555_v15  ;;  %v564_v61 = vrot.slane %v563_v62, 4  ;;  %v2882_v2 = vsel %vm7158_vm7, %v2880_v56, %v2881_v51  ;;  %v590_v6 = vshll.u32 %v7218_v43, 16  ;;  %6648 = vmatprep.subr.msk.bf16.mxu0 %vm799_vm0, %v7223_v22 }
  0x6b   : > { %v594_v7 = vshrl.u32 %v7218_v43, 16  ;;  %v574_v41 = vrot.slane %v573_v46, 4  ;;  %v5613_v17 = vcombine.low %v2879_v55, %v2882_v2  ;;  %v583_v10 = vrot.slane %v581_v58, 4  ;;  %v7274_v46 = vld [vmem:[%s6906_s30 + $0xa0] sm:$0xf] }
  0x6c   : > { %6095 = vmatmul.mubr.msk.bf16.gmra.mrb[16].mxu1 %vm750_vm3, %v5328_v63  ;;  %v586_v11 = vrot.slane %v584_v54, 5  ;;  %v569_v14 = vsel %vm6932_vm4, %v564_v61, %v568_v48  ;;  %v592_v18 = vrot.slane %v590_v6, 5  ;;  %v600_v25 = vshll.u32 %v308_v52, 16  ;;  %v7263_v52 = vld [vmem:[%s6906_s30 + $0x9c] sm:$0xf] }
  0x6d   : > { %v596_v21 = vrot.slane %v594_v7, 4  ;;  %v579_v31 = vsel %vm6932_vm4, %v574_v41, %v578_v50  ;;  %6252 = vmatprep.mubr.msk.bf16.mxu0 %vm750_vm3, %v5613_v17  ;;  %v5597_v1 = vrot.slane %v5581_v57, 9  ;;  %v2885_v28 = vrot.slane %v7011_v33, 5 }
  0x6e   : > { %v587_v38 = vor.u32 %v586_v11, %v583_v10  ;;  %v5329_v42 = vcombine.low %v569_v14, %v579_v31  ;;  %v602_v45 = vrot.slane %v600_v25, 5  ;;  %v2888_v47 = vrot.slane %v7019_v40, 5  ;;  %v310_v10 = vld [vmem:[%s6906_s30 + $0xa4] sm:$0x1]  ;;  %v5583_v11 = vld [vmem:[%s6906_s30 + $0x48] sm:$0xe] }
  0x6f   : > { %v597_v44 = vor.u32 %v596_v21, %v592_v18  ;;  %v2886_v49 = vsel %vm7158_vm7, %v5597_v1, %v2885_v28  ;;  %v2887_v50 = vrot.slane %v2885_v28, 4  ;;  %v605_v51 = vshrl.u32 %v7242_v5, 16 }
  0x70   : > { %v588_v48 = vrot.slane %v587_v38, 4  ;;  %6098 = vmatprep.mubr.msk.bf16.mxu1 %vm750_vm3, %v5329_v42  ;;  %v608_v15 = vshll.u32 %v7242_v5, 16  ;;  %v614_v62 = vshll.u32 %v7254_v30, 16  ;;  %v618_v40 = vshrl.u32 %v7254_v30, 16 }
  0x71   : > { %v598_v33 = vrot.slane %v597_v44, 4  ;;  %v2889_v56 = vsel %vm7158_vm7, %v2887_v50, %v2888_v47  ;;  %v607_v57 = vrot.slane %v605_v51, 4  ;;  %v624_v63 = vshll.u32 %v309_v60, 16 }
  0x72   : > { %v593_v55 = vsel %vm6932_vm4, %v588_v48, %v592_v18  ;;  %v5614_v54 = vcombine.low %v2886_v49, %v2889_v56  ;;  %v610_v61 = vrot.slane %v608_v15, 5  ;;  %v616_v2 = vrot.slane %v614_v62, 5  ;;  %v7300_v56 = vld [vmem:[%s6906_s30 + $0xac] sm:$0xf] }
  0x73   : > { %v603_v58 = vsel %vm6932_vm4, %v598_v33, %v602_v45  ;;  %v620_v7 = vrot.slane %v618_v40, 4  ;;  %v626_v41 = vrot.slane %v624_v63, 5  ;;  %v5598_v17 = vrot.slane %v5582_v26, 9  ;;  %v7295_v33 = vld [vmem:[%s6906_s30 + $0xa8] sm:$0xf] }
  0x74   : > { %v5330_v6 = vcombine.low %v593_v55, %v603_v58  ;;  %6253 = vmatmul.mubr.msk.bf16.gmra.mrb[4].mxu0 %vm750_vm3, %v5614_v54  ;;  %v611_v14 = vor.u32 %v610_v61, %v607_v57  ;;  %v2892_v18 = vrot.slane %v7036_v20, 5  ;;  %v2895_v21 = vrot.slane %v7041_v34, 5  ;;  %v311_v61 = vld [vmem:[%s6906_s30 + $0xb0] sm:$0x1] }
  0x75   : > { %v629_v25 = vshrl.u32 %v7263_v52, 16  ;;  %v621_v31 = vor.u32 %v620_v7, %v616_v2  ;;  %v632_v38 = vshll.u32 %v7263_v52, 16  ;;  %v638_v1 = vshll.u32 %v7274_v46, 16 }
  0x76   : > { %6099 = vmatmul.mubr.msk.bf16.gmra.mrb[20].mxu1 %vm750_vm3, %v5330_v6  ;;  %v642_v28 = vshrl.u32 %v7274_v46, 16  ;;  %v612_v60 = vrot.slane %v611_v14, 4  ;;  %v2893_v42 = vsel %vm7158_vm7, %v5598_v17, %v2892_v18  ;;  %v2894_v20 = vrot.slane %v2892_v18, 4  ;;  %v7315_v14 = vld [vmem:[%s6906_s30 + $0xb4] sm:$0xf] }
  0x77   : > { %v631_v44 = vrot.slane %v629_v25, 4  ;;  %v622_v34 = vrot.slane %v621_v31, 4  ;;  %v634_v45 = vrot.slane %v632_v38, 5  ;;  %v640_v47 = vrot.slane %v638_v1, 5 }
  0x78   : > { %v644_v26 = vrot.slane %v642_v28, 4  ;;  %v617_v48 = vsel %vm6932_vm4, %v612_v60, %v616_v2  ;;  %v2896_v49 = vsel %vm7158_vm7, %v2894_v20, %v2895_v21  ;;  %v648_v50 = vshll.u32 %v310_v10, 16  ;;  %v5584_v2 = vld [vmem:[%s6906_s30 + $0x54] sm:$0xe] }
  0x79   : > { %v5599_v51 = vrot.slane %v5583_v11, 9  ;;  %v627_v15 = vsel %vm6932_vm4, %v622_v34, %v626_v41  ;;  %v5615_v62 = vcombine.low %v2893_v42, %v2896_v49  ;;  %v635_v40 = vor.u32 %v634_v45, %v631_v44  ;;  %v7324_v42 = vld [vmem:[%s6906_s30 + $0xb8] sm:$0xf]  ;;  %v312_v49 = vld [vmem:[%s6906_s30 + $0xbc] sm:$0x1] }
  0x7a   : > { %v645_v55 = vor.u32 %v644_v26, %v640_v47  ;;  %v5331_v57 = vcombine.low %v617_v48, %v627_v15  ;;  %v650_v63 = vrot.slane %v648_v50, 5  ;;  %v2899_v58 = vrot.slane %v7059_v8, 5 }
  0x7b   : > { %v2902_v54 = vrot.slane %v7067_v23, 5  ;;  %6256 = vmatprep.mubr.msk.bf16.mxu0 %vm750_vm3, %v5615_v62  ;;  %v636_v6 = vrot.slane %v635_v40, 4  ;;  %v653_v41 = vshrl.u32 %v7295_v33, 16  ;;  %v656_v17 = vshll.u32 %v7295_v33, 16 }
  0x7c   : > { %v646_v7 = vrot.slane %v645_v55, 4  ;;  %6102 = vmatprep.mubr.msk.bf16.mxu1 %vm750_vm3, %v5331_v57  ;;  %v2900_v10 = vsel %vm7158_vm7, %v5599_v51, %v2899_v58  ;;  %v2901_v11 = vrot.slane %v2899_v58, 4  ;;  %v662_v8 = vshll.u32 %v7300_v56, 16  ;;  %v5585_v55 = vld [vmem:[%s6906_s30 + $0x60] sm:$0xe] }
  0x7d   : > { %v666_v23 = vshrl.u32 %v7300_v56, 16  ;;  %v641_v18 = vsel %vm6932_vm4, %v636_v6, %v640_v47  ;;  %v655_v25 = vrot.slane %v653_v41, 4  ;;  %v658_v31 = vrot.slane %v656_v17, 5  ;;  %v5586_v6 = vld [vmem:[%s6906_s30 + $0x6c] sm:$0xe] }
  0x7e   : > { %v651_v21 = vsel %vm6932_vm4, %v646_v7, %v650_v63  ;;  %v2903_v1 = vsel %vm7158_vm7, %v2901_v11, %v2902_v54  ;;  %v664_v28 = vrot.slane %v662_v8, 5  ;;  %v672_v34 = vshll.u32 %v311_v61, 16  ;;  %v5522_v11 = vld [vmem:[%s6906_s30 + $0x70] sm:$0xf]  ;;  %v5523_v8 = vld [vmem:[%s6906_s30 + $0x74] sm:$0x1] }
  0x7f   : > { %v5332_v38 = vcombine.low %v641_v18, %v651_v21  ;;  %v668_v60 = vrot.slane %v666_v23, 4  ;;  %v5616_v20 = vcombine.low %v2900_v10, %v2903_v1  ;;  %v659_v44 = vor.u32 %v658_v31, %v655_v25 }
  0x80   : > { %v5600_v45 = vrot.slane %v5584_v2, 9  ;;  %v2906_v26 = vrot.slane %v7090_v4, 5  ;;  %v2909_v48 = vrot.slane %v7096_v12, 5  ;;  %v677_v50 = vshrl.u32 %v7315_v14, 16 }
  0x81   : > { %6103 = vmatmul.mubr.msk.bf16.gmra.mrb[24].mxu1 %vm750_vm3, %v5332_v38  ;;  %v669_v47 = vor.u32 %v668_v60, %v664_v28  ;;  %6257 = vmatmul.mubr.msk.bf16.gmra.mrb[8].mxu0 %vm750_vm3, %v5616_v20  ;;  %v660_v51 = vrot.slane %v659_v44, 4  ;;  %v674_v15 = vrot.slane %v672_v34, 5  ;;  %v680_v62 = vshll.u32 %v7315_v14, 16 }
  0x82   : > { %v686_v40 = vshll.u32 %v7324_v42, 16  ;;  %v2907_v4 = vsel %vm7158_vm7, %v5600_v45, %v2906_v26  ;;  %v2908_v12 = vrot.slane %v2906_v26, 4  ;;  %v679_v63 = vrot.slane %v677_v50, 4 }
  0x83   : > { %v670_v57 = vrot.slane %v669_v47, 4  ;;  %v665_v58 = vsel %vm6932_vm4, %v660_v51, %v664_v28  ;;  %v682_v54 = vrot.slane %v680_v62, 5  ;;  %v690_v2 = vshrl.u32 %v7324_v42, 16  ;;  %v5587_v47 = vld [vmem:[%s6906_s30 + $0x78] sm:$0xe] }
  0x84   : > { %v688_v61 = vrot.slane %v686_v40, 5  ;;  %v2910_v41 = vsel %vm7158_vm7, %v2908_v12, %v2909_v48  ;;  %v696_v17 = vshll.u32 %v312_v49, 16  ;;  %v5601_v10 = vrot.slane %v5585_v55, 9  ;;  %v6755_v51 = vld [vmem:[%s6906_s30] sm:$0xf] }
  0x85   : > { %v675_v7 = vsel %vm6932_vm4, %v670_v57, %v674_v15  ;;  %v5617_v18 = vcombine.low %v2907_v4, %v2910_v41  ;;  %v683_v21 = vor.u32 %v682_v54, %v679_v63  ;;  %v692_v25 = vrot.slane %v690_v2, 4  ;;  %v7362_v15 = vld [vmem:[%s6906_s30 + $0x4] sm:$0xf]  ;;  %v7366_v40 = vld [vmem:[%s6906_s30 + $0x7c] sm:$0xf] }
  0x86   : > { %v5333_v23 = vcombine.low %v665_v58, %v675_v7  ;;  %v698_v31 = vrot.slane %v696_v17, 5  ;;  %v2913_v38 = vrot.slane %v7120_v59, 5  ;;  %v2916_v1 = vrot.slane %v7127_v9, 5  ;;  %v7369_v55 = vld [vmem:[%s6906_s30 + $0x80] sm:$0x1] }
  0x87   : > { %v5602_v28 = vrot.slane %v5586_v6, 9  ;;  %6260 = vmatprep.mubr.msk.bf16.mxu0 %vm750_vm3, %v5617_v18  ;;  %v684_v60 = vrot.slane %v683_v21, 4  ;;  %v693_v20 = vor.u32 %v692_v25, %v688_v61  ;;  %v2920_v44 = vrot.slane %v5522_v11, 5  ;;  %v5528_v57 = vld [vmem:[%s6906_s30 + $0x88] sm:$0xf] }
  0x88   : > { %6106 = vmatprep.mubr.msk.bf16.mxu1 %vm750_vm3, %v5333_v23  ;;  %v2923_v34 = vrot.slane %v5523_v8, 5  ;;  %v2914_v45 = vsel %vm7158_vm7, %v5601_v10, %v2913_v38  ;;  %v2915_v59 = vrot.slane %v2913_v38, 4  ;;  %v5351_v62 = vcombine.low %v6755_v51, %v7362_v15  ;;  %v5529_v54 = vld [vmem:[%s6906_s30 + $0x8c] sm:$0x1]  ;;  %v5531_v17 = vld [vmem:[%s6906_s30 + $0x94] sm:$0xf] }
  0x89   : > { %v689_v9 = vsel %vm6932_vm4, %v684_v60, %v688_v61  ;;  %v694_v26 = vrot.slane %v693_v20, 4  ;;  %v2921_v48 = vsel %vm7158_vm7, %v5602_v28, %v2920_v44  ;;  %v2922_v49 = vrot.slane %v2920_v44, 4  ;;  %v5588_v61 = vld [vmem:[%s6906_s30 + $0x84] sm:$0xe]  ;;  %v5589_v23 = vld [vmem:[%s6906_s30 + $0x90] sm:$0xe] }
  0x8a   : > { %v2917_v50 = vsel %vm7158_vm7, %v2915_v59, %v2916_v1  ;;  %v5603_v58 = vrot.slane %v5587_v47, 9  ;;  %v2927_v7 = vrot.slane %v7366_v40, 5  ;;  %v2930_v41 = vrot.slane %v7369_v55, 5  ;;  %v5532_v25 = vld [vmem:[%s6906_s30 + $0x98] sm:$0x1] }
  0x8b   : > { %v699_v4 = vsel %vm6932_vm4, %v694_v26, %v698_v31  ;;  %v5618_v12 = vcombine.low %v2914_v45, %v2917_v50  ;;  %v2924_v63 = vsel %vm7158_vm7, %v2922_v49, %v2923_v34  ;;  %v5604_v10 = vrot.slane %v5588_v61, 9  ;;  %v5534_v31 = vld [vmem:[%s6906_s30 + $0xa0] sm:$0xf]  ;;  %v5535_v60 = vld [vmem:[%s6906_s30 + $0xa4] sm:$0x1] }
  0x8c   : > { %v5334_v2 = vcombine.low %v689_v9, %v699_v4  ;;  %v5619_v6 = vcombine.low %v2921_v48, %v2924_v63  ;;  %v2934_v11 = vrot.slane %v5528_v57, 5  ;;  %v2937_v8 = vrot.slane %v5529_v54, 5  ;;  %v5590_v20 = vld [vmem:[%s6906_s30 + $0x9c] sm:$0xe]  ;;  %v6757_v44 = vld [vmem:[%s6906_s30 + $0xc] sm:$0xf] }
  0x8d   : > { %6261 = vmatmul.mubr.msk.bf16.gmra.mrb[12].mxu0 %vm750_vm3, %v5618_v12  ;;  %v2928_v18 = vsel %vm7158_vm7, %v5603_v58, %v2927_v7  ;;  %v2929_v21 = vrot.slane %v2927_v7, 4  ;;  %v2941_v28 = vrot.slane %v5531_v17, 5  ;;  %v7396_v34 = vld [vmem:[%s6906_s30 + $0x10] sm:$0xf]  ;;  %v6759_v47 = vld [vmem:[%s6906_s30 + $0x18] sm:$0xf] }
  0x8e   : > { %6107 = vmatmul.mubr.msk.bf16.gmra.mrb[28].mxu1 %vm750_vm3, %v5334_v2  ;;  %6264 = vmatprep.mubr.msk.bf16.mxu0 %vm750_vm3, %v5619_v6  ;;  %v2935_v38 = vsel %vm7158_vm7, %v5604_v10, %v2934_v11  ;;  %v2936_v1 = vrot.slane %v2934_v11, 4  ;;  %v5352_v45 = vcombine.low %v6757_v44, %v7396_v34  ;;  %v7403_v9 = vld [vmem:[%s6906_s30 + $0x1c] sm:$0xf]  ;;  %v5605_v48 = vrot.slane %v5589_v23, 9  ;;  %v5537_v57 = vld [vmem:[%s6906_s30 + $0xac] sm:$0xf] }
  0x8f   : > { %6112 = vmatprep.mubr.msk.bf16.mxu1 %vm750_vm3, %v5351_v62  ;;  %v2931_v59 = vsel %vm7158_vm7, %v2929_v21, %v2930_v41  ;;  %v5353_v26 = vcombine.low %v6759_v47, %v7403_v9  ;;  %v2943_v51 = vrot.slane %v2941_v28, 4  ;;  %v2944_v62 = vrot.slane %v5532_v25, 5  ;;  %v6761_v54 = vld [vmem:[%s8760_s1 + $0x4] sm:$0x3]  ;;  %v5540_v2 = vld [vmem:[%s6906_s30 + $0xb8] sm:$0xf] }
  0x90   : > { %v5620_v49 = vcombine.low %v2928_v18, %v2931_v59  ;;  %v2938_v50 = vsel %vm7158_vm7, %v2936_v1, %v2937_v8  ;;  %v5606_v12 = vrot.slane %v5590_v20, 9  ;;  %v2948_v63 = vrot.slane %v5534_v31, 5  ;;  %v7418_v7 = vld [vmem:[%s8760_s1 + $0x6] sm:$0x3]  ;;  %v5538_v10 = vld [vmem:[%s6906_s30 + $0xb0] sm:$0x1] }
  0x91   : > { %v5621_v4 = vcombine.low %v2935_v38, %v2938_v50  ;;  %v2951_v58 = vrot.slane %v5535_v60, 5  ;;  %v1518_v61 = vsel %vm799_vm0, %v6761_v54, 0  ;;  %v2942_v41 = vsel %vm7158_vm7, %v5605_v48, %v2941_v28  ;;  %v5591_v11 = vld [vmem:[%s6906_s30 + $0xa8] sm:$0xe]  ;;  %v5541_v25 = vld [vmem:[%s6906_s30 + $0xbc] sm:$0x1] }
  0x92   : > { %v2950_v6 = vrot.slane %v2948_v63, 4  ;;  %v2945_v17 = vsel %vm7158_vm7, %v2943_v51, %v2944_v62  ;;  %v2955_v8 = vrot.slane %v5537_v57, 5  ;;  %v2949_v23 = vsel %vm7158_vm7, %v5606_v12, %v2948_v63  ;;  %v5592_v31 = vld [vmem:[%s6906_s30 + $0xb4] sm:$0xe]  ;;  %v6762_v38 = vld [vmem:[%s6906_s30 + $0x24] sm:$0xf] }
  0x93   : > { %v2962_v21 = vrot.slane %v5540_v2, 5  ;;  %v7439_v1 = vld [vmem:[%s6906_s30 + $0x28] sm:$0xf]  ;;  %v5622_v60 = vcombine.low %v2942_v41, %v2945_v17  ;;  %v5607_v44 = vrot.slane %v5591_v11, 9  ;;  %v2958_v59 = vrot.slane %v5538_v10, 5 }
  0x94   : > { %v2952_v18 = vsel %vm7158_vm7, %v2950_v6, %v2951_v58  ;;  %v5354_v28 = vcombine.low %v6762_v38, %v7439_v1  ;;  %v6764_v47 = vld [vmem:[%s6906_s30 + $0x30] sm:$0xf]  ;;  %v2965_v51 = vrot.slane %v5541_v25, 5  ;;  %v5543_v62 = vld [vmem:[%s6906_s30 + $0xc4] sm:$0xf]  ;;  %v2350_v25 = vshrl.u32 %v7366_v40, 16 }
  0x95   : > { %6265 = vmatmul.mubr.msk.bf16.gmra.mrb[16].mxu0 %vm750_vm3, %v5620_v49  ;;  %v5623_v20 = vcombine.low %v2949_v23, %v2952_v18  ;;  %v5608_v49 = vrot.slane %v5592_v31, 9  ;;  %v2964_v50 = vrot.slane %v2962_v21, 4  ;;  %v2956_v57 = vsel %vm7158_vm7, %v5607_v44, %v2955_v8  ;;  %v5593_v12 = vld [vmem:[%s6906_s30 + $0xc0] sm:$0xe]  ;;  %v6766_v41 = vld [vmem:[%s6906_s30 + $0x3c] sm:$0xf] }
  0x96   : > { %6113 = vmatmul.mubr.msk.bf16.vlgmr.msra.gmra.mrb[0].mxu1 %vm750_vm3, %v5352_v45  ;;  %6268 = vmatprep.mubr.msk.bf16.mxu0 %vm750_vm3, %v5621_v4  ;;  %v2957_v45 = vrot.slane %v2955_v8, 4  ;;  %v2969_v63 = vrot.slane %v5543_v62, 5  ;;  %v5609_v6 = vrot.slane %v5593_v12, 9  ;;  %v7464_v17 = vld [vmem:[%s6906_s30 + $0x40] sm:$0xf]  ;;  %v5357_v18 = vcombine.low %v7071_v27, %v7074_v36  ;;  %v6718_v62 = vld [vmem:[%s6906_s30 + $0x24] sm:$0xff]  }
  0x97   : > { %6145 = vmatpush3.bf16.msra.mxu1 %v1518_v61  ;;  %6116 = vmatprep.mubr.msk.bf16.mxu1 %vm750_vm3, %v5353_v26  ;;  %v7444_v26 = vld [vmem:[%s6906_s30 + $0x34] sm:$0xf]  ;;  %v2963_v58 = vsel %vm7158_vm7, %v5608_v49, %v2962_v21  ;;  %v2966_v54 = vsel %vm7158_vm7, %v2964_v50, %v2965_v51  ;;  %v5544_v61 = vld [vmem:[%s6906_s30 + $0xc8] sm:$0x1]  ;;  %v5356_v10 = vcombine.low %v6766_v41, %v7464_v17  ;;  %v2346_v21 = vshll.u32 %v7366_v40, 16 }
  0x98   : > { %6643 = vmatprep.subr.msk.bf16.mxu1 %vm799_vm0, %v7418_v7  ;;  %v5355_v48 = vcombine.low %v6764_v47, %v7444_v26  ;;  %v2959_v4 = vsel %vm7158_vm7, %v2957_v45, %v2958_v59  ;;  %v5625_v11 = vcombine.low %v2963_v58, %v2966_v54  ;;  %v2971_v8 = vrot.slane %v2969_v63, 4  ;;  %v1256_v45 = vld [vmem:[%s6906_s30] sm:$0xe]  ;;  %v1257_v59 = vld [vmem:[%s6906_s30 + $0xc] sm:$0xe] }
  0x99   : > { %v5624_v2 = vcombine.low %v2956_v57, %v2959_v4  ;;  %v2972_v23 = vrot.slane %v5544_v61, 5  ;;  %v2970_v31 = vsel %vm7158_vm7, %v5609_v6, %v2969_v63  ;;  %v7479_v27 = vrot.slane %v2346_v21, 5  ;;  %v1260_v41 = vld [vmem:[%s6906_s30 + $0x30] sm:$0xe] }
  0x9a   : > { %v2352_v36 = vrot.slane %v2350_v25, 4  ;;  %v5359_v44 = vcombine.low %v7131_v19, %v7137_v35  ;;  %v2356_v47 = vshll.u32 %v7369_v55, 16  ;;  %v5383_v19 = vrot.slane %v1256_v45, 9 }
  0x9b   : > { %v2973_v38 = vsel %vm7158_vm7, %v2971_v8, %v2972_v23  ;;  %8782 = vst [vmem:[#allocation3_spill] sm:$0xff] %v7479_v27  ;;  %v5384_v35 = vrot.slane %v1257_v59, 9  ;;  %v1323_v4 = vrot.slane %v7403_v9, 5  ;;  %v1330_v12 = vrot.slane %v7439_v1, 5  ;;  %v1261_v8 = vld [vmem:[%s6906_s30 + $0x3c] sm:$0xe] }
  0x9c   : > { %v5626_v40 = vcombine.low %v2970_v31, %v2973_v38  ;;  %v2353_v49 = vor.u32 %v2352_v36, %v7479_v27  ;;  %v7499_v51 = vrot.slane %v2356_v47, 5  ;;  %v5360_v58 = vcombine.low %v7152_v0, %v7165_v29  ;;  %v1262_v31 = vld [vmem:[%s6906_s30 + $0x48] sm:$0xe]  ;;  %v6772_v59 = vld [vmem:[%s6906_s30 + $0x38] sm:$0x1] }
  0x9d   : > { %6269 = vmatmul.mubr.msk.bf16.gmra.mrb[20].mxu0 %vm750_vm3, %v5622_v60  ;;  %v5358_v60 = vcombine.low %v7100_v24, %v7106_v37  ;;  %v6769_v24 = vld [vmem:[%s6906_s30 + $0x14] sm:$0x1]  ;;  %v4158_v54 = vsel %vm799_vm0, %v7223_v22, 0  ;;  %v5361_v61 = vcombine.low %v7184_v53, %v7191_v16  ;;  %v5362_v6 = vcombine.low %v7210_v39, %v7218_v43  ;;  %v6770_v16 = vld [vmem:[%s6906_s30 + $0x20] sm:$0x1] }
  0x9e   : > { %6117 = vmatmul.mubr.msk.bf16.gmra.mrb[4].mxu1 %vm750_vm3, %v5354_v28  ;;  %6272 = vmatprep.mubr.msk.bf16.mxu0 %vm750_vm3, %v5623_v20  ;;  %v1316_v28 = vrot.slane %v7396_v34, 5  ;;  %v6716_v20 = vld [vmem:[%s6906_s30 + $0x18] sm:$0xff]   ;;  %v6768_v34 = vld [vmem:[%s6906_s30 + $0x8] sm:$0x1]  ;;  %v1319_v37 = vrot.slane %v6769_v24, 5  ;;  %8783 = vst [vmem:[#allocation4_spill] sm:$0xff] %v7499_v51  ;;  %v5363_v9 = vcombine.low %v7242_v5, %v7254_v30 }
  0x9f   : > { %6120 = vmatprep.mubr.msk.bf16.mxu1 %vm750_vm3, %v5355_v48  ;;  %v1309_v48 = vrot.slane %v7362_v15, 5  ;;  %v1312_v50 = vrot.slane %v6768_v34, 5  ;;  %v1258_v15 = vld [vmem:[%s6906_s30 + $0x18] sm:$0xe]  ;;  %v7504_v63 = vrot.slane %v2353_v49, 4  ;;  %v1326_v22 = vrot.slane %v6770_v16, 5 }
  0xa0   : > { %v1318_v55 = vrot.slane %v1316_v28, 4  ;;  %v5385_v1 = vrot.slane %v1258_v15, 9  ;;  %v7526_v29 = vsel %vm7158_vm7, %v5384_v35, %v1316_v28  ;;  %v1332_v25 = vrot.slane %v1330_v12, 4  ;;  %v5708_v24 = vld [vmem:[%s6906_s30 + $0x18] sm:$0xf] }
  0xa1   : > { %v1311_v57 = vrot.slane %v1309_v48, 4  ;;  %8784 = vst [vmem:[#allocation5_spill] sm:$0xff] %v7504_v63  ;;  %v7522_v0 = vsel %vm7158_vm7, %v5383_v19, %v1309_v48  ;;  %v1340_v47 = vrot.slane %v6772_v59, 5  ;;  %v7563_v49 = vsel %vm799_vm0, %v7418_v7, 0  ;;  %v5709_v7 = vld [vmem:[%s6906_s30 + $0x1c] sm:$0xf] }
  0xa2   : > { %v7530_v53 = vsel %vm7158_vm7, %v1318_v55, %v1319_v37  ;;  %v7567_v34 = vsel %vm7158_vm7, %v5385_v1, %v1323_v4  ;;  %v6722_v37 = vld [vmem:[%s6906_s30 + $0x3c] sm:$0xff]   ;;  %v5388_v35 = vrot.slane %v1261_v8, 9  ;;  %v6773_v55 = vld [vmem:[%s6906_s30 + $0x44] sm:$0x1]  ;;  %v3679_v8 = vshll.u32 %v5708_v24, 16 }
  0xa3   : > { %v7541_v23 = vsel %vm7158_vm7, %v1311_v57, %v1312_v50  ;;  %v1263_v50 = vld [vmem:[%s6906_s30 + $0x54] sm:$0xe]  ;;  %v1347_v15 = vrot.slane %v6773_v55, 5  ;;  %v5712_v39 = vld [vmem:[%s6906_s30 + $0x28] sm:$0xf] }
  0xa4   : > { %v6780_v5 = vld [vmem:[%s6906_s30 + $0x70] sm:$0xf] }
  0xa5   : > { %6273 = vmatmul.mubr.msk.bf16.gmra.mrb[24].mxu0 %vm750_vm3, %v5624_v2  ;;  %v1259_v2 = vld [vmem:[%s6906_s30 + $0x24] sm:$0xe]  ;;  %v1372_v30 = vrot.slane %v6780_v5, 5 }
  0xa6   : > { %6121 = vmatmul.mubr.msk.bf16.gmra.mrb[8].mxu1 %vm750_vm3, %v5356_v10  ;;  %6276 = vmatprep.mubr.msk.bf16.mxu0 %vm750_vm3, %v5625_v11  ;;  %v1337_v10 = vrot.slane %v7444_v26, 5  ;;  %v6720_v11 = vld [vmem:[%s6906_s30 + $0x30] sm:$0xff]   ;;  %v5386_v21 = vrot.slane %v1259_v2, 9 }
  0xa7   : > { %6124 = vmatprep.mubr.msk.bf16.mxu1 %vm750_vm3, %v5357_v18  ;;  %v7537_v26 = vld [vmem:[%s8760_s1 + $0x10] sm:$0x3]  ;;  %v1325_v18 = vrot.slane %v1323_v4, 4  ;;  %v1374_v48 = vrot.slane %v1372_v30, 4 }
  0xa8   : > { %v1339_v45 = vrot.slane %v1337_v10, 4  ;;  %v7574_v19 = vsel %vm7158_vm7, %v5386_v21, %v1330_v12  ;;  %v3689_v21 = vshrl.u32 %v5709_v7, 16 }
  0xa9   : > { %v7583_v4 = vsel %vm7158_vm7, %v1325_v18, %v1326_v22  ;;  %v3676_v22 = vshrl.u32 %v5708_v24, 16  ;;  %v3685_v18 = vshll.u32 %v5709_v7, 16  ;;  %v5711_v24 = vld [vmem:[%s6906_s30 + $0x24] sm:$0xf] }
  0xaa   : > { %v7596_v1 = vsel %vm7158_vm7, %v1339_v45, %v1340_v47 }
  0xab   : > { %v3678_v43 = vrot.slane %v3676_v22, 4  ;;  %v7638_v7 = vrot.slane %v3685_v18, 5  ;;  %v3703_v22 = vshll.u32 %v5711_v24, 16  ;;  %v3713_v18 = vshrl.u32 %v5712_v39, 16 }
  0xad   : > { %6277 = vmatmul.mubr.msk.bf16.gmra.mrb[28].mxu0 %vm750_vm3, %v5626_v40  ;;  %v6771_v40 = vld [vmem:[%s6906_s30 + $0x2c] sm:$0x1]  ;;  %v3705_v27 = vrot.slane %v3703_v22, 5 }
  0xae   : > { %6125 = vmatmul.mubr.msk.bf16.gmra.mrb[12].mxu1 %vm750_vm3, %v5358_v60  ;;  %6282 = vmatprep.mubr.msk.bf16.mxu0 %vm750_vm3, %v6716_v20  ;;  %v1333_v28 = vrot.slane %v6771_v40, 5  ;;  %v1344_v60 = vrot.slane %v7464_v17, 5  ;;  %v6776_v40 = vld [vmem:[%s6906_s30 + $0x50] sm:$0x1]  ;;  %v6781_v17 = vld [vmem:[%s6906_s30 + $0x74] sm:$0x1] }
  0xaf   : > { %6128 = vmatprep.mubr.msk.bf16.mxu1 %vm750_vm3, %v5359_v44  ;;  %v5387_v44 = vrot.slane %v1260_v41, 9  ;;  %v5390_v41 = vrot.slane %v1263_v50, 9  ;;  %v1264_v50 = vld [vmem:[%s6906_s30 + $0x60] sm:$0xe]  ;;  %v5713_v20 = vld [vmem:[%s6906_s30 + $0x2c] sm:$0x1] }
  0xb0   : > { %v1346_v12 = vrot.slane %v1344_v60, 4  ;;  %v7609_v45 = vsel %vm7158_vm7, %v5388_v35, %v1344_v60  ;;  %v6777_v35 = vld [vmem:[%s6906_s30 + $0x5c] sm:$0x1] }
  0xb1   : > { %v7592_v2 = vsel %vm7158_vm7, %v5387_v44, %v1337_v10  ;;  %v1361_v55 = vrot.slane %v6777_v35, 5  ;;  %v1265_v35 = vld [vmem:[%s6906_s30 + $0x6c] sm:$0xe] }
  0xb2   : > { %v7613_v59 = vsel %vm7158_vm7, %v1346_v12, %v1347_v15  ;;  %v6778_v15 = vld [vmem:[%s6906_s30 + $0x64] sm:$0xf]  ;;  %v3691_v12 = vrot.slane %v3689_v21, 4  ;;  %v5392_v5 = vrot.slane %v1265_v35, 9 }
  0xb3   : > { %v6728_v21 = vld [vmem:[%s6906_s30 + $0x60] sm:$0xff]  }
  0xb5   : > { %6283 = vmatmul.mubr.msk.bf16.vlgmr.msra.gmra.mrb[0].mxu0 %vm750_vm3, %v6718_v62  ;;  %v6774_v62 = vld [vmem:[%s6906_s30 + $0x4c] sm:$0xf] }
  0xb6   : > { %6129 = vmatmul.mubr.msk.bf16.gmra.mrb[16].mxu1 %vm750_vm3, %v5360_v58  ;;  %6315 = vmatpush3.bf16.msra.mxu0 %v4158_v54  ;;  %v1351_v57 = vrot.slane %v6774_v62, 5  ;;  %v7587_v58 = vsel %vm7158_vm7, %v1332_v25, %v1333_v28  ;;  %v5389_v54 = vrot.slane %v1262_v31, 9  ;;  %v1354_v28 = vrot.slane %v6776_v40, 5 }
  0xb7   : > { %6132 = vmatprep.mubr.msk.bf16.mxu1 %vm750_vm3, %v5361_v61  ;;  %6286 = vmatprep.mubr.msk.bf16.mxu0 %vm750_vm3, %v6720_v11  ;;  %v6724_v61 = vld [vmem:[%s6906_s30 + $0x48] sm:$0xff]   ;;  %v6775_v11 = vld [vmem:[%s6906_s30 + $0x58] sm:$0xf]  ;;  %v1365_v62 = vrot.slane %v6778_v15, 5  ;;  %v5715_v15 = vld [vmem:[%s6906_s30 + $0x34] sm:$0xf] }
  0xb8   : > { %6649 = vmatprep.subr.msk.bf16.mxu0 %vm799_vm0, %v7537_v26  ;;  %v1358_v16 = vrot.slane %v6775_v11, 5  ;;  %v1353_v31 = vrot.slane %v1351_v57, 4  ;;  %v7617_v47 = vsel %vm7158_vm7, %v5389_v54, %v1351_v57  ;;  %v5710_v57 = vld [vmem:[%s6906_s30 + $0x20] sm:$0x1]  ;;  %v5714_v54 = vld [vmem:[%s6906_s30 + $0x30] sm:$0xf] }
  0xb9   : > { %v5391_v11 = vrot.slane %v1264_v50, 9  ;;  %v3727_v50 = vshll.u32 %v5714_v54, 16  ;;  %v3695_v25 = vshll.u32 %v5710_v57, 16  ;;  %v3733_v36 = vshll.u32 %v5715_v15, 16 }
  0xba   : > { %v7628_v60 = vsel %vm7158_vm7, %v5390_v41, %v1358_v16  ;;  %v7644_v41 = vsel %vm7158_vm7, %v1353_v31, %v1354_v28  ;;  %v1367_v31 = vrot.slane %v1365_v62, 4  ;;  %v3724_v28 = vshrl.u32 %v5714_v54, 16 }
  0xbb   : > { %v7686_v35 = vrot.slane %v3733_v36, 5 }
  0xbd   : > { %6287 = vmatmul.mubr.msk.bf16.gmra.mrb[4].mxu0 %vm750_vm3, %v6722_v37  ;;  %v1360_v37 = vrot.slane %v1358_v16, 4  ;;  %v6779_v16 = vld [vmem:[%s6906_s30 + $0x68] sm:$0x1] }
  0xbe   : > { %6133 = vmatmul.mubr.msk.bf16.gmra.mrb[20].mxu1 %vm750_vm3, %v5362_v6  ;;  %6290 = vmatprep.mubr.msk.bf16.mxu0 %vm750_vm3, %v6724_v61  ;;  %v3681_v6 = vrot.slane %v3679_v8, 5  ;;  %v6726_v61 = vld [vmem:[%s6906_s30 + $0x54] sm:$0xff]   ;;  %v1368_v40 = vrot.slane %v6779_v16, 5  ;;  %v3709_v8 = vshll.u32 %v5712_v39, 16  ;;  %v3692_v16 = vor.u32 %v3691_v12, %v7638_v7 }
  0xbf   : > { %6136 = vmatprep.mubr.msk.bf16.mxu1 %vm750_vm3, %v5363_v9  ;;  %v3700_v9 = vshrl.u32 %v5711_v24, 16  ;;  %v7653_v44 = vsel %vm7158_vm7, %v1360_v37, %v1361_v55  ;;  %v1375_v24 = vrot.slane %v6781_v17, 5  ;;  %v3737_v39 = vshrl.u32 %v5715_v15, 16 }
  0xc0   : > { %v3682_v10 = vor.u32 %v3681_v6, %v3678_v43  ;;  %v7659_v37 = vrot.slane %v3709_v8, 5  ;;  %v3715_v55 = vrot.slane %v3713_v18, 4  ;;  %v8785_v43 = vcombine.low %v7263_v52, %v7274_v46  ;;  %v6782_v8 = vld [vmem:[%s6906_s30 + $0x7c] sm:$0xf]  ;;  %v7695_v18 = vld [vmem:[%s6906_s30 + $0x38] sm:$0x1] }
  0xc1   : > { %v3702_v38 = vrot.slane %v3700_v9, 4  ;;  %v7668_v17 = vsel %vm7158_vm7, %v5391_v11, %v1365_v62  ;;  %v7672_v57 = vsel %vm7158_vm7, %v1367_v31, %v1368_v40  ;;  %v3726_v6 = vrot.slane %v3724_v28, 4  ;;  %8787 = vst [vmem:[#allocation6_spill] sm:$0xff] %v7695_v18 }
  0xc2   : > { %v3729_v12 = vrot.slane %v3727_v50, 5  ;;  %v8786_v52 = vcombine.low %v7295_v33, %v7300_v56  ;;  %v3683_v46 = vrot.slane %v3682_v10, 4  ;;  %v3693_v54 = vrot.slane %v3692_v16, 4  ;;  %v6730_v33 = vld [vmem:[%s6906_s30 + $0x6c] sm:$0xff]   ;;  %v1267_v16 = vld [vmem:[%s6906_s30 + $0x84] sm:$0xe] }
  0xc3   : > { %v3719_v62 = vshll.u32 %v5713_v20, 16  ;;  %v7680_v11 = vsel %vm7158_vm7, %v5392_v5, %v1372_v30  ;;  %v7684_v40 = vsel %vm7158_vm7, %v1374_v48, %v1375_v24  ;;  %v3739_v9 = vrot.slane %v3737_v39, 4  ;;  %v6731_v48 = vld [vmem:[%s6906_s30 + $0x78] sm:$0xff]  }
  0xc4   : > { %v3706_v10 = vor.u32 %v3705_v27, %v3702_v38  ;;  %v3716_v20 = vor.u32 %v3715_v55, %v7659_v37  ;;  %v1379_v30 = vrot.slane %v6782_v8, 5  ;;  %v3730_v38 = vor.u32 %v3729_v12, %v3726_v6  ;;  %v5717_v5 = vld [vmem:[%s6906_s30 + $0x3c] sm:$0xf] }
  0xc5   : > { %6291 = vmatmul.mubr.msk.bf16.gmra.mrb[8].mxu0 %vm750_vm3, %v6726_v61  ;;  %v3697_v61 = vrot.slane %v3695_v25, 5  ;;  %v1266_v25 = vld [vmem:[%s6906_s30 + $0x78] sm:$0xe]  ;;  %v7711_v50 = vrot.slane %v3719_v62, 5  ;;  %v3740_v39 = vor.u32 %v3739_v9, %v7686_v35  ;;  %v3743_v55 = vshll.u32 %v7695_v18, 16 }
  0xc6   : > { %6137 = vmatmul.mubr.msk.bf16.gmra.mrb[24].mxu1 %vm750_vm3, %v8785_v43  ;;  %6294 = vmatprep.mubr.msk.bf16.mxu0 %vm750_vm3, %v6728_v21  ;;  %v3688_v21 = vsel %vm6932_vm4, %v3683_v46, %v7638_v7  ;;  %v5393_v24 = vrot.slane %v1266_v25, 9  ;;  %v6783_v43 = vld [vmem:[%s6906_s30 + $0x88] sm:$0xf]  ;;  %v7719_v7 = vld [vmem:[%s6906_s30 + $0x40] sm:$0xf]  ;;  %v3707_v12 = vrot.slane %v3706_v10, 4  ;;  %v8789_v62 = vcombine.low %v7315_v14, %v7324_v42 }
  0xc7   : > { %6140 = vmatprep.mubr.msk.bf16.mxu1 %vm750_vm3, %v8786_v52  ;;  %v3698_v31 = vsel %vm6932_vm4, %v3693_v54, %v3697_v61  ;;  %v1386_v6 = vrot.slane %v6783_v43, 5  ;;  %8788 = vst [vmem:[#allocation7_spill] sm:$0xff] %v7719_v7  ;;  %v3717_v52 = vrot.slane %v3716_v20, 4  ;;  %v1381_v46 = vrot.slane %v1379_v30, 4  ;;  %v6784_v54 = vld [vmem:[%s6906_s30 + $0x80] sm:$0x1] }
  0xc8   : > { %v1382_v61 = vrot.slane %v6784_v54, 5  ;;  %v3731_v9 = vrot.slane %v3730_v38, 4  ;;  %v5394_v25 = vrot.slane %v1267_v16, 9  ;;  %v3748_v8 = vshrl.u32 %v5717_v5, 16  ;;  %v6732_v10 = vld [vmem:[%s6906_s30 + $0x84] sm:$0xff]  }
  0xc9   : > { %v3751_v43 = vshll.u32 %v5717_v5, 16  ;;  %v7733_v20 = vcombine.low %v3688_v21, %v3698_v31  ;;  %v7737_v14 = vsel %vm799_vm0, %v7537_v26, 0  ;;  %v3761_v38 = vshrl.u32 %v7719_v7, 16  ;;  %v6733_v21 = vld [vmem:[%s6906_s30 + $0x90] sm:$0xff]   ;;  %v6789_v18 = vld [vmem:[%s6906_s30 + $0xa0] sm:$0xf] }
  0xca   : > { %v3741_v16 = vrot.slane %v3740_v39, 4  ;;  %v3745_v5 = vrot.slane %v3743_v55, 5  ;;  %v1388_v54 = vrot.slane %v1386_v6, 4  ;;  %v3712_v31 = vsel %vm6932_vm4, %v3707_v12, %v7659_v37 }
  0xcb   : > { %v3722_v26 = vsel %vm6932_vm4, %v3717_v52, %v7711_v50  ;;  %v7752_v39 = vsel %vm7158_vm7, %v5393_v24, %v1379_v30  ;;  %v7756_v55 = vsel %vm7158_vm7, %v1381_v46, %v1382_v61  ;;  %v3736_v37 = vsel %vm6932_vm4, %v3731_v9, %v7686_v35  ;;  %v5723_v30 = vld [vmem:[%s6906_s30 + $0x54] sm:$0xf]  ;;  %v7773_v24 = vld [vmem:[%s6906_s30 + $0x58] sm:$0xf]  ;;  %v7778_v61 = vld [vmem:[%s6906_s30 + $0x90] sm:$0xe] }
  0xcc   : > { %v7769_v12 = vsel %vm7158_vm7, %v5394_v25, %v1386_v6  ;;  %v3750_v50 = vrot.slane %v3748_v8, 4  ;;  %v3753_v52 = vrot.slane %v3751_v43, 5  ;;  %v3763_v46 = vrot.slane %v3761_v38, 4 }
  0xcd   : > { %6295 = vmatmul.mubr.msk.bf16.gmra.mrb[12].mxu0 %vm750_vm3, %v6730_v33  ;;  %v8790_v33 = vcombine.low %v7522_v0, %v7541_v23  ;;  %v6785_v0 = vld [vmem:[%s6906_s30 + $0x8c] sm:$0x1]  ;;  %v3746_v36 = vsel %vm6932_vm4, %v3741_v16, %v3745_v5  ;;  %v3796_v25 = vshrl.u32 %v5723_v30, 16  ;;  %v3799_v8 = vshll.u32 %v5723_v30, 16 }
  0xce   : > { %6141 = vmatmul.mubr.msk.bf16.gmra.mrb[28].mxu1 %vm750_vm3, %v8789_v62  ;;  %6298 = vmatprep.mubr.msk.bf16.mxu0 %vm750_vm3, %v6731_v48  ;;  %v3757_v48 = vshll.u32 %v7719_v7, 16  ;;  %v1389_v23 = vrot.slane %v6785_v0, 5  ;;  %v5720_v62 = vld [vmem:[%s6906_s30 + $0x48] sm:$0xf]  ;;  %v7762_v0 = vld [vmem:[%s6906_s30 + $0x4c] sm:$0xf]  ;;  %v8792_v38 = vcombine.low %v7526_v29, %v7530_v53  ;;  %v7796_v16 = vcombine.low %v3712_v31, %v3722_v26 }
  0xcf   : > { %6146 = vmatprep.mubr.msk.bf16.mxu1 %vm750_vm3, %v8790_v33  ;;  %v7759_v33 = vld [vmem:[%s6906_s30 + $0x44] sm:$0x1]  ;;  %v3772_v27 = vshrl.u32 %v5720_v62, 16  ;;  %v3775_v15 = vshll.u32 %v5720_v62, 16  ;;  %v3781_v6 = vshll.u32 %v7762_v0, 16  ;;  %v3785_v9 = vshrl.u32 %v7762_v0, 16 }
  0xd0   : > { %8791 = vst [vmem:[#allocation8_spill] sm:$0xff] %v7759_v33  ;;  %v7775_v28 = vrot.slane %v3757_v48, 5  ;;  %v7784_v35 = vsel %vm7158_vm7, %v1388_v54, %v1389_v23  ;;  %v3805_v43 = vshll.u32 %v7773_v24, 16  ;;  %v3809_v48 = vshrl.u32 %v7773_v24, 16  ;;  %v5726_v31 = vld [vmem:[%s6906_s30 + $0x60] sm:$0xf] }
  0xd1   : > { %v3767_v5 = vshll.u32 %v7759_v33, 16  ;;  %v5395_v54 = vrot.slane %v7778_v61, 9  ;;  %v8793_v23 = vcombine.low %v7567_v34, %v7583_v4  ;;  %v7807_v29 = vcombine.low %v3736_v37, %v3746_v36  ;;  %v6734_v26 = vld [vmem:[%s6906_s30 + $0x9c] sm:$0xff]   ;;  %v6735_v30 = vld [vmem:[%s6906_s30 + $0xa8] sm:$0xff]  }
  0xd2   : > { %v3754_v53 = vor.u32 %v3753_v52, %v3750_v50  ;;  %v3774_v62 = vrot.slane %v3772_v27, 4  ;;  %v7818_v34 = vrot.slane %v3781_v6, 5  ;;  %v3787_v4 = vrot.slane %v3785_v9, 4  ;;  %v6786_v36 = vld [vmem:[%s8760_s1 + $0x8] sm:$0x3] }
  0xd3   : > { %v3798_v27 = vrot.slane %v3796_v25, 4  ;;  %v3801_v37 = vrot.slane %v3799_v8, 5  ;;  %v7827_v50 = vrot.slane %v3805_v43, 5  ;;  %v3811_v52 = vrot.slane %v3809_v48, 4  ;;  %v6787_v6 = vld [vmem:[%s6906_s30 + $0x94] sm:$0xf] }
  0xd4   : > { %v7833_v9 = vld [vmem:[%s6906_s30 + $0x64] sm:$0xf]  ;;  %v3820_v61 = vshrl.u32 %v5726_v31, 16  ;;  %v7835_v22 = vrot.slane %v3754_v53, 4  ;;  %v1400_v25 = vrot.slane %v6789_v18, 5  ;;  %v3788_v43 = vor.u32 %v3787_v4, %v7818_v34 }
  0xd5   : > { %6299 = vmatmul.mubr.msk.bf16.gmra.mrb[16].mxu0 %vm750_vm3, %v6732_v10  ;;  %8794 = vst [vmem:[#allocation9_spill] sm:$0xff] %v7833_v9  ;;  %v3823_v10 = vshll.u32 %v5726_v31, 16  ;;  %v3802_v31 = vor.u32 %v3801_v37, %v3798_v27  ;;  %v3812_v53 = vor.u32 %v3811_v52, %v7827_v50  ;;  %v8795_v18 = vcombine.low %v7574_v19, %v7587_v58  ;;  %v6736_v37 = vld [vmem:[%s6906_s30 + $0xb4] sm:$0xff]  }
  0xd6   : > { %6147 = vmatmul.mubr.msk.bf16.vlgmr.msra.gmra.mrb[0].mxu1 %vm750_vm3, %v8792_v38  ;;  %6302 = vmatprep.mubr.msk.bf16.mxu0 %vm750_vm3, %v6733_v21  ;;  %v3777_v21 = vrot.slane %v3775_v15, 5  ;;  %v7816_v38 = vld [vmem:[%s6906_s30 + $0x50] sm:$0x1]  ;;  %v7825_v15 = vld [vmem:[%s6906_s30 + $0x5c] sm:$0x1]  ;;  %v8796_v27 = vcombine.low %v7592_v2, %v7596_v1  ;;  %v1402_v52 = vrot.slane %v1400_v25, 4 }
  0xd7   : > { %6179 = vmatpush3.bf16.msra.mxu1 %v7563_v49  ;;  %6150 = vmatprep.mubr.msk.bf16.mxu1 %vm750_vm3, %v8793_v23  ;;  %v3764_v49 = vor.u32 %v3763_v46, %v7775_v28  ;;  %v7829_v46 = vrot.slane %v3767_v5, 5  ;;  %v1393_v23 = vrot.slane %v6787_v6, 5  ;;  %v3791_v48 = vshll.u32 %v7816_v38, 16  ;;  %v1269_v5 = vld [vmem:[%s6906_s30 + $0x9c] sm:$0xe] }
  0xd8   : > { %6645 = vmatprep.subr.msk.bf16.mxu1 %vm799_vm0, %v6786_v36  ;;  %v6788_v36 = vld [vmem:[%s6906_s30 + $0x98] sm:$0x1]  ;;  %v3778_v7 = vor.u32 %v3777_v21, %v3774_v62  ;;  %v3815_v6 = vshll.u32 %v7825_v15, 16  ;;  %v3833_v62 = vshrl.u32 %v7833_v9, 16  ;;  %v3825_v4 = vrot.slane %v3823_v10, 5 }
  0xd9   : > { %v1396_v33 = vrot.slane %v6788_v36, 5  ;;  %v3765_v8 = vrot.slane %v3764_v49, 4  ;;  %v3829_v36 = vshll.u32 %v7833_v9, 16  ;;  %v7854_v21 = vsel %vm7158_vm7, %v5395_v54, %v1393_v23  ;;  %v7865_v2 = vld [vmem:[%s6906_s30 + $0x68] sm:$0x1] }
  0xda   : > { %v3822_v49 = vrot.slane %v3820_v61, 4  ;;  %v3779_v19 = vrot.slane %v3778_v7, 4  ;;  %v5396_v58 = vrot.slane %v1269_v5, 9  ;;  %v3789_v3 = vrot.slane %v3788_v43, 4  ;;  %8797 = vst [vmem:[#allocation10_spill] sm:$0xff] %v7865_v2  ;;  %v6737_v5 = vld [vmem:[%s6906_s30 + $0xc0] sm:$0xff]  }
  0xdb   : > { %v3793_v54 = vrot.slane %v3791_v48, 5  ;;  %v3817_v63 = vrot.slane %v3815_v6, 5  ;;  %v1407_v61 = vrot.slane %v7300_v56, 5  ;;  %v3803_v10 = vrot.slane %v3802_v31, 4  ;;  %v1271_v31 = vld [vmem:[%s6906_s30 + $0xb4] sm:$0xe] }
  0xdc   : > { %v3813_v51 = vrot.slane %v3812_v53, 4  ;;  %v7867_v1 = vrot.slane %v3829_v36, 5  ;;  %v3835_v7 = vrot.slane %v3833_v62, 4  ;;  %v3760_v43 = vsel %vm6932_vm4, %v7835_v22, %v7775_v28  ;;  %v6791_v62 = vld [vmem:[%s6906_s30 + $0xb0] sm:$0x1] }
  0xdd   : > { %6303 = vmatmul.mubr.msk.bf16.gmra.mrb[20].mxu0 %vm750_vm3, %v6734_v26  ;;  %v1395_v26 = vrot.slane %v1393_v23, 4  ;;  %v1270_v23 = vld [vmem:[%s6906_s30 + $0xa8] sm:$0xe]  ;;  %v3770_v48 = vsel %vm6932_vm4, %v3765_v8, %v7829_v46  ;;  %v3826_v6 = vor.u32 %v3825_v4, %v3822_v49  ;;  %v3784_v53 = vsel %vm6932_vm4, %v3779_v19, %v7818_v34  ;;  %v5729_v46 = vld [vmem:[%s6906_s30 + $0x6c] sm:$0xf] }
  0xde   : > { %6151 = vmatmul.mubr.msk.bf16.gmra.mrb[4].mxu1 %vm750_vm3, %v8795_v18  ;;  %6306 = vmatprep.mubr.msk.bf16.mxu0 %vm750_vm3, %v6735_v30  ;;  %v6790_v18 = vld [vmem:[%s6906_s30 + $0xa4] sm:$0x1]  ;;  %v7887_v36 = vsel %vm7158_vm7, %v5396_v58, %v1400_v25  ;;  %v5397_v28 = vrot.slane %v1270_v23, 9  ;;  %v1409_v8 = vrot.slane %v1407_v61, 4  ;;  %v3839_v49 = vshll.u32 %v7865_v2, 16 }
  0xdf   : > { %6154 = vmatprep.mubr.msk.bf16.mxu1 %vm750_vm3, %v8796_v27  ;;  %v1403_v30 = vrot.slane %v6790_v18, 5  ;;  %v7879_v56 = vsel %vm7158_vm7, %v1395_v26, %v1396_v33  ;;  %v3794_v33 = vsel %vm6932_vm4, %v3789_v3, %v3793_v54  ;;  %v1410_v26 = vrot.slane %v6791_v62, 5  ;;  %v5732_v18 = vld [vmem:[%s6906_s30 + $0x78] sm:$0xf]  ;;  %v7942_v54 = vld [vmem:[%s6906_s30 + $0xbc] sm:$0x1] }
  0xe0   : > { %v3808_v34 = vsel %vm6932_vm4, %v3803_v10, %v7827_v50  ;;  %v3818_v25 = vsel %vm6932_vm4, %v3813_v51, %v3817_v63  ;;  %v3836_v4 = vor.u32 %v3835_v7, %v7867_v1  ;;  %v5398_v27 = vrot.slane %v1271_v31, 9  ;;  %v7916_v51 = vld [vmem:[%s6906_s30 + $0x70] sm:$0xf]  ;;  %v7946_v10 = vld [vmem:[%s6906_s30 + $0x7c] sm:$0xf] }
  0xe1   : > { %v7891_v22 = vsel %vm7158_vm7, %v1402_v52, %v1403_v30  ;;  %v8799_v3 = vcombine.low %v7609_v45, %v7613_v59  ;;  %v7912_v19 = vrot.slane %v3826_v6, 4  ;;  %v1414_v50 = vrot.slane %v7324_v42, 5  ;;  %8800 = vst [vmem:[#allocation12_spill] sm:$0xff] %v7916_v51  ;;  %8802 = vst [vmem:[#allocation13_spill] sm:$0xff] %v7946_v10  ;;  %v5735_v7 = vld [vmem:[%s6906_s30 + $0x84] sm:$0xf] }
  0xe2   : > { %8798 = vst [vmem:[#allocation11_spill] sm:$0xff] %v7891_v22  ;;  %v3844_v63 = vshrl.u32 %v5729_v46, 16  ;;  %v8801_v45 = vcombine.low %v7617_v47, %v7644_v41  ;;  %v7924_v58 = vcombine.low %v3784_v53, %v3794_v33  ;;  %v7930_v42 = vsel %vm7158_vm7, %v5397_v28, %v1407_v61  ;;  %v6738_v61 = vld [vmem:[%s6906_s30 + $0xcc] sm:$0xff]   ;;  %v7958_v31 = vld [vmem:[%s6906_s30 + $0x88] sm:$0xf] }
  0xe3   : > { %v7933_v30 = vcombine.low %v3808_v34, %v3818_v25  ;;  %v7937_v47 = vsel %vm7158_vm7, %v1409_v8, %v1410_v26  ;;  %v7939_v41 = vrot.slane %v3839_v49, 5  ;;  %v3853_v6 = vshll.u32 %v7916_v51, 16  ;;  %8803 = vst [vmem:[#allocation14_spill] sm:$0xff] %v7958_v31  ;;  %v5738_v62 = vld [vmem:[%s6906_s30 + $0x90] sm:$0xf] }
  0xe4   : > { %v7964_v28 = vrot.slane %v1414_v50, 4  ;;  %v7966_v33 = vrot.slane %v3844_v63, 4  ;;  %v3857_v8 = vshrl.u32 %v7916_v51, 16  ;;  %v3868_v26 = vshrl.u32 %v5732_v18, 16  ;;  %v7973_v25 = vld [vmem:[%s6906_s30 + $0x94] sm:$0xf] }
  0xe5   : > { %6307 = vmatmul.mubr.msk.bf16.gmra.mrb[24].mxu0 %vm750_vm3, %v6736_v37  ;;  %v7910_v37 = vcombine.low %v3760_v43, %v3770_v48  ;;  %v7954_v43 = vsel %vm7158_vm7, %v5398_v27, %v1414_v50  ;;  %v3847_v48 = vshll.u32 %v5729_v46, 16  ;;  %v3871_v49 = vshll.u32 %v5732_v18, 16  ;;  %8804 = vst [vmem:[#allocation15_spill] sm:$0xff] %v7973_v25  ;;  %v8011_v2 = vld [vmem:[%s6906_s30 + $0x8c] sm:$0x1] }
  0xe6   : > { %6155 = vmatmul.mubr.msk.bf16.gmra.mrb[8].mxu1 %vm750_vm3, %v8799_v3  ;;  %6310 = vmatprep.mubr.msk.bf16.mxu0 %vm750_vm3, %v6737_v5  ;;  %v7950_v5 = vrot.slane %v3836_v4, 4  ;;  %v3877_v46 = vshll.u32 %v7946_v10, 16  ;;  %v3881_v34 = vshrl.u32 %v7946_v10, 16  ;;  %v3892_v4 = vshrl.u32 %v5735_v7, 16 }
  0xe7   : > { %6158 = vmatprep.mubr.msk.bf16.mxu1 %vm750_vm3, %v8801_v45  ;;  %v3895_v27 = vshll.u32 %v5735_v7, 16  ;;  %v3901_v3 = vshll.u32 %v7958_v31, 16  ;;  %v3905_v50 = vshrl.u32 %v7958_v31, 16  ;;  %v7983_v45 = vld [vmem:[%s6906_s30 + $0x74] sm:$0x1]  ;;  %v3849_v18 = vrot.slane %v3847_v48, 5 }
  0xe8   : > { %v3916_v52 = vshrl.u32 %v5738_v62, 16  ;;  %v3919_v53 = vshll.u32 %v5738_v62, 16  ;;  %v8805_v7 = vcombine.low %v7628_v60, %v7653_v44  ;;  %v3859_v59 = vrot.slane %v3857_v8, 4  ;;  %v5741_v48 = vld [vmem:[%s6906_s30 + $0x9c] sm:$0xf] }
  0xe9   : > { %v3925_v63 = vshll.u32 %v7973_v25, 16  ;;  %v3929_v23 = vshrl.u32 %v7973_v25, 16  ;;  %v8806_v62 = vcombine.low %v7668_v17, %v7672_v57  ;;  %v8001_v44 = vld [vmem:[%s6906_s30 + $0x80] sm:$0x1]  ;;  %v3870_v60 = vrot.slane %v3868_v26, 4 }
  0xea   : > { %8807 = vst [vmem:[#allocation16_spill] sm:$0xff] %v8001_v44  ;;  %v3894_v31 = vrot.slane %v3892_v4, 4  ;;  %v3897_v8 = vrot.slane %v3895_v27, 5  ;;  %v8005_v10 = vrot.slane %v3901_v3, 5  ;;  %v3907_v51 = vrot.slane %v3905_v50, 4 }
  0xeb   : > { %v8008_v25 = vld [vmem:[%s6906_s30 + $0xa0] sm:$0xf]  ;;  %v3918_v17 = vrot.slane %v3916_v52, 4  ;;  %v3921_v57 = vrot.slane %v3919_v53, 5  ;;  %v3943_v9 = vshll.u32 %v5741_v48, 16  ;;  %v3850_v26 = vor.u32 %v3849_v18, %v7966_v33 }
  0xec   : > { %v3887_v27 = vshll.u32 %v8001_v44, 16  ;;  %v8020_v3 = vld [vmem:[%s6906_s30 + $0x98] sm:$0x1]  ;;  %v3949_v50 = vshll.u32 %v8008_v25, 16  ;;  %v3953_v52 = vshrl.u32 %v8008_v25, 16  ;;  %v3898_v22 = vor.u32 %v3897_v8, %v3894_v31 }
  0xed   : > { %6311 = vmatmul.mubr.msk.bf16.gmra.mrb[28].mxu0 %vm750_vm3, %v6738_v61  ;;  %v7991_v61 = vrot.slane %v3853_v6, 5  ;;  %v3883_v6 = vrot.slane %v3881_v34, 4  ;;  %v3931_v34 = vrot.slane %v3929_v23, 4  ;;  %v3911_v33 = vshll.u32 %v8011_v2, 16 }
  0xee   : > { %6159 = vmatmul.mubr.msk.bf16.gmra.mrb[12].mxu1 %vm750_vm3, %v8805_v7  ;;  %6316 = vmatprep.mubr.msk.bf16.mxu0 %vm750_vm3, %v7733_v20  ;;  %v3873_v7 = vrot.slane %v3871_v49, 5  ;;  %v8003_v20 = vrot.slane %v3877_v46, 5  ;;  %v3863_v49 = vshll.u32 %v7983_v45, 16  ;;  %v8015_v46 = vrot.slane %v3925_v63, 5 }
  0xef   : > { %6162 = vmatprep.mubr.msk.bf16.mxu1 %vm750_vm3, %v8806_v62  ;;  %v3940_v62 = vshrl.u32 %v5741_v48, 16  ;;  %v3860_v4 = vor.u32 %v3859_v59, %v7991_v61  ;;  %v3908_v23 = vor.u32 %v3907_v51, %v8005_v10  ;;  %v3922_v59 = vor.u32 %v3921_v57, %v3918_v17  ;;  %v8053_v57 = vld [vmem:[%s6906_s30 + $0xa4] sm:$0x1] }
  0xf0   : > { %v3874_v53 = vor.u32 %v3873_v7, %v3870_v60  ;;  %v3884_v48 = vor.u32 %v3883_v6, %v8003_v20  ;;  %v3945_v18 = vrot.slane %v3943_v9, 5  ;;  %v8808_v44 = vcombine.low %v7680_v11, %v7684_v40 }
  0xf1   : > { %v3942_v63 = vrot.slane %v3940_v62, 4  ;;  %v8809_v31 = vrot.slane %v7942_v54, 5  ;;  %v3865_v51 = vrot.slane %v3863_v49, 5  ;;  %v3932_v60 = vor.u32 %v3931_v34, %v8015_v46  ;;  %v8056_v34 = vld [vmem:[%s6906_s30 + $0xac] sm:$0xf] }
  0xf2   : > { %v3935_v9 = vshll.u32 %v8020_v3, 16  ;;  %v8810_v11 = vcombine.low %v7752_v39, %v7756_v55  ;;  %v3851_v40 = vrot.slane %v3850_v26, 4  ;;  %v8049_v54 = vrot.slane %v3949_v50, 5 }
  0xf3   : > { %v3875_v7 = vrot.slane %v3874_v53, 4  ;;  %v3885_v6 = vrot.slane %v3884_v48, 4  ;;  %v3889_v8 = vrot.slane %v3887_v27, 5  ;;  %v3913_v17 = vrot.slane %v3911_v33, 5  ;;  %v8066_v48 = vld [vmem:[%s6906_s30 + $0xb0] sm:$0x1] }
  0xf4   : > { %v3899_v39 = vrot.slane %v3898_v22, 4  ;;  %v3909_v55 = vrot.slane %v3908_v23, 4  ;;  %v3923_v62 = vrot.slane %v3922_v59, 4  ;;  %v3946_v49 = vor.u32 %v3945_v18, %v3942_v63 }
  0xf5   : > { %6317 = vmatmul.mubr.msk.bf16.vlgmr.msra.gmra.mrb[0].mxu0 %vm750_vm3, %v7796_v16  ;;  %v8039_v16 = vsel %vm7158_vm7, %v7964_v28, %v8809_v31  ;;  %v3955_v28 = vrot.slane %v3953_v52, 4  ;;  %v3937_v26 = vrot.slane %v3935_v9, 5  ;;  %v3856_v52 = vsel %vm6932_vm4, %v3851_v40, %v7991_v61 }
  0xf6   : > { %6163 = vmatmul.mubr.msk.bf16.gmra.mrb[16].mxu1 %vm750_vm3, %v8808_v44  ;;  %6349 = vmatpush3.bf16.msra.mxu0 %v7737_v14  ;;  %v3861_v14 = vrot.slane %v3860_v4, 4  ;;  %v5744_v44 = vld [vmem:[%s6906_s30 + $0xa8] sm:$0xf]  ;;  %v3959_v22 = vshll.u32 %v8053_v57, 16  ;;  %v3880_v33 = vsel %vm6932_vm4, %v3875_v7, %v8003_v20  ;;  %v3890_v23 = vsel %vm6932_vm4, %v3885_v6, %v3889_v8 }
  0xf7   : > { %6166 = vmatprep.mubr.msk.bf16.mxu1 %vm750_vm3, %v8810_v11  ;;  %6320 = vmatprep.mubr.msk.bf16.mxu0 %vm750_vm3, %v7807_v29  ;;  %v3933_v29 = vrot.slane %v3932_v60, 4  ;;  %v3964_v4 = vshrl.u32 %v5744_v44, 16  ;;  %v3967_v50 = vshll.u32 %v5744_v44, 16  ;;  %v3956_v53 = vor.u32 %v3955_v28, %v8049_v54  ;;  %v5793_v11 = vld [vmem:[%s6906_s30 + $0x48] sm:$0xe] }
  0xf8   : > { %v3866_v27 = vsel %vm6932_vm4, %v3861_v14, %v3865_v51  ;;  %v3973_v59 = vshll.u32 %v8056_v34, 16  ;;  %v3977_v61 = vshrl.u32 %v8056_v34, 16  ;;  %v3904_v63 = vsel %vm6932_vm4, %v3899_v39, %v8005_v10  ;;  %v8131_v39 = vld [vmem:[%s6906_s30 + $0xb8] sm:$0xf] }
  0xf9   : > { %v3914_v18 = vsel %vm6932_vm4, %v3909_v55, %v3913_v17  ;;  %v3928_v20 = vsel %vm6932_vm4, %v3923_v62, %v8015_v46  ;;  %v3947_v31 = vrot.slane %v3946_v49, 4  ;;  %v8811_v51 = vcombine.low %v7769_v12, %v7784_v35 }
  0xfa   : > { %v3966_v10 = vrot.slane %v3964_v4, 4  ;;  %v3969_v60 = vrot.slane %v3967_v50, 5  ;;  %v3983_v9 = vshll.u32 %v8066_v48, 16  ;;  %v8812_v46 = vcombine.low %v7854_v21, %v7879_v56  ;;  %v5747_v21 = vld [vmem:[%s6906_s30 + $0xb4] sm:$0xf] }
  0xfb   : > { %v5414_v12 = vcombine.low %v7930_v42, %v7937_v47  ;;  %v8813_v35 = vsel %vm6932_vm4, %v7950_v5, %v7939_v41  ;;  %v3957_v14 = vrot.slane %v3956_v53, 4  ;;  %v3961_v28 = vrot.slane %v3959_v22, 5  ;;  %v5795_v4 = vld [vmem:[%s6906_s30 + $0x60] sm:$0xe]  ;;  %v5796_v53 = vld [vmem:[%s6906_s30 + $0x6c] sm:$0xe] }
  0xfc   : > { %v5415_v56 = vcombine.low %v7954_v43, %v8039_v16  ;;  %v8114_v44 = vcombine.low %v3856_v52, %v3866_v27  ;;  %v8116_v42 = vrot.slane %v3973_v59, 5  ;;  %v3979_v47 = vrot.slane %v3977_v61, 4  ;;  %v8822_v16 = vld [vmem:[#allocation4_spill] sm:$0xff] }
  0xfd   : > { %6321 = vmatmul.mubr.msk.bf16.gmra.mrb[4].mxu0 %vm750_vm3, %v7910_v37  ;;  %v3938_v37 = vsel %vm6932_vm4, %v3933_v29, %v3937_v26  ;;  %v8118_v41 = vcombine.low %v3880_v33, %v3890_v23  ;;  %v8120_v5 = vcombine.low %v3904_v63, %v3914_v18  ;;  %v3952_v6 = vsel %vm6932_vm4, %v3947_v31, %v8049_v54  ;;  %v8815_v23 = vld [vmem:[#allocation11_spill] sm:$0xff]  ;;  %v5750_v63 = vld [vmem:[%s6906_s30 + $0xc0] sm:$0xf]  ;;  %v8817_v18 = vld [vmem:[#allocation9_spill] sm:$0xff] }
  0xfe   : > { %6167 = vmatmul.mubr.msk.bf16.gmra.mrb[20].mxu1 %vm750_vm3, %v8811_v51  ;;  %6324 = vmatprep.mubr.msk.bf16.mxu0 %vm750_vm3, %v7924_v58  ;;  %v8814_v58 = vsel %vm6932_vm4, %v7912_v19, %v7867_v1  ;;  %v8122_v7 = vcombine.low %v3928_v20, %v3938_v37  ;;  %v5809_v1 = vrot.slane %v5793_v11, 9  ;;  %v5794_v19 = vld [vmem:[%s6906_s30 + $0x54] sm:$0xe]  ;;  %v3970_v8 = vor.u32 %v3969_v60, %v3966_v10  ;;  %v8818_v31 = vld [vmem:[#allocation10_spill] sm:$0xff] }
  0xff   : > { %6170 = vmatprep.mubr.msk.bf16.mxu1 %vm750_vm3, %v8812_v46  ;;  %v5763_v40 = vcombine.low %v8814_v58, %v8813_v35  ;;  %v8128_v17 = vrot.slane %v3983_v9, 5  ;;  %v3988_v55 = vshrl.u32 %v5747_v21, 16  ;;  %v3962_v62 = vsel %vm6932_vm4, %v3957_v14, %v3961_v28  ;;  %v8819_v9 = vld [vmem:[#allocation12_spill] sm:$0xff]  ;;  %v8180_v35 = vld [vmem:[%s6906_s30 + $0xbc] sm:$0x1] }
 0x100   : > { %v3991_v49 = vshll.u32 %v5747_v21, 16  ;;  %v4447_v29 = vrot.slane %v7762_v0, 5  ;;  %v4450_v26 = vrot.slane %v7816_v38, 5  ;;  %v3980_v50 = vor.u32 %v3979_v47, %v8116_v42  ;;  %v8183_v58 = vld [vmem:[%s6906_s30 + $0xc4] sm:$0xf] }
 0x101   : > { %v5810_v52 = vrot.slane %v5794_v19, 9  ;;  %v4454_v54 = vrot.slane %v7773_v24, 5  ;;  %v4457_v27 = vrot.slane %v7825_v15, 5  ;;  %v3997_v22 = vshll.u32 %v8131_v39, 16  ;;  %v5797_v19 = vld [vmem:[%s6906_s30 + $0x78] sm:$0xe] }
 0x102   : > { %v4001_v33 = vshrl.u32 %v8131_v39, 16  ;;  %v8148_v0 = vsel %vm7158_vm7, %v5809_v1, %v4447_v29  ;;  %v4449_v38 = vrot.slane %v4447_v29, 4  ;;  %v8816_v59 = vcombine.low %v7887_v36, %v8815_v23  ;;  %v8820_v23 = vld [vmem:[#allocation13_spill] sm:$0xff] }
 0x103   : > { %v8155_v24 = vcombine.low %v3952_v6, %v3962_v62  ;;  %v8159_v15 = vsel %vm7158_vm7, %v5810_v52, %v4454_v54  ;;  %v5811_v61 = vrot.slane %v5795_v4, 9  ;;  %v4461_v20 = vrot.slane %v8817_v18, 5  ;;  %v6739_v6 = vld [vmem:[%s6906_s30 + $0xc] sm:$0xff]  }
 0x104   : > { %v8165_v36 = vsel %vm7158_vm7, %v4449_v38, %v4450_v26  ;;  %v4464_v51 = vrot.slane %v8818_v31, 5  ;;  %v5812_v37 = vrot.slane %v5796_v53, 9  ;;  %v4468_v11 = vrot.slane %v8819_v9, 5 }
 0x105   : > { %6325 = vmatmul.mubr.msk.bf16.gmra.mrb[8].mxu0 %vm750_vm3, %v7933_v30  ;;  %v4456_v30 = vrot.slane %v4454_v54, 4  ;;  %v5826_v10 = vcombine.low %v8148_v0, %v8165_v36  ;;  %v4471_v46 = vrot.slane %v7983_v45, 5  ;;  %v8189_v14 = vsel %vm7158_vm7, %v5811_v61, %v4461_v20 }
 0x106   : > { %6171 = vmatmul.mubr.msk.bf16.gmra.mrb[24].mxu1 %vm750_vm3, %v8816_v59  ;;  %6328 = vmatprep.mubr.msk.bf16.mxu0 %vm750_vm3, %v5763_v40  ;;  %v4463_v28 = vrot.slane %v4461_v20, 4  ;;  %v8191_v21 = vrot.slane %v3988_v55, 4  ;;  %v4012_v47 = vshrl.u32 %v5750_v63, 16  ;;  %v8195_v45 = vsel %vm7158_vm7, %v5812_v37, %v4468_v11  ;;  %v5524_v55 = vld [vmem:[%s6906_s30 + $0x78] sm:$0xf]  ;;  %v8821_v59 = vld [vmem:[#allocation16_spill] sm:$0xff] }
 0x107   : > { %6174 = vmatprep.mubr.msk.bf16.mxu1 %vm750_vm3, %v5414_v12  ;;  %v8173_v60 = vsel %vm7158_vm7, %v4456_v30, %v4457_v27  ;;  %v8177_v12 = vrot.slane %v3970_v8, 4  ;;  %v4470_v1 = vrot.slane %v4468_v11, 4  ;;  %v8199_v8 = vrot.slane %v3980_v50, 4 }
 0x108   : > { %v5827_v40 = vcombine.low %v8159_v15, %v8173_v60  ;;  %v8201_v62 = vrot.slane %v3991_v49, 5  ;;  %v4015_v29 = vshll.u32 %v5750_v63, 16  ;;  %v8205_v26 = vsel %vm7158_vm7, %v4463_v28, %v4464_v51  ;;  %v8824_v28 = vld [vmem:[#allocation14_spill] sm:$0xff] }
 0x109   : > { %v8208_v4 = vrot.slane %v3997_v22, 5  ;;  %v8210_v52 = vrot.slane %v4001_v33, 4  ;;  %v5828_v54 = vcombine.low %v8189_v14, %v8205_v26  ;;  %v8216_v27 = vsel %vm7158_vm7, %v4470_v1, %v4471_v46  ;;  %v5798_v33 = vld [vmem:[%s6906_s30 + $0x84] sm:$0xe]  ;;  %v6740_v1 = vld [vmem:[%s6906_s30 + $0x18] sm:$0xff]  }
 0x10a   : > { %v4007_v49 = vshll.u32 %v8180_v35, 16  ;;  %v4021_v50 = vshll.u32 %v8183_v58, 16  ;;  %v5829_v53 = vcombine.low %v8195_v45, %v8216_v27  ;;  %v5813_v22 = vrot.slane %v5797_v19, 9  ;;  %v6802_v60 = vld [vmem:[%s6906_s30 + $0xa0] sm:$0xf] }
 0x10b   : > { %v4014_v38 = vrot.slane %v4012_v47, 4  ;;  %v4478_v30 = vrot.slane %v8821_v59, 5  ;;  %v2337_v61 = vshrl.u32 %v5524_v55, 16  ;;  %v4017_v63 = vrot.slane %v4015_v29, 5  ;;  %v5753_v29 = vld [vmem:[%s6906_s30 + $0xcc] sm:$0xf] }
 0x10c   : > { %v4025_v18 = vshrl.u32 %v8183_v58, 16  ;;  %v2340_v43 = vshll.u32 %v5524_v55, 16  ;;  %v5814_v37 = vrot.slane %v5798_v33, 9  ;;  %v3976_v9 = vsel %vm6932_vm4, %v8177_v12, %v8116_v42  ;;  %v8259_v55 = vld [vmem:[%s6906_s30 + $0xd0] sm:$0xf] }
 0x10d   : > { %6329 = vmatmul.mubr.msk.bf16.gmra.mrb[12].mxu0 %vm750_vm3, %v8114_v44  ;;  %v4475_v44 = vrot.slane %v8820_v23, 5  ;;  %v2339_v51 = vrot.slane %v2337_v61, 4  ;;  %v3994_v11 = vor.u32 %v8201_v62, %v8191_v21  ;;  %v4482_v47 = vrot.slane %v8824_v28, 5  ;;  %v6741_v21 = vld [vmem:[%s6906_s30 + $0x24] sm:$0xff]   ;;  %v6806_v27 = vld [vmem:[%s6906_s30 + $0xac] sm:$0xf] }
 0x10e   : > { %6175 = vmatmul.mubr.msk.bf16.gmra.mrb[28].mxu1 %vm750_vm3, %v5415_v56  ;;  %6332 = vmatprep.mubr.msk.bf16.mxu0 %vm750_vm3, %v8118_v41  ;;  %v8823_v56 = vld [vmem:[#allocation5_spill] sm:$0xff]  ;;  %v2342_v46 = vrot.slane %v2340_v43, 5  ;;  %v3986_v19 = vsel %vm6932_vm4, %v8199_v8, %v8128_v17  ;;  %v4485_v12 = vrot.slane %v8011_v2, 5  ;;  %v8267_v62 = vrot.slane %v4021_v50, 5  ;;  %v5799_v8 = vld [vmem:[%s6906_s30 + $0x90] sm:$0xe] }
 0x10f   : > { %6180 = vmatprep.mubr.msk.bf16.mxu1 %vm750_vm3, %v6739_v6  ;;  %v2359_v41 = vsel %vm6932_vm4, %v8823_v56, %v8822_v16  ;;  %v8241_v20 = vsel %vm7158_vm7, %v5813_v22, %v4475_v44  ;;  %v4477_v31 = vrot.slane %v4475_v44, 4  ;;  %v4004_v6 = vor.u32 %v8210_v52, %v8208_v4  ;;  %v8273_v52 = vld [vmem:[%s6906_s30 + $0xc8] sm:$0x1]  ;;  %v8826_v16 = vld [vmem:[#allocation2_spill] sm:$0xff] }
 0x110   : > { %v4027_v22 = vrot.slane %v4025_v18, 4  ;;  %v2343_v17 = vor.u32 %v2342_v46, %v2339_v51  ;;  %v4009_v23 = vrot.slane %v4007_v49, 5  ;;  %v4018_v44 = vor.u32 %v4017_v63, %v4014_v38  ;;  %v8827_v51 = vld [vmem:[#allocation3_spill] sm:$0xff] }
 0x111   : > { %v8263_v42 = vsel %vm7158_vm7, %v4477_v31, %v4478_v30  ;;  %v8277_v59 = vsel %vm7158_vm7, %v5814_v37, %v4482_v47  ;;  %v4484_v30 = vrot.slane %v4482_v47, 4  ;;  %v4036_v2 = vshrl.u32 %v5753_v29, 16 }
 0x112   : > { %v5830_v33 = vcombine.low %v8241_v20, %v8263_v42  ;;  %v4039_v50 = vshll.u32 %v5753_v29, 16  ;;  %v4045_v61 = vshll.u32 %v8259_v55, 16  ;;  %v2344_v18 = vrot.slane %v2343_v17, 4  ;;  %v6742_v29 = vld [vmem:[%s6906_s30 + $0x30] sm:$0xff]  }
 0x113   : > { %v4049_v49 = vshrl.u32 %v8259_v55, 16  ;;  %v8288_v38 = vsel %vm7158_vm7, %v4484_v30, %v4485_v12  ;;  %v5815_v63 = vrot.slane %v5799_v8, 9  ;;  %v4028_v56 = vor.u32 %v4027_v22, %v8267_v62 }
 0x114   : > { %v4031_v31 = vshll.u32 %v8273_v52, 16  ;;  %v5831_v37 = vcombine.low %v8277_v59, %v8288_v38  ;;  %v5769_v46 = vcombine.low %v3976_v9, %v3986_v19  ;;  %v3995_v28 = vrot.slane %v3994_v11, 4  ;;  %v5800_v11 = vld [vmem:[%s6906_s30 + $0x9c] sm:$0xe] }
 0x115   : > { %6333 = vmatmul.mubr.msk.bf16.gmra.mrb[16].mxu0 %vm750_vm3, %v8120_v5  ;;  %v8825_v5 = vld [vmem:[#allocation15_spill] sm:$0xff]  ;;  %v4005_v47 = vrot.slane %v4004_v6, 4  ;;  %v4019_v12 = vrot.slane %v4018_v44, 4  ;;  %v4492_v8 = vrot.slane %v8020_v3, 5  ;;  %v4038_v30 = vrot.slane %v4036_v2, 4  ;;  %v6743_v19 = vld [vmem:[%s6906_s30 + $0x3c] sm:$0xff]  }
 0x116   : > { %6181 = vmatmul.mubr.msk.bf16.vlgmr.msra.gmra.mrb[0].mxu1 %vm750_vm3, %v6740_v1  ;;  %6336 = vmatprep.mubr.msk.bf16.mxu0 %vm750_vm3, %v8122_v7  ;;  %v4489_v43 = vrot.slane %v8825_v5, 5  ;;  %v2349_v7 = vsel %vm6932_vm4, %v2344_v18, %v8827_v51  ;;  %v4041_v18 = vrot.slane %v4039_v50, 5  ;;  %v8311_v5 = vrot.slane %v4045_v61, 5 }
 0x117   : > { %6383 = vmatpush3.bf16.msra.mxu1 %v8826_v16  ;;  %6184 = vmatprep.mubr.msk.bf16.mxu1 %vm750_vm3, %v6741_v21  ;;  %v8300_v1 = vcombine.low %v2349_v7, %v2359_v41  ;;  %v8304_v21 = vld [vmem:[%s6906_s30 + $0xd4] sm:$0x1]  ;;  %v4051_v9 = vrot.slane %v4049_v49, 4  ;;  %v4029_v41 = vrot.slane %v4028_v56, 4  ;;  %v4033_v6 = vrot.slane %v4031_v31, 5 }
 0x118   : > { %v8308_v22 = vsel %vm7158_vm7, %v5815_v63, %v4489_v43  ;;  %v4491_v17 = vrot.slane %v4489_v43, 4  ;;  %v4000_v63 = vsel %vm6932_vm4, %v3995_v28, %v8208_v4  ;;  %v4010_v2 = vsel %vm6932_vm4, %v4005_v47, %v4009_v23  ;;  %v6793_v16 = vld [vmem:[%s6906_s30 + $0x1c] sm:$0xf]  ;;  %v5801_v28 = vld [vmem:[%s6906_s30 + $0xa8] sm:$0xe] }
 0x119   : > { %v4055_v50 = vshll.u32 %v8304_v21, 16  ;;  %v5816_v61 = vrot.slane %v5800_v11, 9  ;;  %v4496_v49 = vrot.slane %v8008_v25, 5  ;;  %v4024_v4 = vsel %vm6932_vm4, %v4019_v12, %v8267_v62  ;;  %v5789_v62 = vld [vmem:[%s6906_s30 + $0x18] sm:$0xe]  ;;  %v6744_v47 = vld [vmem:[%s6906_s30 + $0x48] sm:$0xff]  }
 0x11a   : > { %v8317_v44 = vsel %vm7158_vm7, %v4491_v17, %v4492_v8  ;;  %v4052_v43 = vor.u32 %v4051_v9, %v8311_v5  ;;  %v4499_v23 = vrot.slane %v8053_v57, 5  ;;  %v4034_v25 = vsel %vm6932_vm4, %v4029_v41, %v4033_v6  ;;  %v6794_v11 = vld [vmem:[%s6906_s30 + $0x20] sm:$0x1] }
 0x11b   : > { %v5832_v3 = vcombine.low %v8308_v22, %v8317_v44  ;;  %v4419_v56 = vrot.slane %v6793_v16, 5  ;;  %v8343_v31 = vsel %vm7158_vm7, %v5816_v61, %v4496_v49  ;;  %v4498_v51 = vrot.slane %v4496_v49, 4  ;;  %v5802_v49 = vld [vmem:[%s6906_s30 + $0xb4] sm:$0xe] }
 0x11c   : > { %v5770_v7 = vcombine.low %v4000_v63, %v4010_v2  ;;  %v4053_v17 = vrot.slane %v4052_v43, 4  ;;  %v5817_v41 = vrot.slane %v5801_v28, 9  ;;  %v4503_v6 = vrot.slane %v8056_v34, 5  ;;  %v5790_v2 = vld [vmem:[%s6906_s30 + $0x24] sm:$0xe] }
 0x11d   : > { %6337 = vmatmul.mubr.msk.bf16.gmra.mrb[20].mxu0 %vm750_vm3, %v8155_v24  ;;  %v4042_v24 = vor.u32 %v4041_v18, %v4038_v30  ;;  %v8348_v57 = vsel %vm7158_vm7, %v4498_v51, %v4499_v23  ;;  %v6745_v30 = vld [vmem:[%s6906_s30 + $0x54] sm:$0xff]   ;;  %v5805_v18 = vrot.slane %v5789_v62, 9  ;;  %v4421_v9 = vrot.slane %v4419_v56, 4  ;;  %v6797_v28 = vld [vmem:[%s6906_s30 + $0x2c] sm:$0x1] }
 0x11e   : > { %6185 = vmatmul.mubr.msk.bf16.gmra.mrb[4].mxu1 %vm750_vm3, %v6742_v29  ;;  %6340 = vmatprep.mubr.msk.bf16.mxu0 %vm750_vm3, %v5769_v46  ;;  %v4057_v46 = vrot.slane %v4055_v50, 5  ;;  %v5771_v29 = vcombine.low %v4024_v4, %v4034_v25  ;;  %v5833_v8 = vcombine.low %v8343_v31, %v8348_v57  ;;  %v4506_v63 = vrot.slane %v8066_v48, 5  ;;  %v6795_v50 = vld [vmem:[%s6906_s30 + $0x28] sm:$0xf]  ;;  %v5791_v25 = vld [vmem:[%s6906_s30 + $0x30] sm:$0xe] }
 0x11f   : > { %6188 = vmatprep.mubr.msk.bf16.mxu1 %vm750_vm3, %v6743_v19  ;;  %v4043_v12 = vrot.slane %v4042_v24, 4  ;;  %v4422_v19 = vrot.slane %v6794_v11, 5  ;;  %v4426_v61 = vrot.slane %v6795_v50, 5  ;;  %v8371_v48 = vsel %vm7158_vm7, %v5817_v41, %v4503_v6  ;;  %v6747_v11 = vld [vmem:[%s6906_s30 + $0x6c] sm:$0xff]   ;;  %v8828_v41 = vld [vmem:[#allocation6_spill] sm:$0xff] }
 0x120   : > { %v4058_v34 = vsel %vm6932_vm4, %v4053_v17, %v4057_v46  ;;  %v4505_v24 = vrot.slane %v4503_v6, 4  ;;  %v4420_v43 = vsel %vm7158_vm7, %v5805_v18, %v4419_v56  ;;  %v5806_v51 = vrot.slane %v5790_v2, 9  ;;  %v5803_v50 = vld [vmem:[%s6906_s30 + $0xc0] sm:$0xe]  ;;  %v6811_v31 = vld [vmem:[%s6906_s30 + $0xc8] sm:$0x1] }
 0x121   : > { %v4048_v4 = vsel %vm6932_vm4, %v4043_v12, %v8311_v5  ;;  %v4423_v23 = vsel %vm7158_vm7, %v4421_v9, %v4422_v19  ;;  %v6796_v5 = vld [vmem:[%s6906_s30 + $0x34] sm:$0xf]  ;;  %v6746_v12 = vld [vmem:[%s6906_s30 + $0x60] sm:$0xff]   ;;  %v5807_v18 = vrot.slane %v5791_v25, 9  ;;  %v4513_v9 = vrot.slane %v8180_v35, 5 }
 0x122   : > { %v4433_v16 = vrot.slane %v6796_v5, 5  ;;  %v8382_v62 = vsel %vm7158_vm7, %v4505_v24, %v4506_v63  ;;  %v5772_v46 = vcombine.low %v4048_v4, %v4058_v34  ;;  %v5822_v17 = vcombine.low %v4420_v43, %v4423_v23  ;;  %v5792_v24 = vld [vmem:[%s6906_s30 + $0x3c] sm:$0xe] }
 0x123   : > { %v5834_v56 = vcombine.low %v8371_v48, %v8382_v62  ;;  %v4436_v6 = vrot.slane %v8828_v41, 5  ;;  %v4427_v35 = vsel %vm7158_vm7, %v5806_v51, %v4426_v61  ;;  %v5819_v5 = vrot.slane %v5803_v50, 9 }
 0x124   : > { %v4435_v19 = vrot.slane %v4433_v16, 4  ;;  %v4434_v23 = vsel %vm7158_vm7, %v5807_v18, %v4433_v16  ;;  %v4520_v51 = vrot.slane %v8273_v52, 5  ;;  %v2500_v57 = vshll.u32 %v6811_v31, 16 }
 0x125   : > { %6341 = vmatmul.mubr.msk.bf16.gmra.mrb[24].mxu0 %vm750_vm3, %v5770_v7  ;;  %v5818_v7 = vrot.slane %v5802_v49, 9 }
 0x126   : > { %6189 = vmatmul.mubr.msk.bf16.gmra.mrb[8].mxu1 %vm750_vm3, %v6744_v47  ;;  %6344 = vmatprep.mubr.msk.bf16.mxu0 %vm750_vm3, %v5771_v29  ;;  %v4429_v47 = vrot.slane %v6797_v28, 5  ;;  %v4510_v29 = vrot.slane %v8131_v39, 5  ;;  %v8829_v39 = vld [vmem:[#allocation7_spill] sm:$0xff]  ;;  %v4437_v25 = vsel %vm7158_vm7, %v4435_v19, %v4436_v6  ;;  %v5808_v28 = vrot.slane %v5792_v24, 9 }
 0x127   : > { %6192 = vmatprep.mubr.msk.bf16.mxu1 %vm750_vm3, %v6745_v30  ;;  %v4428_v30 = vrot.slane %v4426_v61, 4  ;;  %v4440_v49 = vrot.slane %v8829_v39, 5  ;;  %v4517_v61 = vrot.slane %v8183_v58, 5  ;;  %v6798_v39 = vld [vmem:[%s6906_s30 + $0x70] sm:$0xf]  ;;  %v4524_v24 = vrot.slane %v8259_v55, 5 }
 0x128   : > { %v8394_v63 = vsel %vm7158_vm7, %v5818_v7, %v4510_v29  ;;  %v4512_v2 = vrot.slane %v4510_v29, 4  ;;  %v5521_v7 = vld [vmem:[%s6906_s30 + $0x6c] sm:$0xf]  ;;  %v8830_v29 = vld [vmem:[#allocation8_spill] sm:$0xff] }
 0x129   : > { %v4430_v34 = vsel %vm7158_vm7, %v4428_v30, %v4429_v47  ;;  %v4442_v47 = vrot.slane %v4440_v49, 4  ;;  %v6748_v30 = vld [vmem:[%s6906_s30 + $0x78] sm:$0xff]   ;;  %v8425_v16 = vsel %vm7158_vm7, %v5819_v5, %v4517_v61  ;;  %v4519_v18 = vrot.slane %v4517_v61, 4 }
 0x12a   : > { %v8401_v4 = vsel %vm7158_vm7, %v4512_v2, %v4513_v9  ;;  %v5824_v9 = vcombine.low %v4434_v23, %v4437_v25  ;;  %v2313_v19 = vshrl.u32 %v5521_v7, 16  ;;  %v2316_v41 = vshll.u32 %v5521_v7, 16 }
 0x12b   : > { %v5835_v43 = vcombine.low %v8394_v63, %v8401_v4  ;;  %v8430_v58 = vsel %vm7158_vm7, %v4519_v18, %v4520_v51  ;;  %v4441_v6 = vsel %vm7158_vm7, %v5808_v28, %v4440_v49  ;;  %v4527_v49 = vrot.slane %v8304_v21, 5  ;;  %v6750_v51 = vld [vmem:[%s6906_s30 + $0x90] sm:$0xff]   ;;  %v6751_v21 = vld [vmem:[%s6906_s30 + $0x9c] sm:$0xff]  }
 0x12c   : > { %v5836_v50 = vcombine.low %v8425_v16, %v8430_v58  ;;  %v2315_v23 = vrot.slane %v2313_v19, 4  ;;  %v2318_v25 = vrot.slane %v2316_v41, 5  ;;  %v4526_v7 = vrot.slane %v4524_v24, 4 }
 0x12d   : > { %6345 = vmatmul.mubr.msk.bf16.gmra.mrb[28].mxu0 %vm750_vm3, %v5772_v46  ;;  %v5823_v46 = vcombine.low %v4427_v35, %v4430_v34  ;;  %v2322_v35 = vshll.u32 %v6798_v39, 16  ;;  %v2326_v34 = vshrl.u32 %v6798_v39, 16 }
 0x12e   : > { %6193 = vmatmul.mubr.msk.bf16.gmra.mrb[12].mxu1 %vm750_vm3, %v6746_v12  ;;  %6350 = vmatprep.mubr.msk.bf16.mxu0 %vm750_vm3, %v5822_v17  ;;  %v4443_v12 = vrot.slane %v8830_v29, 5  ;;  %v5804_v17 = vld [vmem:[%s6906_s30 + $0xcc] sm:$0xe]  ;;  %v8452_v55 = vsel %vm7158_vm7, %v4526_v7, %v4527_v49 }
 0x12f   : > { %6196 = vmatprep.mubr.msk.bf16.mxu1 %vm750_vm3, %v6747_v11  ;;  %v6749_v11 = vld [vmem:[%s6906_s30 + $0x84] sm:$0xff]   ;;  %v5820_v52 = vrot.slane %v5804_v17, 9  ;;  %v2328_v28 = vrot.slane %v2326_v34, 4  ;;  %v6799_v17 = vld [vmem:[%s6906_s30 + $0x74] sm:$0x1] }
 0x130   : > { %v4444_v2 = vsel %vm7158_vm7, %v4442_v47, %v4443_v12  ;;  %v5527_v47 = vld [vmem:[%s6906_s30 + $0x84] sm:$0xf]  ;;  %v2319_v12 = vor.u32 %v2318_v25, %v2315_v23  ;;  %v6753_v34 = vld [vmem:[%s6906_s30 + $0xb4] sm:$0xff]  }
 0x131   : > { %v8447_v5 = vsel %vm7158_vm7, %v5820_v52, %v4524_v24  ;;  %v5825_v61 = vcombine.low %v4441_v6, %v4444_v2  ;;  %v2364_v18 = vshll.u32 %v5527_v47, 16  ;;  %v5530_v6 = vld [vmem:[%s6906_s30 + $0x90] sm:$0xf]  ;;  %v6752_v2 = vld [vmem:[%s6906_s30 + $0xa8] sm:$0xff]  }
 0x132   : > { %v5837_v29 = vcombine.low %v8447_v5, %v8452_v55  ;;  %v2320_v52 = vrot.slane %v2319_v12, 4  ;;  %v2385_v23 = vshrl.u32 %v5530_v6, 16  ;;  %v2388_v25 = vshll.u32 %v5530_v6, 16 }
 0x133   : > { %v2418_v12 = vshll.u32 %v6802_v60, 16 }
 0x134   : > { %v2390_v14 = vrot.slane %v2388_v25, 5  ;;  %v6805_v25 = vld [vmem:[%s6906_s30 + $0xa4] sm:$0x1] }
 0x135   : > { %6351 = vmatmul.mubr.msk.bf16.vlgmr.msra.gmra.mrb[0].mxu0 %vm750_vm3, %v5823_v46  ;;  %v2324_v46 = vrot.slane %v2322_v35, 5  ;;  %v5533_v35 = vld [vmem:[%s6906_s30 + $0x9c] sm:$0xf]  ;;  %v8494_v6 = vrot.slane %v2418_v12, 5 }
 0x136   : > { %6197 = vmatmul.mubr.msk.bf16.gmra.mrb[16].mxu1 %vm750_vm3, %v6748_v30  ;;  %6354 = vmatprep.mubr.msk.bf16.mxu0 %vm750_vm3, %v5824_v9  ;;  %v2332_v30 = vshll.u32 %v6799_v17, 16  ;;  %v2361_v9 = vshrl.u32 %v5527_v47, 16  ;;  %v2412_v47 = vshll.u32 %v5533_v35, 16  ;;  %v6803_v17 = vld [vmem:[%s6906_s30 + $0x8c] sm:$0x1] }
 0x137   : > { %6200 = vmatprep.mubr.msk.bf16.mxu1 %vm750_vm3, %v6749_v11  ;;  %v2329_v13 = vor.u32 %v2328_v28, %v2324_v46  ;;  %v6800_v11 = vld [vmem:[%s6906_s30 + $0x88] sm:$0xf]  ;;  %v2325_v7 = vsel %vm6932_vm4, %v2320_v52, %v2324_v46 }
 0x138   : > { %v2370_v19 = vshll.u32 %v6800_v11, 16  ;;  %v2374_v41 = vshrl.u32 %v6800_v11, 16  ;;  %v2334_v0 = vrot.slane %v2332_v30, 5  ;;  %v2363_v36 = vrot.slane %v2361_v9, 4 }
 0x139   : > { %v2330_v39 = vrot.slane %v2329_v13, 4  ;;  %v2380_v30 = vshll.u32 %v6803_v17, 16  ;;  %v2387_v9 = vrot.slane %v2385_v23, 4  ;;  %v2414_v11 = vrot.slane %v2412_v47, 5 }
 0x13a   : > { %v8471_v24 = vrot.slane %v2370_v19, 5  ;;  %v2376_v49 = vrot.slane %v2374_v41, 4  ;;  %v6754_v19 = vld [vmem:[%s6906_s30 + $0xc0] sm:$0xff]  }
 0x13b   : > { %v2335_v46 = vsel %vm6932_vm4, %v2330_v39, %v2334_v0  ;;  %v5536_v39 = vld [vmem:[%s6906_s30 + $0xa8] sm:$0xf] }
 0x13c   : > { %v2377_v13 = vor.u32 %v2376_v49, %v8471_v24  ;;  %v5554_v41 = vcombine.low %v2325_v7, %v2335_v46  ;;  %v2428_v7 = vshll.u32 %v6805_v25, 16  ;;  %v2436_v45 = vshll.u32 %v5536_v39, 16 }
 0x13d   : > { %6355 = vmatmul.mubr.msk.bf16.gmra.mrb[4].mxu0 %vm750_vm3, %v5825_v61  ;;  %v6801_v61 = vld [vmem:[%s6906_s30 + $0x94] sm:$0xf] }
 0x13e   : > { %6201 = vmatmul.mubr.msk.bf16.gmra.mrb[20].mxu1 %vm750_vm3, %v6750_v51  ;;  %6358 = vmatprep.mubr.msk.bf16.mxu0 %vm750_vm3, %v5826_v10  ;;  %v2366_v10 = vrot.slane %v2364_v18, 5  ;;  %v2394_v51 = vshll.u32 %v6801_v61, 16  ;;  %v2398_v28 = vshrl.u32 %v6801_v61, 16  ;;  %v2378_v0 = vrot.slane %v2377_v13, 4 }
 0x13f   : > { %6204 = vmatprep.mubr.msk.bf16.mxu1 %vm750_vm3, %v6751_v21  ;;  %v2409_v21 = vshrl.u32 %v5533_v35, 16  ;;  %v6804_v35 = vld [vmem:[%s6906_s30 + $0x98] sm:$0x1]  ;;  %v2433_v61 = vshrl.u32 %v5536_v39, 16  ;;  %v5542_v39 = vld [vmem:[%s6906_s30 + $0xc0] sm:$0xf] }
 0x140   : > { %v2367_v15 = vor.u32 %v2366_v10, %v2363_v36  ;;  %v8491_v26 = vrot.slane %v2394_v51, 5  ;;  %v2382_v36 = vrot.slane %v2380_v30, 5  ;;  %v2391_v10 = vor.u32 %v2390_v14, %v2387_v9  ;;  %v5539_v51 = vld [vmem:[%s6906_s30 + $0xb4] sm:$0xf] }
 0x141   : > { %v2411_v18 = vrot.slane %v2409_v21, 4  ;;  %v2446_v21 = vshrl.u32 %v6806_v27, 16  ;;  %v2457_v20 = vshrl.u32 %v5539_v51, 16  ;;  %v2460_v42 = vshll.u32 %v5539_v51, 16 }
 0x142   : > { %v2368_v52 = vrot.slane %v2367_v15, 4  ;;  %v2383_v46 = vsel %vm6932_vm4, %v2378_v0, %v2382_v36  ;;  %v2392_v15 = vrot.slane %v2391_v10, 4  ;;  %v2430_v30 = vrot.slane %v2428_v7, 5 }
 0x143   : > { %v2415_v23 = vor.u32 %v2414_v11, %v2411_v18  ;;  %v2435_v9 = vrot.slane %v2433_v61, 4  ;;  %v2448_v11 = vrot.slane %v2446_v21, 4  ;;  %v6810_v61 = vld [vmem:[%s6906_s30 + $0xbc] sm:$0x1] }
 0x144   : > { %v2373_v47 = vsel %vm6932_vm4, %v2368_v52, %v8471_v24  ;;  %v2397_v0 = vsel %vm6932_vm4, %v2392_v15, %v8491_v26  ;;  %v2476_v22 = vshll.u32 %v6810_v61, 16 }
 0x145   : > { %6359 = vmatmul.mubr.msk.bf16.gmra.mrb[8].mxu0 %vm750_vm3, %v5827_v40  ;;  %v2422_v40 = vshrl.u32 %v6802_v60, 16  ;;  %v2416_v17 = vrot.slane %v2415_v23, 4  ;;  %v5556_v24 = vcombine.low %v2373_v47, %v2383_v46 }
 0x146   : > { %6205 = vmatmul.mubr.msk.bf16.gmra.mrb[24].mxu1 %vm750_vm3, %v6752_v2  ;;  %6362 = vmatprep.mubr.msk.bf16.mxu0 %vm750_vm3, %v5828_v54  ;;  %v2400_v54 = vrot.slane %v2398_v28, 4 }
 0x147   : > { %6208 = vmatprep.mubr.msk.bf16.mxu1 %vm750_vm3, %v6753_v34  ;;  %v2424_v2 = vrot.slane %v2422_v40, 4  ;;  %v2404_v34 = vshll.u32 %v6804_v35, 16  ;;  %v2421_v10 = vsel %vm6932_vm4, %v2416_v17, %v8494_v6  ;;  %v2502_v17 = vrot.slane %v2500_v57, 5 }
 0x148   : > { %v2401_v49 = vor.u32 %v2400_v54, %v8491_v26  ;;  %v2438_v54 = vrot.slane %v2436_v45, 5  ;;  %v6808_v26 = vld [vmem:[%s6906_s30 + $0xb0] sm:$0x1] }
 0x149   : > { %v2425_v28 = vor.u32 %v2424_v2, %v8494_v6  ;;  %v2406_v60 = vrot.slane %v2404_v34, 5  ;;  %v2452_v35 = vshll.u32 %v6808_v26, 16  ;;  %v2481_v34 = vshrl.u32 %v5542_v39, 16 }
 0x14a   : > { %v2402_v13 = vrot.slane %v2401_v49, 4  ;;  %v2439_v38 = vor.u32 %v2438_v54, %v2435_v9  ;;  %v2484_v6 = vshll.u32 %v5542_v39, 16  ;;  %v6809_v49 = vld [vmem:[%s6906_s30 + $0xc4] sm:$0xf] }
 0x14b   : > { %v2426_v14 = vrot.slane %v2425_v28, 4  ;;  %v2490_v23 = vshll.u32 %v6809_v49, 16  ;;  %v2494_v25 = vshrl.u32 %v6809_v49, 16  ;;  %v2454_v45 = vrot.slane %v2452_v35, 5 }
 0x14c   : > { %v2407_v36 = vsel %vm6932_vm4, %v2402_v13, %v2406_v60  ;;  %v2440_v51 = vrot.slane %v2439_v38, 4  ;;  %v2478_v60 = vrot.slane %v2476_v22, 5 }
 0x14d   : > { %6363 = vmatmul.mubr.msk.bf16.gmra.mrb[12].mxu0 %vm750_vm3, %v5829_v53  ;;  %v2442_v53 = vshll.u32 %v6806_v27, 16  ;;  %v2431_v59 = vsel %vm6932_vm4, %v2426_v14, %v2430_v30  ;;  %v5557_v44 = vcombine.low %v2397_v0, %v2407_v36  ;;  %v2483_v27 = vrot.slane %v2481_v34, 4  ;;  %v8606_v36 = vld [vmem:[%s8762_s3] ss:$0 sm:$0xff] }
 0x14e   : > { %6209 = vmatmul.mubr.msk.bf16.gmra.mrb[28].mxu1 %vm750_vm3, %v6754_v19  ;;  %6366 = vmatprep.mubr.msk.bf16.mxu0 %vm750_vm3, %v5830_v33  ;;  %v6807_v33 = vld [vmem:[%s6906_s30 + $0xb8] sm:$0xf]  ;;  %v2459_v19 = vrot.slane %v2457_v20, 4  ;;  %v2492_v21 = vrot.slane %v2490_v23, 5  ;;  %v2496_v47 = vrot.slane %v2494_v25, 4 }
 0x14f   : > { %6230 = vmatprep.mubr.msk.bf16.mxu1 %vm750_vm3, %v5554_v41  ;;  %v2466_v12 = vshll.u32 %v6807_v33, 16  ;;  %v2470_v40 = vshrl.u32 %v6807_v33, 16  ;;  %v2444_v18 = vrot.slane %v2442_v53, 5  ;;  %v2462_v41 = vrot.slane %v2460_v42, 5 }
 0x150   : > { %v2486_v53 = vrot.slane %v2484_v6, 5 }
 0x151   : > { %v2468_v52 = vrot.slane %v2466_v12, 5  ;;  %v2472_v2 = vrot.slane %v2470_v40, 4  ;;  %v2445_v20 = vsel %vm6932_vm4, %v2440_v51, %v2444_v18  ;;  %v2497_v12 = vor.u32 %v2496_v47, %v2492_v21 }
 0x152   : > { %v2487_v33 = vor.u32 %v2486_v53, %v2483_v27 }
 0x153   : > { %v2473_v7 = vor.u32 %v2472_v2, %v2468_v52  ;;  %v2498_v13 = vrot.slane %v2497_v12, 4  ;;  %v8601_v2 = vld [vmem:[%s8761_s2] ss:$0 sm:$0xff] }
 0x154   : > { %v2488_v40 = vrot.slane %v2487_v33, 4 }
 0x155   : > { %6367 = vmatmul.mubr.msk.bf16.gmra.mrb[16].mxu0 %vm750_vm3, %v5831_v37  ;;  %v2449_v37 = vor.u32 %v2448_v11, %v2444_v18  ;;  %v2474_v15 = vrot.slane %v2473_v7, 4  ;;  %v2503_v9 = vsel %vm6932_vm4, %v2498_v13, %v2502_v17 }
 0x156   : > { %6231 = vmatmul.mubr.msk.bf16.vlgmr.msra.gmra.mrb[16].mxu1 %vm750_vm3, %v8300_v1  ;;  %6370 = vmatprep.mubr.msk.bf16.mxu0 %vm750_vm3, %v5832_v3  ;;  %v2463_v1 = vor.u32 %v2462_v41, %v2459_v19  ;;  %v5558_v3 = vcombine.low %v2421_v10, %v2431_v59  ;;  %v2493_v30 = vsel %vm6932_vm4, %v2488_v40, %v2492_v21 }
 0x157   : > { %6234 = vmatprep.mubr.msk.bf16.mxu1 %vm750_vm3, %v5556_v24  ;;  %v2450_v28 = vrot.slane %v2449_v37, 4  ;;  %v2479_v48 = vsel %vm6932_vm4, %v2474_v15, %v2478_v60  ;;  %v5561_v14 = vcombine.low %v2493_v30, %v2503_v9 }
 0x158   : > { %v2464_v46 = vrot.slane %v2463_v1, 4 }
 0x159   : > { %v2455_v42 = vsel %vm6932_vm4, %v2450_v28, %v2454_v45 }
 0x15a   : > { %v5559_v62 = vcombine.low %v2445_v20, %v2455_v42 }
 0x15d   : > { %6371 = vmatmul.mubr.msk.bf16.gmra.mrb[20].mxu0 %vm750_vm3, %v5833_v8  ;;  %v2469_v8 = vsel %vm6932_vm4, %v2464_v46, %v2468_v52 }
 0x15e   : > { %6235 = vmatmul.mubr.msk.bf16.gmra.mrb[20].mxu1 %vm750_vm3, %v5557_v44  ;;  %6374 = vmatprep.mubr.msk.bf16.mxu0 %vm750_vm3, %v5834_v56  ;;  %v5560_v56 = vcombine.low %v2469_v8, %v2479_v48 }
 0x15f   : > { %6238 = vmatprep.mubr.msk.bf16.mxu1 %vm750_vm3, %v5558_v3 }
 0x165   : > { %6375 = vmatmul.mubr.msk.bf16.gmra.mrb[24].mxu0 %vm750_vm3, %v5835_v43 }
 0x166   : > { %6239 = vmatmul.mubr.msk.bf16.gmra.mrb[24].mxu1 %vm750_vm3, %v5559_v62  ;;  %6378 = vmatprep.mubr.msk.bf16.mxu0 %vm750_vm3, %v5836_v50 }
 0x167   : > { %6242 = vmatprep.mubr.msk.bf16.mxu1 %vm750_vm3, %v5560_v56 }
 0x16d   : > { %6379 = vmatmul.mubr.msk.bf16.gmra.mrb[28].mxu0 %vm750_vm3, %v5837_v29 }
 0x16e   : > { %6243 = vmatmul.mubr.msk.bf16.gmra.mrb[28].mxu1 %vm750_vm3, %v5561_v14 }
 0x1e9   : > { %v6182_v63 = vpop.f32.mrb[0].mxu1 }
 0x1ea   : > { %v1913_v4 = vpop.f32.mrb[1].mxu1 }
 0x1eb   : > { %v6183_v43 = vpop.f32.mrb[2].mxu1 }
 0x1ec   : > { %v1916_v16 = vpop.f32.mrb[3].mxu1 }
 0x1f1   : > { %v6186_v58 = vpop.f32.mrb[4].mxu1 }
 0x1f2   : > { %v1929_v50 = vpop.f32.mrb[5].mxu1 }
 0x1f3   : > { %v6187_v54 = vpop.f32.mrb[6].mxu1 }
 0x1f4   : > { %v1932_v18 = vpop.f32.mrb[7].mxu1 }
 0x1f9   : > { %v8582_v11 = vpop.f32.mrb[8].mxu1 }
 0x1fa   : > { %v8584_v32 = vpop.f32.mrb[9].mxu1 }
 0x1fb   : > { %v8586_v24 = vpop.f32.mrb[10].mxu1 }
 0x1fc   : > { %v8588_v19 = vpop.f32.mrb[11].mxu1 }
 0x201   : > { %v8590_v5 = vpop.f32.mrb[12].mxu1 }
 0x202   : > { %v8592_v55 = vpop.f32.mrb[13].mxu1 }
 0x203   : > { %v8594_v29 = vpop.f32.mrb[14].mxu1 }
 0x204   : > { %v8596_v41 = vpop.f32.mrb[15].mxu1 }
 0x208   : > { %v6352_v52 = vpop.f32.mrb[0].mxu0 }
 0x209   : > { %v6384_v39 = vadd.f32 %v6352_v52, %v6182_v63  ;;  %v4664_v0 = vpop.f32.mrb[1].mxu0 }
 0x20a   : > { %v6385_v10 = vadd.f32 %v4664_v0, %v1913_v4  ;;  %v6353_v59 = vpop.f32.mrb[2].mxu0 }
 0x20b   : > { %v4832_v38 = vmul.f32 %v6384_v39, %v8601_v2  ;;  %v6386_v37 = vadd.f32 %v6353_v59, %v6183_v43  ;;  %v4667_v26 = vpop.f32.mrb[3].mxu0 }
 0x20c   : > { %v4830_v35 = vmul.f32 %v6385_v10, %v8601_v2  ;;  %v6387_v34 = vadd.f32 %v4667_v26, %v1916_v16 }
 0x20d   : > { %v4871_v6 = vadd.f32 %v8606_v36, %v4832_v38  ;;  %v4833_v49 = vmul.f32 %v6386_v37, %v8601_v2 }
 0x20e   : > { %v4869_v23 = vadd.f32 %v8606_v36, %v4830_v35  ;;  %v4831_v25 = vmul.f32 %v6387_v34, %v8601_v2 }
 0x20f   : > { %v6653_v1 = vround.rtne.f32 %v4871_v6  ;;  %v4872_v7 = vadd.f32 %v8606_v36, %v4833_v49 }
 0x210   : > { %v6651_v61 = vround.rtne.f32 %v4869_v23  ;;  %v4870_v22 = vadd.f32 %v8606_v36, %v4831_v25  ;;  %v6356_v44 = vpop.f32.mrb[4].mxu0 }
 0x211   : > { %v4935_v3 = vmax.f32 %v6653_v1, 0.0  ;;  %v6654_v51 = vround.rtne.f32 %v4872_v7  ;;  %v6388_v28 = vadd.f32 %v6356_v44, %v6186_v58  ;;  %v4680_v45 = vpop.f32.mrb[5].mxu0 }
 0x212   : > { %v4933_v27 = vmax.f32 %v6651_v61, 0.0  ;;  %v6652_v53 = vround.rtne.f32 %v4870_v22  ;;  %v6389_v21 = vadd.f32 %v4680_v45, %v1929_v50  ;;  %v6357_v47 = vpop.f32.mrb[6].mxu0 }
 0x213   : > { %v4967_v46 = vmin.f32 %v4935_v3, 15.0  ;;  %v4936_v15 = vmax.f32 %v6654_v51, 0.0  ;;  %v4836_v60 = vmul.f32 %v6388_v28, %v8601_v2  ;;  %v6390_v20 = vadd.f32 %v6357_v47, %v6187_v54  ;;  %v4683_v42 = vpop.f32.mrb[7].mxu0 }
 0x214   : > { %v4965_v33 = vmin.f32 %v4933_v27, 15.0  ;;  %v4934_v12 = vmax.f32 %v6652_v53, 0.0  ;;  %v4834_v31 = vmul.f32 %v6389_v21, %v8601_v2  ;;  %v6391_v57 = vadd.f32 %v4683_v42, %v1932_v18 }
 0x215   : > { %v4999_v8 = vmul.f32 0.4, %v4967_v46  ;;  %v4968_v48 = vmin.f32 %v4936_v15, 15.0  ;;  %v4875_v62 = vadd.f32 %v8606_v36, %v4836_v60  ;;  %v4837_v56 = vmul.f32 %v6390_v20, %v8601_v2 }
 0x216   : > { %v4997_v40 = vmul.f32 0.4, %v4965_v33  ;;  %v4966_v13 = vmin.f32 %v4934_v12, 15.0  ;;  %v4873_v17 = vadd.f32 %v8606_v36, %v4834_v31  ;;  %v4835_v30 = vmul.f32 %v6391_v57, %v8601_v2 }
 0x217   : > { %v5893_v9 = vpack.c.bf16 %v4999_v8, %v4999_v8  ;;  %v5000_v14 = vmul.f32 0.4, %v4968_v48  ;;  %v6657_v63 = vround.rtne.f32 %v4875_v62  ;;  %v4876_v4 = vadd.f32 %v8606_v36, %v4837_v56 }
 0x218   : > { %v5891_v43 = vpack.c.bf16 %v4997_v40, %v4997_v40  ;;  %v4998_v16 = vmul.f32 0.4, %v4966_v13  ;;  %v6655_v58 = vround.rtne.f32 %v4873_v17  ;;  %v4874_v50 = vadd.f32 %v8606_v36, %v4835_v30  ;;  %v6360_v54 = vpop.f32.mrb[8].mxu0 }
 0x219   : > { %5160 = vst.msk [vmem:[%s8624_s15 + $0x8] sm:$0xf] %vm5157_vm8, %v5893_v9  ;;  %v5894_v18 = vpack.c.bf16 %v5000_v14, %v5000_v14  ;;  %v4939_v52 = vmax.f32 %v6657_v63, 0.0  ;;  %v6658_v39 = vround.rtne.f32 %v4876_v4  ;;  %v6392_v0 = vadd.f32 %v6360_v54, %v8582_v11  ;;  %v4696_v10 = vpop.f32.mrb[9].mxu0 }
 0x21a   : > { %5158 = vst.msk [vmem:[%s8624_s15] sm:$0xf] %vm5157_vm8, %v5891_v43  ;;  %v5892_v59 = vpack.c.bf16 %v4998_v16, %v4998_v16  ;;  %v4937_v38 = vmax.f32 %v6655_v58, 0.0  ;;  %v6656_v37 = vround.rtne.f32 %v4874_v50  ;;  %v6393_v26 = vadd.f32 %v4696_v10, %v8584_v32  ;;  %v6361_v35 = vpop.f32.mrb[10].mxu0 }
 0x21b   : > { %5161 = vst.msk [vmem:[%s8624_s15 + $0xc] sm:$0xf] %vm5157_vm8, %v5894_v18  ;;  %v4971_v34 = vmin.f32 %v4939_v52, 15.0  ;;  %v4940_v6 = vmax.f32 %v6658_v39, 0.0  ;;  %v4840_v49 = vmul.f32 %v6392_v0, %v8601_v2  ;;  %v6394_v23 = vadd.f32 %v6361_v35, %v8586_v24  ;;  %v4699_v25 = vpop.f32.mrb[11].mxu0 }
 0x21c   : > { %5159 = vst.msk [vmem:[%s8624_s15 + $0x4] sm:$0xf] %vm5157_vm8, %v5892_v59  ;;  %v4969_v11 = vmin.f32 %v4937_v38, 15.0  ;;  %v4938_v1 = vmax.f32 %v6656_v37, 0.0  ;;  %v4838_v7 = vmul.f32 %v6393_v26, %v8601_v2  ;;  %v6395_v61 = vadd.f32 %v4699_v25, %v8588_v19 }
 0x21d   : > { %v5003_v22 = vmul.f32 0.4, %v4971_v34  ;;  %v4972_v32 = vmin.f32 %v4940_v6, 15.0  ;;  %v4879_v44 = vadd.f32 %v8606_v36, %v4840_v49  ;;  %v4841_v3 = vmul.f32 %v6394_v23, %v8601_v2 }
 0x21e   : > { %v5001_v51 = vmul.f32 0.4, %v4969_v11  ;;  %v4970_v28 = vmin.f32 %v4938_v1, 15.0  ;;  %v4877_v24 = vadd.f32 %v8606_v36, %v4838_v7  ;;  %v4839_v45 = vmul.f32 %v6395_v61, %v8601_v2 }
 0x21f   : > { %v5897_v27 = vpack.c.bf16 %v5003_v22, %v5003_v22  ;;  %v5004_v53 = vmul.f32 0.4, %v4972_v32  ;;  %v6661_v21 = vround.rtne.f32 %v4879_v44  ;;  %v4880_v47 = vadd.f32 %v8606_v36, %v4841_v3 }
 0x220   : > { %v5895_v19 = vpack.c.bf16 %v5001_v51, %v5001_v51  ;;  %v5002_v46 = vmul.f32 0.4, %v4970_v28  ;;  %v6659_v15 = vround.rtne.f32 %v4877_v24  ;;  %v4878_v60 = vadd.f32 %v8606_v36, %v4839_v45  ;;  %v6364_v20 = vpop.f32.mrb[12].mxu0 }
 0x221   : > { %5164 = vst.msk [vmem:[%s8624_s15 + $0x18] sm:$0xf] %vm5157_vm8, %v5897_v27  ;;  %v5898_v42 = vpack.c.bf16 %v5004_v53, %v5004_v53  ;;  %v4943_v33 = vmax.f32 %v6661_v21, 0.0  ;;  %v6662_v12 = vround.rtne.f32 %v4880_v47  ;;  %v6396_v31 = vadd.f32 %v6364_v20, %v8590_v5  ;;  %v4712_v57 = vpop.f32.mrb[13].mxu0 }
 0x222   : > { %5162 = vst.msk [vmem:[%s8624_s15 + $0x10] sm:$0xf] %vm5157_vm8, %v5895_v19  ;;  %v5896_v8 = vpack.c.bf16 %v5002_v46, %v5002_v46  ;;  %v4941_v48 = vmax.f32 %v6659_v15, 0.0  ;;  %v6660_v62 = vround.rtne.f32 %v4878_v60  ;;  %v6397_v56 = vadd.f32 %v4712_v57, %v8592_v55  ;;  %v6365_v40 = vpop.f32.mrb[14].mxu0 }
 0x223   : > { %5165 = vst.msk [vmem:[%s8624_s15 + $0x1c] sm:$0xf] %vm5157_vm8, %v5898_v42  ;;  %v4975_v13 = vmin.f32 %v4943_v33, 15.0  ;;  %v4944_v17 = vmax.f32 %v6662_v12, 0.0  ;;  %v4844_v30 = vmul.f32 %v6396_v31, %v8601_v2  ;;  %v6398_v9 = vadd.f32 %v6365_v40, %v8594_v29  ;;  %v4715_v14 = vpop.f32.mrb[15].mxu0 }
 0x224   : > { %5163 = vst.msk [vmem:[%s8624_s15 + $0x14] sm:$0xf] %vm5157_vm8, %v5896_v8  ;;  %v4973_v5 = vmin.f32 %v4941_v48, 15.0  ;;  %v4942_v63 = vmax.f32 %v6660_v62, 0.0  ;;  %v4842_v4 = vmul.f32 %v6397_v56, %v8601_v2  ;;  %v6399_v43 = vadd.f32 %v4715_v14, %v8596_v41 }
 0x225   : > { %v5007_v16 = vmul.f32 0.4, %v4975_v13  ;;  %v4976_v55 = vmin.f32 %v4944_v17, 15.0  ;;  %v4883_v58 = vadd.f32 %v8606_v36, %v4844_v30  ;;  %v4845_v50 = vmul.f32 %v6398_v9, %v8601_v2 }
 0x226   : > { %v5005_v54 = vmul.f32 0.4, %v4973_v5  ;;  %v4974_v18 = vmin.f32 %v4942_v63, 15.0  ;;  %v4881_v29 = vadd.f32 %v8606_v36, %v4842_v4  ;;  %v4843_v52 = vmul.f32 %v6399_v43, %v8601_v2 }
 0x227   : > { %v5901_v39 = vpack.c.bf16 %v5007_v16, %v5007_v16  ;;  %v5008_v0 = vmul.f32 0.4, %v4976_v55  ;;  %v6665_v10 = vround.rtne.f32 %v4883_v58  ;;  %v4884_v59 = vadd.f32 %v8606_v36, %v4845_v50 }
 0x228   : > { %v5899_v41 = vpack.c.bf16 %v5005_v54, %v5005_v54  ;;  %v5006_v38 = vmul.f32 0.4, %v4974_v18  ;;  %v6663_v37 = vround.rtne.f32 %v4881_v29  ;;  %v4882_v26 = vadd.f32 %v8606_v36, %v4843_v52  ;;  %v6368_v35 = vpop.f32.mrb[16].mxu0 }
 0x229   : > { %5168 = vst.msk [vmem:[%s8624_s15 + $0x28] sm:$0xf] %vm5157_vm8, %v5901_v39  ;;  %v5902_v34 = vpack.c.bf16 %v5008_v0, %v5008_v0  ;;  %v4947_v6 = vmax.f32 %v6665_v10, 0.0  ;;  %v6666_v49 = vround.rtne.f32 %v4884_v59  ;;  %v6232_v23 = vpop.f32.mrb[16].mxu1  ;;  %v4728_v25 = vpop.f32.mrb[17].mxu0 }
 0x22a   : > { %5166 = vst.msk [vmem:[%s8624_s15 + $0x20] sm:$0xf] %vm5157_vm8, %v5899_v41  ;;  %v5900_v11 = vpack.c.bf16 %v5006_v38, %v5006_v38  ;;  %v4945_v1 = vmax.f32 %v6663_v37, 0.0  ;;  %v6664_v7 = vround.rtne.f32 %v4882_v26  ;;  %v6400_v61 = vadd.f32 %v6368_v35, %v6232_v23  ;;  %v2703_v22 = vpop.f32.mrb[17].mxu1  ;;  %v6369_v32 = vpop.f32.mrb[18].mxu0 }
 0x22b   : > { %5169 = vst.msk [vmem:[%s8624_s15 + $0x2c] sm:$0xf] %vm5157_vm8, %v5902_v34  ;;  %v4979_v44 = vmin.f32 %v4947_v6, 15.0  ;;  %v4948_v3 = vmax.f32 %v6666_v49, 0.0  ;;  %v6401_v51 = vadd.f32 %v4728_v25, %v2703_v22  ;;  %v6233_v28 = vpop.f32.mrb[18].mxu1  ;;  %v4731_v24 = vpop.f32.mrb[19].mxu0 }
 0x22c   : > { %5167 = vst.msk [vmem:[%s8624_s15 + $0x24] sm:$0xf] %vm5157_vm8, %v5900_v11  ;;  %v4977_v45 = vmin.f32 %v4945_v1, 15.0  ;;  %v4946_v27 = vmax.f32 %v6664_v7, 0.0  ;;  %v4848_v53 = vmul.f32 %v6400_v61, %v8601_v2  ;;  %v6402_v21 = vadd.f32 %v6369_v32, %v6233_v28  ;;  %v2706_v47 = vpop.f32.mrb[19].mxu1 }
 0x22d   : > { %v5011_v19 = vmul.f32 0.4, %v4979_v44  ;;  %v4980_v46 = vmin.f32 %v4948_v3, 15.0  ;;  %v4846_v15 = vmul.f32 %v6401_v51, %v8601_v2  ;;  %v6403_v60 = vadd.f32 %v4731_v24, %v2706_v47 }
 0x22e   : > { %v5009_v20 = vmul.f32 0.4, %v4977_v45  ;;  %v4978_v42 = vmin.f32 %v4946_v27, 15.0  ;;  %v4887_v33 = vadd.f32 %v8606_v36, %v4848_v53  ;;  %v4849_v12 = vmul.f32 %v6402_v21, %v8601_v2 }
 0x22f   : > { %v5905_v31 = vpack.c.bf16 %v5011_v19, %v5011_v19  ;;  %v5012_v57 = vmul.f32 0.4, %v4980_v46  ;;  %v4885_v8 = vadd.f32 %v8606_v36, %v4846_v15  ;;  %v4847_v48 = vmul.f32 %v6403_v60, %v8601_v2 }
 0x230   : > { %v5903_v62 = vpack.c.bf16 %v5009_v20, %v5009_v20  ;;  %v5010_v56 = vmul.f32 0.4, %v4978_v42  ;;  %v6669_v40 = vround.rtne.f32 %v4887_v33  ;;  %v4888_v13 = vadd.f32 %v8606_v36, %v4849_v12  ;;  %v6372_v17 = vpop.f32.mrb[20].mxu0 }
 0x231   : > { %5172 = vst.msk [vmem:[%s8624_s15 + $0x38] sm:$0xf] %vm5157_vm8, %v5905_v31  ;;  %v5906_v30 = vpack.c.bf16 %v5012_v57, %v5012_v57  ;;  %v6667_v9 = vround.rtne.f32 %v4885_v8  ;;  %v4886_v14 = vadd.f32 %v8606_v36, %v4847_v48  ;;  %v6236_v5 = vpop.f32.mrb[20].mxu1  ;;  %v4744_v63 = vpop.f32.mrb[21].mxu0 }
 0x232   : > { %5170 = vst.msk [vmem:[%s8624_s15 + $0x30] sm:$0xf] %vm5157_vm8, %v5903_v62  ;;  %v5904_v4 = vpack.c.bf16 %v5010_v56, %v5010_v56  ;;  %v4951_v43 = vmax.f32 %v6669_v40, 0.0  ;;  %v6670_v16 = vround.rtne.f32 %v4888_v13  ;;  %v6404_v55 = vadd.f32 %v6372_v17, %v6236_v5  ;;  %v2719_v58 = vpop.f32.mrb[21].mxu1  ;;  %v6373_v50 = vpop.f32.mrb[22].mxu0 }
 0x233   : > { %5173 = vst.msk [vmem:[%s8624_s15 + $0x3c] sm:$0xf] %vm5157_vm8, %v5906_v30  ;;  %v4949_v54 = vmax.f32 %v6667_v9, 0.0  ;;  %v6668_v18 = vround.rtne.f32 %v4886_v14  ;;  %v6405_v29 = vadd.f32 %v4744_v63, %v2719_v58  ;;  %v6237_v52 = vpop.f32.mrb[22].mxu1  ;;  %v4747_v39 = vpop.f32.mrb[23].mxu0 }
 0x234   : > { %5171 = vst.msk [vmem:[%s8624_s15 + $0x34] sm:$0xf] %vm5157_vm8, %v5904_v4  ;;  %v4983_v0 = vmin.f32 %v4951_v43, 15.0  ;;  %v4952_v10 = vmax.f32 %v6670_v16, 0.0  ;;  %v4852_v59 = vmul.f32 %v6404_v55, %v8601_v2  ;;  %v6406_v41 = vadd.f32 %v6373_v50, %v6237_v52  ;;  %v2722_v38 = vpop.f32.mrb[23].mxu1 }
 0x235   : > { %v4981_v37 = vmin.f32 %v4949_v54, 15.0  ;;  %v4950_v26 = vmax.f32 %v6668_v18, 0.0  ;;  %v4850_v35 = vmul.f32 %v6405_v29, %v8601_v2  ;;  %v6407_v34 = vadd.f32 %v4747_v39, %v2722_v38 }
 0x236   : > { %v5015_v6 = vmul.f32 0.4, %v4983_v0  ;;  %v4984_v49 = vmin.f32 %v4952_v10, 15.0  ;;  %v4891_v23 = vadd.f32 %v8606_v36, %v4852_v59  ;;  %v4853_v25 = vmul.f32 %v6406_v41, %v8601_v2 }
 0x237   : > { %v5013_v11 = vmul.f32 0.4, %v4981_v37  ;;  %v4982_v1 = vmin.f32 %v4950_v26, 15.0  ;;  %v4889_v7 = vadd.f32 %v8606_v36, %v4850_v35  ;;  %v4851_v61 = vmul.f32 %v6407_v34, %v8601_v2 }
 0x238   : > { %v5909_v22 = vpack.c.bf16 %v5015_v6, %v5015_v6  ;;  %v5016_v32 = vmul.f32 0.4, %v4984_v49  ;;  %v6673_v44 = vround.rtne.f32 %v4891_v23  ;;  %v4892_v3 = vadd.f32 %v8606_v36, %v4853_v25  ;;  %v6376_v51 = vpop.f32.mrb[24].mxu0 }
 0x239   : > { %v5907_v28 = vpack.c.bf16 %v5013_v11, %v5013_v11  ;;  %v5014_v24 = vmul.f32 0.4, %v4982_v1  ;;  %v6671_v45 = vround.rtne.f32 %v4889_v7  ;;  %v4890_v27 = vadd.f32 %v8606_v36, %v4851_v61  ;;  %v6240_v53 = vpop.f32.mrb[24].mxu1  ;;  %v4760_v21 = vpop.f32.mrb[25].mxu0 }
 0x23a   : > { %5176 = vst.msk [vmem:[%s8624_s15 + $0x48] sm:$0xf] %vm5157_vm8, %v5909_v22  ;;  %v5910_v47 = vpack.c.bf16 %v5016_v32, %v5016_v32  ;;  %v4955_v19 = vmax.f32 %v6673_v44, 0.0  ;;  %v6674_v46 = vround.rtne.f32 %v4892_v3  ;;  %v6408_v15 = vadd.f32 %v6376_v51, %v6240_v53  ;;  %v2735_v60 = vpop.f32.mrb[25].mxu1  ;;  %v6377_v20 = vpop.f32.mrb[26].mxu0 }
 0x23b   : > { %5174 = vst.msk [vmem:[%s8624_s15 + $0x40] sm:$0xf] %vm5157_vm8, %v5907_v28  ;;  %v5908_v42 = vpack.c.bf16 %v5014_v24, %v5014_v24  ;;  %v4953_v33 = vmax.f32 %v6671_v45, 0.0  ;;  %v6672_v12 = vround.rtne.f32 %v4890_v27  ;;  %v6409_v31 = vadd.f32 %v4760_v21, %v2735_v60  ;;  %v6241_v57 = vpop.f32.mrb[26].mxu1  ;;  %v4763_v8 = vpop.f32.mrb[27].mxu0 }
 0x23c   : > { %5177 = vst.msk [vmem:[%s8624_s15 + $0x4c] sm:$0xf] %vm5157_vm8, %v5910_v47  ;;  %v4987_v48 = vmin.f32 %v4955_v19, 15.0  ;;  %v4956_v62 = vmax.f32 %v6674_v46, 0.0  ;;  %v4856_v56 = vmul.f32 %v6408_v15, %v8601_v2  ;;  %v6410_v40 = vadd.f32 %v6377_v20, %v6241_v57  ;;  %v2738_v13 = vpop.f32.mrb[27].mxu1 }
 0x23d   : > { %5175 = vst.msk [vmem:[%s8624_s15 + $0x44] sm:$0xf] %vm5157_vm8, %v5908_v42  ;;  %v4985_v17 = vmin.f32 %v4953_v33, 15.0  ;;  %v4954_v30 = vmax.f32 %v6672_v12, 0.0  ;;  %v4854_v9 = vmul.f32 %v6409_v31, %v8601_v2  ;;  %v6411_v14 = vadd.f32 %v4763_v8, %v2738_v13 }
 0x23e   : > { %v5019_v5 = vmul.f32 0.4, %v4987_v48  ;;  %v4988_v63 = vmin.f32 %v4956_v62, 15.0  ;;  %v4895_v4 = vadd.f32 %v8606_v36, %v4856_v56  ;;  %v4857_v43 = vmul.f32 %v6410_v40, %v8601_v2 }
 0x23f   : > { %v5017_v16 = vmul.f32 0.4, %v4985_v17  ;;  %v4986_v55 = vmin.f32 %v4954_v30, 15.0  ;;  %v4893_v58 = vadd.f32 %v8606_v36, %v4854_v9  ;;  %v4855_v50 = vmul.f32 %v6411_v14, %v8601_v2 }
 0x240   : > { %v5913_v54 = vpack.c.bf16 %v5019_v5, %v5019_v5  ;;  %v5020_v18 = vmul.f32 0.4, %v4988_v63  ;;  %v6677_v29 = vround.rtne.f32 %v4895_v4  ;;  %v4896_v52 = vadd.f32 %v8606_v36, %v4857_v43  ;;  %v6380_v39 = vpop.f32.mrb[28].mxu0 }
 0x241   : > { %v5911_v0 = vpack.c.bf16 %v5017_v16, %v5017_v16  ;;  %v5018_v10 = vmul.f32 0.4, %v4986_v55  ;;  %v6675_v59 = vround.rtne.f32 %v4893_v58  ;;  %v4894_v41 = vadd.f32 %v8606_v36, %v4855_v50  ;;  %v6244_v38 = vpop.f32.mrb[28].mxu1  ;;  %v4776_v37 = vpop.f32.mrb[29].mxu0 }
 0x242   : > { %5180 = vst.msk [vmem:[%s8624_s15 + $0x58] sm:$0xf] %vm5157_vm8, %v5913_v54  ;;  %v5914_v26 = vpack.c.bf16 %v5020_v18, %v5020_v18  ;;  %v4959_v35 = vmax.f32 %v6677_v29, 0.0  ;;  %v6678_v34 = vround.rtne.f32 %v4896_v52  ;;  %v6412_v6 = vadd.f32 %v6380_v39, %v6244_v38  ;;  %v2751_v49 = vpop.f32.mrb[29].mxu1  ;;  %v6381_v23 = vpop.f32.mrb[30].mxu0 }
 0x243   : > { %5178 = vst.msk [vmem:[%s8624_s15 + $0x50] sm:$0xf] %vm5157_vm8, %v5911_v0  ;;  %v5912_v25 = vpack.c.bf16 %v5018_v10, %v5018_v10  ;;  %v4957_v11 = vmax.f32 %v6675_v59, 0.0  ;;  %v6676_v1 = vround.rtne.f32 %v4894_v41  ;;  %v6413_v7 = vadd.f32 %v4776_v37, %v2751_v49  ;;  %v6245_v61 = vpop.f32.mrb[30].mxu1  ;;  %v4779_v22 = vpop.f32.mrb[31].mxu0 }
 0x244   : > { %5181 = vst.msk [vmem:[%s8624_s15 + $0x5c] sm:$0xf] %vm5157_vm8, %v5914_v26  ;;  %v4991_v32 = vmin.f32 %v4959_v35, 15.0  ;;  %v4960_v44 = vmax.f32 %v6678_v34, 0.0  ;;  %v4860_v3 = vmul.f32 %v6412_v6, %v8601_v2  ;;  %v6414_v51 = vadd.f32 %v6381_v23, %v6245_v61  ;;  %v2754_v28 = vpop.f32.mrb[31].mxu1 }
 0x245   : > { %5179 = vst.msk [vmem:[%s8624_s15 + $0x54] sm:$0xf] %vm5157_vm8, %v5912_v25  ;;  %v4989_v24 = vmin.f32 %v4957_v11, 15.0  ;;  %v4958_v45 = vmax.f32 %v6676_v1, 0.0  ;;  %v4858_v27 = vmul.f32 %v6413_v7, %v8601_v2  ;;  %v6415_v53 = vadd.f32 %v4779_v22, %v2754_v28 }
 0x246   : > { %v5023_v21 = vmul.f32 0.4, %v4991_v32  ;;  %v4992_v47 = vmin.f32 %v4960_v44, 15.0  ;;  %v4899_v19 = vadd.f32 %v8606_v36, %v4860_v3  ;;  %v4861_v46 = vmul.f32 %v6414_v51, %v8601_v2 }
 0x247   : > { %v5021_v15 = vmul.f32 0.4, %v4989_v24  ;;  %v4990_v60 = vmin.f32 %v4958_v45, 15.0  ;;  %v4897_v20 = vadd.f32 %v8606_v36, %v4858_v27  ;;  %v4859_v42 = vmul.f32 %v6415_v53, %v8601_v2 }
 0x248   : > { %v5917_v33 = vpack.c.bf16 %v5023_v21, %v5023_v21  ;;  %v5024_v12 = vmul.f32 0.4, %v4992_v47  ;;  %v6681_v31 = vround.rtne.f32 %v4899_v19  ;;  %v4900_v57 = vadd.f32 %v8606_v36, %v4861_v46 }
 0x249   : > { %v5915_v8 = vpack.c.bf16 %v5021_v15, %v5021_v15  ;;  %v5022_v48 = vmul.f32 0.4, %v4990_v60  ;;  %v6679_v62 = vround.rtne.f32 %v4897_v20  ;;  %v4898_v56 = vadd.f32 %v8606_v36, %v4859_v42 }
 0x24a   : > { %5184 = vst.msk [vmem:[%s8624_s15 + $0x68] sm:$0xf] %vm5157_vm8, %v5917_v33  ;;  %v5918_v40 = vpack.c.bf16 %v5024_v12, %v5024_v12  ;;  %v4963_v13 = vmax.f32 %v6681_v31, 0.0  ;;  %v6682_v17 = vround.rtne.f32 %v4900_v57 }
 0x24b   : > { %5182 = vst.msk [vmem:[%s8624_s15 + $0x60] sm:$0xf] %vm5157_vm8, %v5915_v8  ;;  %v5916_v2 = vpack.c.bf16 %v5022_v48, %v5022_v48  ;;  %v4961_v30 = vmax.f32 %v6679_v62, 0.0  ;;  %v6680_v9 = vround.rtne.f32 %v4898_v56 }
 0x24c   : > { %5185 = vst.msk [vmem:[%s8624_s15 + $0x6c] sm:$0xf] %vm5157_vm8, %v5918_v40  ;;  %v4995_v14 = vmin.f32 %v4963_v13, 15.0  ;;  %v4964_v5 = vmax.f32 %v6682_v17, 0.0 }
 0x24d   : > { %5183 = vst.msk [vmem:[%s8624_s15 + $0x64] sm:$0xf] %vm5157_vm8, %v5916_v2  ;;  %v4993_v36 = vmin.f32 %v4961_v30, 15.0  ;;  %v4962_v63 = vmax.f32 %v6680_v9, 0.0 }
 0x24e   : > { %v5027_v4 = vmul.f32 0.4, %v4995_v14  ;;  %v4996_v43 = vmin.f32 %v4964_v5, 15.0 }
 0x24f   : > { %v5025_v16 = vmul.f32 0.4, %v4993_v36  ;;  %v4994_v55 = vmin.f32 %v4962_v63, 15.0 }
 0x250   : > { %v5921_v58 = vpack.c.bf16 %v5027_v4, %v5027_v4  ;;  %v5028_v50 = vmul.f32 0.4, %v4996_v43 }
 0x251   : > { %v5919_v54 = vpack.c.bf16 %v5025_v16, %v5025_v16  ;;  %v5026_v18 = vmul.f32 0.4, %v4994_v55 }
 0x252   : > { %5188 = vst.msk [vmem:[%s8624_s15 + $0x78] sm:$0xf] %vm5157_vm8, %v5921_v58  ;;  %v5922_v29 = vpack.c.bf16 %v5028_v50, %v5028_v50 }
 0x253   : > { %5186 = vst.msk [vmem:[%s8624_s15 + $0x70] sm:$0xf] %vm5157_vm8, %v5919_v54  ;;  %v5920_v52 = vpack.c.bf16 %v5026_v18, %v5026_v18 }
 0x254   : > { %5189 = vst.msk [vmem:[%s8624_s15 + $0x7c] sm:$0xf] %vm5157_vm8, %v5922_v29 }
 0x255   : > { %5187 = vst.msk [vmem:[%s8624_s15 + $0x74] sm:$0xf] %vm5157_vm8, %v5920_v52 }
 0x256 PF: > { %s14_s17 = sadd.s32 1, %s6834_s17   ;;  %s8831_s15 = smov %s6830_s16 }
 0x257   : > { %p11_p5 = scmp.ge.s32.totalorder %s14_s17, 4   ;;  %s8832_s16 = smov %s8834_s18 }
 0x259   :  { %13 = sbr.rel (!%p11_p5) target bundleno = 2 (0x2), region = 85 }

</bundles_post_ra>
